<compile_context>
chip_gen: v5e
topology: v5e:2x2
jax: 0.10.0
libtpu: 0.0.40
codegen_flags: <defaults>
</compile_context>

<pallas_src>
import functools

import jax
import jax.numpy as jnp
from jax import lax
from jax.experimental import pallas as pl
from jax.experimental.pallas import tpu as pltpu

LANE = 128     # lane width; every activation is a lane-dense (C, 128) f32 slab
SLAB_W = 64    # lane width of the packed parameter slab (= max C_in of any layer)
MAX_B = 8      # batch rows packed on the sublane axis of the input slab

# Packed-parameter layout: (name, rows, cols).  Every block starts at a sublane offset
# that is a multiple of 8 and sits at lane offset 0 of the (R, 64) slab, so every
# in-kernel access is a cheap static ref slice.
_PARAM_BLOCKS = (
    ("e0w0", 16, 1), ("e0w1", 16, 1), ("e0w2", 16, 1), ("e0b", 16, 1),
    ("e1w0", 32, 16), ("e1w1", 32, 16), ("e1w2", 32, 16), ("e1b", 32, 1),
    ("e2w0", 64, 32), ("e2w1", 64, 32), ("e2w2", 64, 32), ("e2b", 64, 1),
    ("d0w0", 32, 64), ("d0w1", 32, 64), ("d0w2", 32, 64), ("d0b", 32, 1),
    ("d1w0", 16, 32), ("d1w1", 16, 32), ("d1w2", 16, 32), ("d1b", 16, 1),
    ("d2w0", 1, 16), ("d2w1", 1, 16), ("d2w2", 1, 16), ("d2b", 1, 1),
)


def _slab_layout():
    """name -> (row0, rows, cols), every block 8-row aligned."""
    layout, row = {}, 0
    for name, r, c in _PARAM_BLOCKS:
        layout[name] = (row, r, c)
        row += r + (-r % 8)
    return layout, row


# ------------------------------ Pallas kernel ------------------------------ #
def _fused_ae_kernel(x_ref, p_ref, o_ref, *, L, lay):
    f32 = jnp.float32

    # ---- one-time in-kernel constants (hoisted; shared by all layers/batch) ----
    col = lax.broadcasted_iota(jnp.int32, (1, LANE), 1)          # lane index
    src = lax.broadcasted_iota(jnp.int32, (LANE, LANE), 0)
    dst = lax.broadcasted_iota(jnp.int32, (LANE, LANE), 1)
    e_even = (dst == 2 * src).astype(f32)      # (y @ e_even)[:, 2m]   = y[:, m]
    e_odd = (dst == 2 * src + 1).astype(f32)   # (y @ e_odd)[:, 2m+1]  = y[:, m]

    def ld(name):                              # static slice of the parameter slab
        r0, nr, nc = lay[name]
        return p_ref[r0:r0 + nr, 0:nc]

    def mask_relu(y, valid):                   # ReLU, then zero lanes >= valid
        return jnp.where(col < valid, jnp.maximum(y, 0.0), 0.0)

    # Circular lane rotations on the XLU.  The wrapped-in column is harmless:
    # lanes >= each activation's valid length are exact zeros (masked), and the
    # only non-zero wrap (lane 127 of `nxt`) only ever feeds masked output lanes.
    def prv(v):                                # v[:, j-1]
        return pltpu.roll(v, shift=1, axis=1)

    def nxt(v):                                # v[:, j+1]
        return pltpu.roll(v, shift=LANE - 1, axis=1)

    def conv3(x, w, b, l_out):
        # Conv1d(k=3, s=1, p=1) + bias + ReLU: three accumulating MXU dots on
        # lane-shifted activations (no im2col concat materialized in VMEM).
        y = (jnp.dot(ld(w + "0"), prv(x), preferred_element_type=f32)
             + jnp.dot(ld(w + "1"), x, preferred_element_type=f32)
             + jnp.dot(ld(w + "2"), nxt(x), preferred_element_type=f32)
             + ld(b))
        return mask_relu(y, l_out)

    def convT_s2(x, w, b, l_in):
        # ConvTranspose1d(k=3, s=2, p=1, op=1) + bias + ReLU, polyphase form:
        #   out[2m] = B1 x[m],  out[2m+1] = B2 x[m] + B0 x[m+1],
        # with B_k[c_out, c_in] = w_t[c_in, c_out, k].  The two phases are
        # interleaved on the lane axis with the in-kernel-generated 0/1 matrices.
        even = jnp.dot(ld(w + "1"), x, preferred_element_type=f32)
        odd = (jnp.dot(ld(w + "2"), x, preferred_element_type=f32)
               + jnp.dot(ld(w + "0"), nxt(x), preferred_element_type=f32))
        y = (jnp.dot(even, e_even, preferred_element_type=f32)
             + jnp.dot(odd, e_odd, preferred_element_type=f32)
             + ld(b))
        return mask_relu(y, 2 * l_in)

    # Batch rows live on the sublane axis of the input slab, so the layer-0 lane
    # shifts are two rolls shared by the whole batch.
    x_all = x_ref[...]                         # (8, 128); rows 0..N-1 are valid
    xl_all, xr_all = prv(x_all), nxt(x_all)
    w00, w01, w02, b0 = ld("e0w0"), ld("e0w1"), ld("e0w2"), ld("e0b")

    for n in range(o_ref.shape[0]):            # tiny static unroll (N = 2)
        x0 = x_all[n:n + 1]                    # (1, 128)
        xl, xr = xl_all[n:n + 1], xr_all[n:n + 1]
        # encoder layer 0 (C_in = 1): broadcast FMAs on the VPU — a depth-1 MXU
        # contraction would waste the systolic array.
        h = mask_relu(w00 * xl + w01 * x0 + w02 * xr + b0, L)     # (16, 128)
        h = conv3(h, "e1w", "e1b", L)                             # (32, 128)
        h = conv3(h, "e2w", "e2b", L)                             # (64, 128)
        h = convT_s2(h, "d0w", "d0b", L)                          # (32, 128), len 2L
        h = convT_s2(h, "d1w", "d1b", 2 * L)                      # (16, 128), len 4L
        h = conv3(h, "d2w", "d2b", 4 * L)                         # (1, 128),  len 4L
        o_ref[n] = h                           # final ReLU kept (matches the module)


# ------------------- one-time parameter preparation ------------------------ #
def prepare_params(params):
    """Pack every weight/bias into ONE (R, 64) f32 slab -> a single HBM->VMEM DMA."""
    f32 = jnp.float32
    layout, rows = _slab_layout()

    pieces = {}
    for k in range(3):
        pieces[f"e0w{k}"] = params["enc0_w"][:, :, k]             # (16, 1)
        pieces[f"e1w{k}"] = params["enc1_w"][:, :, k]             # (32, 16)
        pieces[f"e2w{k}"] = params["enc2_w"][:, :, k]             # (64, 32)
        # stride-2 transpose convs -> polyphase taps B_k = w_t[:, :, k]^T
        pieces[f"d0w{k}"] = params["dec0_w"][:, :, k].T           # (32, 64)
        pieces[f"d1w{k}"] = params["dec1_w"][:, :, k].T           # (16, 32)
    # final stride-1 transpose conv == ordinary conv with flipped/transposed kernel
    w_conv = jnp.transpose(jnp.flip(params["dec2_w"], axis=2), (1, 0, 2))   # (1, 16, 3)
    for k in range(3):
        pieces[f"d2w{k}"] = w_conv[:, :, k]                       # (1, 16)
    pieces["e0b"] = params["enc0_b"].reshape(-1, 1)
    pieces["e1b"] = params["enc1_b"].reshape(-1, 1)
    pieces["e2b"] = params["enc2_b"].reshape(-1, 1)
    pieces["d0b"] = params["dec0_b"].reshape(-1, 1)
    pieces["d1b"] = params["dec1_b"].reshape(-1, 1)
    pieces["d2b"] = params["dec2_b"].reshape(-1, 1)

    slab = jnp.zeros((rows, SLAB_W), f32)
    for name, mat in pieces.items():
        r0, nr, nc = layout[name]
        slab = slab.at[r0:r0 + nr, 0:nc].set(jnp.asarray(mat, f32))
    return slab


# ----------------------------- forward (Pallas) ----------------------------- #
def forward(slab, x):
    n, c_in, L = x.shape
    assert c_in == 1, "model expects a single input channel"
    assert n <= MAX_B, "batch rows are packed on the sublane axis of one input slab"
    assert 4 * L < LANE, "sequence (plus the roll guard lane) must fit in 128 lanes"
    # TODO(synk): tile the length axis (extra grid dim) for sequences with 4*L >= 128;
    # size that tile against v7x's 32 MiB scoped / 64 MiB physical VMEM budget.

    xp = jnp.zeros((MAX_B, LANE), jnp.float32).at[:n, :L].set(
        x[:, 0, :].astype(jnp.float32))
    lay, _ = _slab_layout()

    out = pl.pallas_call(
        functools.partial(_fused_ae_kernel, L=L, lay=lay),
        out_shape=jax.ShapeDtypeStruct((n, 1, LANE), jnp.float32),
        grid=(1,),  # single step: whole net in one invocation, everything VMEM-resident
        in_specs=[pl.BlockSpec((MAX_B, LANE), lambda i: (0, 0)),
                  pl.BlockSpec(slab.shape, lambda i: (0, 0))],
        out_specs=pl.BlockSpec((n, 1, LANE), lambda i: (0, 0, 0)),
        compiler_params=pltpu.CompilerParams(dimension_semantics=("arbitrary",)),
    )(xp, slab)
    return out[:, :, :4 * L]


# ----------------------- parameter initialization -------------------------- #
def _uniform(key, shape, fan_in):
    bound = 1.0 / jnp.sqrt(jnp.float32(fan_in))
    return jax.random.uniform(key, shape, jnp.float32, -bound, bound)


def init_params(key):
    ks = jax.random.split(key, 12)
    p = {}
    enc = [(1, 16, 3), (16, 32, 3), (32, 64, 3)]
    for i, (ci, co, k) in enumerate(enc):
        p[f"enc{i}_w"] = _uniform(ks[2 * i], (co, ci, k), ci * k)
        p[f"enc{i}_b"] = _uniform(ks[2 * i + 1], (co,), ci * k)
    dec = [(64, 32, 3), (32, 16, 3), (16, 1, 3)]       # ConvTranspose1d: (C_in, C_out, K)
    for i, (ci, co, k) in enumerate(dec):
        p[f"dec{i}_w"] = _uniform(ks[6 + 2 * i], (ci, co, k), co * k)
        p[f"dec{i}_b"] = _uniform(ks[6 + 2 * i + 1], (co,), co * k)
    return p


# ------------------------- pure-JAX reference ------------------------------ #
def _ref_conv(x, w, b, padding):
    y = lax.conv_general_dilated(
        x, w, window_strides=(1,), padding=[(padding, padding)],
        dimension_numbers=("NCH", "OIH", "NCH"))
    return jnp.maximum(y + b[None, :, None], 0.0)


def _ref_convT(x, w_t, b, stride, padding, output_padding):
    K = w_t.shape[2]
    w_conv = jnp.transpose(jnp.flip(w_t, axis=2), (1, 0, 2))
    y = lax.conv_general_dilated(
        x, w_conv, window_strides=(1,),
        padding=[(K - 1 - padding, K - 1 - padding + output_padding)],
        lhs_dilation=(stride,),
        dimension_numbers=("NCH", "OIH", "NCH"))
    return jnp.maximum(y + b[None, :, None], 0.0)


def forward_ref(params, x):
    h = _ref_conv(x, params["enc0_w"], params["enc0_b"], 1)
    h = _ref_conv(h, params["enc1_w"], params["enc1_b"], 1)
    h = _ref_conv(h, params["enc2_w"], params["enc2_b"], 1)
    h = _ref_convT(h, params["dec0_w"], params["dec0_b"], 2, 1, 1)
    h = _ref_convT(h, params["dec1_w"], params["dec1_b"], 2, 1, 1)
    h = _ref_convT(h, params["dec2_w"], params["dec2_b"], 1, 1, 0)
    return h


if __name__ == "__main__":
    key = jax.random.PRNGKey(0)
    pkey, xkey = jax.random.split(key)
    params = init_params(pkey)
    slab = prepare_params(params)              # one-time weight packing (hoisted)

    # Conv1d(in_channels=1, ...) => input is (N, 1, L)
    N, C, L = 2, 1, 16
    x = jax.random.normal(xkey, (N, C, L), jnp.float32)

    fwd = jax.jit(forward)
    out = jax.block_until_ready(fwd(slab, x))
    assert out.shape == (N, 1, 4 * L), out.shape

    ref = jax.block_until_ready(forward_ref(params, x))
    assert jnp.allclose(out, ref, atol=1e-4, rtol=1e-4), "mismatch vs reference"

    print("KERNEL_OK")
</pallas_src>

<mosaic_0001>
module attributes {stable_mosaic.version = 11 : i64} {
  func.func @_fused_ae_kernel(%arg0: i32, %arg1: memref<8x128xf32, #tpu.memory_space<vmem>>, %arg2: memref<672x64xf32, #tpu.memory_space<vmem>>, %arg3: memref<2x1x128xf32, #tpu.memory_space<vmem>>) attributes {dimension_semantics = [#tpu.dimension_semantics<arbitrary>], iteration_bounds = array<i64: 1>, scalar_prefetch = 0 : i64, scratch_operands = 0 : i64, tpu.core_type = #tpu.core_type<tc>, window_params = [{pipeline_mode = #tpu.pipeline_mode<synchronous>, transform_indices = @transform_0, window_bounds = array<i64: 8, 128>}, {pipeline_mode = #tpu.pipeline_mode<synchronous>, transform_indices = @transform_1, window_bounds = array<i64: 672, 64>}, {pipeline_mode = #tpu.pipeline_mode<synchronous>, transform_indices = @transform_2, window_bounds = array<i64: 2, 1, 128>}]} {
    %0 = tpu.iota {dimensions = array<i32: 1>} : vector<1x128xi32>
    %1 = tpu.iota {dimensions = array<i32: 0>} : vector<128x128xi32>
    %2 = tpu.iota {dimensions = array<i32: 1>} : vector<128x128xi32>
    %c2_i32 = arith.constant 2 : i32
    %3 = vector.broadcast %c2_i32 : i32 to vector<128x128xi32>
    %4 = arith.muli %3, %1 : vector<128x128xi32>
    %5 = arith.cmpi eq, %2, %4 : vector<128x128xi32>
    %6 = arith.extui %5 : vector<128x128xi1> to vector<128x128xi32>
    %7 = arith.sitofp %6 : vector<128x128xi32> to vector<128x128xf32>
    %c2_i32_0 = arith.constant 2 : i32
    %8 = vector.broadcast %c2_i32_0 : i32 to vector<128x128xi32>
    %9 = arith.muli %8, %1 : vector<128x128xi32>
    %c1_i32 = arith.constant 1 : i32
    %10 = vector.broadcast %c1_i32 : i32 to vector<128x128xi32>
    %11 = arith.addi %9, %10 : vector<128x128xi32>
    %12 = arith.cmpi eq, %2, %11 : vector<128x128xi32>
    %13 = arith.extui %12 : vector<128x128xi1> to vector<128x128xi32>
    %14 = arith.sitofp %13 : vector<128x128xi32> to vector<128x128xf32>
    %c0 = arith.constant 0 : index
    %c0_1 = arith.constant 0 : index
    %15 = vector.load %arg1[%c0, %c0_1] : memref<8x128xf32, #tpu.memory_space<vmem>>, vector<8x128xf32>
    %c1_i32_2 = arith.constant 1 : i32
    %16 = tpu.dynamic_rotate %15 by %c1_i32_2 dim 1 : vector<8x128xf32>, i32 -> vector<8x128xf32>
    %c127_i32 = arith.constant 127 : i32
    %17 = tpu.dynamic_rotate %15 by %c127_i32 dim 1 : vector<8x128xf32>, i32 -> vector<8x128xf32>
    %c0_3 = arith.constant 0 : index
    %c0_4 = arith.constant 0 : index
    %18 = vector.load %arg2[%c0_3, %c0_4] : memref<672x64xf32, #tpu.memory_space<vmem>>, vector<16x1xf32>
    %c16 = arith.constant 16 : index
    %c0_5 = arith.constant 0 : index
    %19 = vector.load %arg2[%c16, %c0_5] : memref<672x64xf32, #tpu.memory_space<vmem>>, vector<16x1xf32>
    %c32 = arith.constant 32 : index
    %c0_6 = arith.constant 0 : index
    %20 = vector.load %arg2[%c32, %c0_6] : memref<672x64xf32, #tpu.memory_space<vmem>>, vector<16x1xf32>
    %c48 = arith.constant 48 : index
    %c0_7 = arith.constant 0 : index
    %21 = vector.load %arg2[%c48, %c0_7] : memref<672x64xf32, #tpu.memory_space<vmem>>, vector<16x1xf32>
    %22 = vector.extract_strided_slice %15 {offsets = [0, 0], sizes = [1, 128], strides = [1, 1]} : vector<8x128xf32> to vector<1x128xf32>
    %23 = vector.extract_strided_slice %16 {offsets = [0, 0], sizes = [1, 128], strides = [1, 1]} : vector<8x128xf32> to vector<1x128xf32>
    %24 = vector.extract_strided_slice %17 {offsets = [0, 0], sizes = [1, 128], strides = [1, 1]} : vector<8x128xf32> to vector<1x128xf32>
    %25 = vector.broadcast %18 : vector<16x1xf32> to vector<16x128xf32>
    %26 = vector.broadcast %23 : vector<1x128xf32> to vector<16x128xf32>
    %27 = arith.mulf %25, %26 : vector<16x128xf32>
    %28 = vector.broadcast %19 : vector<16x1xf32> to vector<16x128xf32>
    %29 = vector.broadcast %22 : vector<1x128xf32> to vector<16x128xf32>
    %30 = arith.mulf %28, %29 : vector<16x128xf32>
    %31 = arith.addf %27, %30 : vector<16x128xf32>
    %32 = vector.broadcast %20 : vector<16x1xf32> to vector<16x128xf32>
    %33 = vector.broadcast %24 : vector<1x128xf32> to vector<16x128xf32>
    %34 = arith.mulf %32, %33 : vector<16x128xf32>
    %35 = arith.addf %31, %34 : vector<16x128xf32>
    %36 = vector.broadcast %21 : vector<16x1xf32> to vector<16x128xf32>
    %37 = arith.addf %35, %36 : vector<16x128xf32>
    %c16_i32 = arith.constant 16 : i32
    %38 = vector.broadcast %c16_i32 : i32 to vector<1x128xi32>
    %39 = arith.cmpi slt, %0, %38 : vector<1x128xi32>
    %cst = arith.constant 0.000000e+00 : f32
    %40 = vector.broadcast %cst : f32 to vector<16x128xf32>
    %41 = arith.maximumf %37, %40 : vector<16x128xf32>
    %cst_8 = arith.constant 0.000000e+00 : f32
    %42 = vector.shape_cast %39 : vector<1x128xi1> to vector<1x128xi1>
    %43 = vector.broadcast %42 : vector<1x128xi1> to vector<16x128xi1>
    %44 = vector.broadcast %cst_8 : f32 to vector<16x128xf32>
    %45 = arith.select %43, %41, %44 : vector<16x128xi1>, vector<16x128xf32>
    %c64 = arith.constant 64 : index
    %c0_9 = arith.constant 0 : index
    %46 = vector.load %arg2[%c64, %c0_9] : memref<672x64xf32, #tpu.memory_space<vmem>>, vector<32x16xf32>
    %c1_i32_10 = arith.constant 1 : i32
    %47 = tpu.dynamic_rotate %45 by %c1_i32_10 dim 1 : vector<16x128xf32>, i32 -> vector<16x128xf32>
    %cst_11 = arith.constant dense<0.000000e+00> : vector<32x128xf32>
    %48 = tpu.matmul %46, %47, %cst_11 {dimension_numbers = #tpu.dot_dimension_numbers<[1], [0], [0], [1], [0, 0, 1, 1], [], []>} : vector<32x16xf32>, vector<16x128xf32>, vector<32x128xf32> -> vector<32x128xf32>
    %c96 = arith.constant 96 : index
    %c0_12 = arith.constant 0 : index
    %49 = vector.load %arg2[%c96, %c0_12] : memref<672x64xf32, #tpu.memory_space<vmem>>, vector<32x16xf32>
    %cst_13 = arith.constant dense<0.000000e+00> : vector<32x128xf32>
    %50 = tpu.matmul %49, %45, %cst_13 {dimension_numbers = #tpu.dot_dimension_numbers<[1], [0], [0], [1], [0, 0, 1, 1], [], []>} : vector<32x16xf32>, vector<16x128xf32>, vector<32x128xf32> -> vector<32x128xf32>
    %51 = arith.addf %48, %50 : vector<32x128xf32>
    %c128 = arith.constant 128 : index
    %c0_14 = arith.constant 0 : index
    %52 = vector.load %arg2[%c128, %c0_14] : memref<672x64xf32, #tpu.memory_space<vmem>>, vector<32x16xf32>
    %c127_i32_15 = arith.constant 127 : i32
    %53 = tpu.dynamic_rotate %45 by %c127_i32_15 dim 1 : vector<16x128xf32>, i32 -> vector<16x128xf32>
    %cst_16 = arith.constant dense<0.000000e+00> : vector<32x128xf32>
    %54 = tpu.matmul %52, %53, %cst_16 {dimension_numbers = #tpu.dot_dimension_numbers<[1], [0], [0], [1], [0, 0, 1, 1], [], []>} : vector<32x16xf32>, vector<16x128xf32>, vector<32x128xf32> -> vector<32x128xf32>
    %55 = arith.addf %51, %54 : vector<32x128xf32>
    %c160 = arith.constant 160 : index
    %c0_17 = arith.constant 0 : index
    %56 = vector.load %arg2[%c160, %c0_17] : memref<672x64xf32, #tpu.memory_space<vmem>>, vector<32x1xf32>
    %57 = vector.broadcast %56 : vector<32x1xf32> to vector<32x128xf32>
    %58 = arith.addf %55, %57 : vector<32x128xf32>
    %c16_i32_18 = arith.constant 16 : i32
    %59 = vector.broadcast %c16_i32_18 : i32 to vector<1x128xi32>
    %60 = arith.cmpi slt, %0, %59 : vector<1x128xi32>
    %cst_19 = arith.constant 0.000000e+00 : f32
    %61 = vector.broadcast %cst_19 : f32 to vector<32x128xf32>
    %62 = arith.maximumf %58, %61 : vector<32x128xf32>
    %cst_20 = arith.constant 0.000000e+00 : f32
    %63 = vector.shape_cast %60 : vector<1x128xi1> to vector<1x128xi1>
    %64 = vector.broadcast %63 : vector<1x128xi1> to vector<32x128xi1>
    %65 = vector.broadcast %cst_20 : f32 to vector<32x128xf32>
    %66 = arith.select %64, %62, %65 : vector<32x128xi1>, vector<32x128xf32>
    %c192 = arith.constant 192 : index
    %c0_21 = arith.constant 0 : index
    %67 = vector.load %arg2[%c192, %c0_21] : memref<672x64xf32, #tpu.memory_space<vmem>>, vector<64x32xf32>
    %c1_i32_22 = arith.constant 1 : i32
    %68 = tpu.dynamic_rotate %66 by %c1_i32_22 dim 1 : vector<32x128xf32>, i32 -> vector<32x128xf32>
    %cst_23 = arith.constant dense<0.000000e+00> : vector<64x128xf32>
    %69 = tpu.matmul %67, %68, %cst_23 {dimension_numbers = #tpu.dot_dimension_numbers<[1], [0], [0], [1], [0, 0, 1, 1], [], []>} : vector<64x32xf32>, vector<32x128xf32>, vector<64x128xf32> -> vector<64x128xf32>
    %c256 = arith.constant 256 : index
    %c0_24 = arith.constant 0 : index
    %70 = vector.load %arg2[%c256, %c0_24] : memref<672x64xf32, #tpu.memory_space<vmem>>, vector<64x32xf32>
    %cst_25 = arith.constant dense<0.000000e+00> : vector<64x128xf32>
    %71 = tpu.matmul %70, %66, %cst_25 {dimension_numbers = #tpu.dot_dimension_numbers<[1], [0], [0], [1], [0, 0, 1, 1], [], []>} : vector<64x32xf32>, vector<32x128xf32>, vector<64x128xf32> -> vector<64x128xf32>
    %72 = arith.addf %69, %71 : vector<64x128xf32>
    %c320 = arith.constant 320 : index
    %c0_26 = arith.constant 0 : index
    %73 = vector.load %arg2[%c320, %c0_26] : memref<672x64xf32, #tpu.memory_space<vmem>>, vector<64x32xf32>
    %c127_i32_27 = arith.constant 127 : i32
    %74 = tpu.dynamic_rotate %66 by %c127_i32_27 dim 1 : vector<32x128xf32>, i32 -> vector<32x128xf32>
    %cst_28 = arith.constant dense<0.000000e+00> : vector<64x128xf32>
    %75 = tpu.matmul %73, %74, %cst_28 {dimension_numbers = #tpu.dot_dimension_numbers<[1], [0], [0], [1], [0, 0, 1, 1], [], []>} : vector<64x32xf32>, vector<32x128xf32>, vector<64x128xf32> -> vector<64x128xf32>
    %76 = arith.addf %72, %75 : vector<64x128xf32>
    %c384 = arith.constant 384 : index
    %c0_29 = arith.constant 0 : index
    %77 = vector.load %arg2[%c384, %c0_29] : memref<672x64xf32, #tpu.memory_space<vmem>>, vector<64x1xf32>
    %78 = vector.broadcast %77 : vector<64x1xf32> to vector<64x128xf32>
    %79 = arith.addf %76, %78 : vector<64x128xf32>
    %c16_i32_30 = arith.constant 16 : i32
    %80 = vector.broadcast %c16_i32_30 : i32 to vector<1x128xi32>
    %81 = arith.cmpi slt, %0, %80 : vector<1x128xi32>
    %cst_31 = arith.constant 0.000000e+00 : f32
    %82 = vector.broadcast %cst_31 : f32 to vector<64x128xf32>
    %83 = arith.maximumf %79, %82 : vector<64x128xf32>
    %cst_32 = arith.constant 0.000000e+00 : f32
    %84 = vector.shape_cast %81 : vector<1x128xi1> to vector<1x128xi1>
    %85 = vector.broadcast %84 : vector<1x128xi1> to vector<64x128xi1>
    %86 = vector.broadcast %cst_32 : f32 to vector<64x128xf32>
    %87 = arith.select %85, %83, %86 : vector<64x128xi1>, vector<64x128xf32>
    %c480 = arith.constant 480 : index
    %c0_33 = arith.constant 0 : index
    %88 = vector.load %arg2[%c480, %c0_33] : memref<672x64xf32, #tpu.memory_space<vmem>>, vector<32x64xf32>
    %cst_34 = arith.constant dense<0.000000e+00> : vector<32x128xf32>
    %89 = tpu.matmul %88, %87, %cst_34 {dimension_numbers = #tpu.dot_dimension_numbers<[1], [0], [0], [1], [0, 0, 1, 1], [], []>} : vector<32x64xf32>, vector<64x128xf32>, vector<32x128xf32> -> vector<32x128xf32>
    %c512 = arith.constant 512 : index
    %c0_35 = arith.constant 0 : index
    %90 = vector.load %arg2[%c512, %c0_35] : memref<672x64xf32, #tpu.memory_space<vmem>>, vector<32x64xf32>
    %cst_36 = arith.constant dense<0.000000e+00> : vector<32x128xf32>
    %91 = tpu.matmul %90, %87, %cst_36 {dimension_numbers = #tpu.dot_dimension_numbers<[1], [0], [0], [1], [0, 0, 1, 1], [], []>} : vector<32x64xf32>, vector<64x128xf32>, vector<32x128xf32> -> vector<32x128xf32>
    %c448 = arith.constant 448 : index
    %c0_37 = arith.constant 0 : index
    %92 = vector.load %arg2[%c448, %c0_37] : memref<672x64xf32, #tpu.memory_space<vmem>>, vector<32x64xf32>
    %c127_i32_38 = arith.constant 127 : i32
    %93 = tpu.dynamic_rotate %87 by %c127_i32_38 dim 1 : vector<64x128xf32>, i32 -> vector<64x128xf32>
    %cst_39 = arith.constant dense<0.000000e+00> : vector<32x128xf32>
    %94 = tpu.matmul %92, %93, %cst_39 {dimension_numbers = #tpu.dot_dimension_numbers<[1], [0], [0], [1], [0, 0, 1, 1], [], []>} : vector<32x64xf32>, vector<64x128xf32>, vector<32x128xf32> -> vector<32x128xf32>
    %95 = arith.addf %91, %94 : vector<32x128xf32>
    %cst_40 = arith.constant dense<0.000000e+00> : vector<32x128xf32>
    %96 = tpu.matmul %89, %7, %cst_40 {dimension_numbers = #tpu.dot_dimension_numbers<[1], [0], [0], [1], [0, 0, 1, 1], [], []>} : vector<32x128xf32>, vector<128x128xf32>, vector<32x128xf32> -> vector<32x128xf32>
    %cst_41 = arith.constant dense<0.000000e+00> : vector<32x128xf32>
    %97 = tpu.matmul %95, %14, %cst_41 {dimension_numbers = #tpu.dot_dimension_numbers<[1], [0], [0], [1], [0, 0, 1, 1], [], []>} : vector<32x128xf32>, vector<128x128xf32>, vector<32x128xf32> -> vector<32x128xf32>
    %98 = arith.addf %96, %97 : vector<32x128xf32>
    %c544 = arith.constant 544 : index
    %c0_42 = arith.constant 0 : index
    %99 = vector.load %arg2[%c544, %c0_42] : memref<672x64xf32, #tpu.memory_space<vmem>>, vector<32x1xf32>
    %100 = vector.broadcast %99 : vector<32x1xf32> to vector<32x128xf32>
    %101 = arith.addf %98, %100 : vector<32x128xf32>
    %c32_i32 = arith.constant 32 : i32
    %102 = vector.broadcast %c32_i32 : i32 to vector<1x128xi32>
    %103 = arith.cmpi slt, %0, %102 : vector<1x128xi32>
    %cst_43 = arith.constant 0.000000e+00 : f32
    %104 = vector.broadcast %cst_43 : f32 to vector<32x128xf32>
    %105 = arith.maximumf %101, %104 : vector<32x128xf32>
    %cst_44 = arith.constant 0.000000e+00 : f32
    %106 = vector.shape_cast %103 : vector<1x128xi1> to vector<1x128xi1>
    %107 = vector.broadcast %106 : vector<1x128xi1> to vector<32x128xi1>
    %108 = vector.broadcast %cst_44 : f32 to vector<32x128xf32>
    %109 = arith.select %107, %105, %108 : vector<32x128xi1>, vector<32x128xf32>
    %c592 = arith.constant 592 : index
    %c0_45 = arith.constant 0 : index
    %110 = vector.load %arg2[%c592, %c0_45] : memref<672x64xf32, #tpu.memory_space<vmem>>, vector<16x32xf32>
    %cst_46 = arith.constant dense<0.000000e+00> : vector<16x128xf32>
    %111 = tpu.matmul %110, %109, %cst_46 {dimension_numbers = #tpu.dot_dimension_numbers<[1], [0], [0], [1], [0, 0, 1, 1], [], []>} : vector<16x32xf32>, vector<32x128xf32>, vector<16x128xf32> -> vector<16x128xf32>
    %c608 = arith.constant 608 : index
    %c0_47 = arith.constant 0 : index
    %112 = vector.load %arg2[%c608, %c0_47] : memref<672x64xf32, #tpu.memory_space<vmem>>, vector<16x32xf32>
    %cst_48 = arith.constant dense<0.000000e+00> : vector<16x128xf32>
    %113 = tpu.matmul %112, %109, %cst_48 {dimension_numbers = #tpu.dot_dimension_numbers<[1], [0], [0], [1], [0, 0, 1, 1], [], []>} : vector<16x32xf32>, vector<32x128xf32>, vector<16x128xf32> -> vector<16x128xf32>
    %c576 = arith.constant 576 : index
    %c0_49 = arith.constant 0 : index
    %114 = vector.load %arg2[%c576, %c0_49] : memref<672x64xf32, #tpu.memory_space<vmem>>, vector<16x32xf32>
    %c127_i32_50 = arith.constant 127 : i32
    %115 = tpu.dynamic_rotate %109 by %c127_i32_50 dim 1 : vector<32x128xf32>, i32 -> vector<32x128xf32>
    %cst_51 = arith.constant dense<0.000000e+00> : vector<16x128xf32>
    %116 = tpu.matmul %114, %115, %cst_51 {dimension_numbers = #tpu.dot_dimension_numbers<[1], [0], [0], [1], [0, 0, 1, 1], [], []>} : vector<16x32xf32>, vector<32x128xf32>, vector<16x128xf32> -> vector<16x128xf32>
    %117 = arith.addf %113, %116 : vector<16x128xf32>
    %cst_52 = arith.constant dense<0.000000e+00> : vector<16x128xf32>
    %118 = tpu.matmul %111, %7, %cst_52 {dimension_numbers = #tpu.dot_dimension_numbers<[1], [0], [0], [1], [0, 0, 1, 1], [], []>} : vector<16x128xf32>, vector<128x128xf32>, vector<16x128xf32> -> vector<16x128xf32>
    %cst_53 = arith.constant dense<0.000000e+00> : vector<16x128xf32>
    %119 = tpu.matmul %117, %14, %cst_53 {dimension_numbers = #tpu.dot_dimension_numbers<[1], [0], [0], [1], [0, 0, 1, 1], [], []>} : vector<16x128xf32>, vector<128x128xf32>, vector<16x128xf32> -> vector<16x128xf32>
    %120 = arith.addf %118, %119 : vector<16x128xf32>
    %c624 = arith.constant 624 : index
    %c0_54 = arith.constant 0 : index
    %121 = vector.load %arg2[%c624, %c0_54] : memref<672x64xf32, #tpu.memory_space<vmem>>, vector<16x1xf32>
    %122 = vector.broadcast %121 : vector<16x1xf32> to vector<16x128xf32>
    %123 = arith.addf %120, %122 : vector<16x128xf32>
    %c64_i32 = arith.constant 64 : i32
    %124 = vector.broadcast %c64_i32 : i32 to vector<1x128xi32>
    %125 = arith.cmpi slt, %0, %124 : vector<1x128xi32>
    %cst_55 = arith.constant 0.000000e+00 : f32
    %126 = vector.broadcast %cst_55 : f32 to vector<16x128xf32>
    %127 = arith.maximumf %123, %126 : vector<16x128xf32>
    %cst_56 = arith.constant 0.000000e+00 : f32
    %128 = vector.shape_cast %125 : vector<1x128xi1> to vector<1x128xi1>
    %129 = vector.broadcast %128 : vector<1x128xi1> to vector<16x128xi1>
    %130 = vector.broadcast %cst_56 : f32 to vector<16x128xf32>
    %131 = arith.select %129, %127, %130 : vector<16x128xi1>, vector<16x128xf32>
    %c640 = arith.constant 640 : index
    %c0_57 = arith.constant 0 : index
    %132 = vector.load %arg2[%c640, %c0_57] : memref<672x64xf32, #tpu.memory_space<vmem>>, vector<1x16xf32>
    %c1_i32_58 = arith.constant 1 : i32
    %133 = tpu.dynamic_rotate %131 by %c1_i32_58 dim 1 : vector<16x128xf32>, i32 -> vector<16x128xf32>
    %cst_59 = arith.constant dense<0.000000e+00> : vector<1x128xf32>
    %134 = tpu.matmul %132, %133, %cst_59 {dimension_numbers = #tpu.dot_dimension_numbers<[1], [0], [0], [1], [0, 0, 1, 1], [], []>} : vector<1x16xf32>, vector<16x128xf32>, vector<1x128xf32> -> vector<1x128xf32>
    %c648 = arith.constant 648 : index
    %c0_60 = arith.constant 0 : index
    %135 = vector.load %arg2[%c648, %c0_60] : memref<672x64xf32, #tpu.memory_space<vmem>>, vector<1x16xf32>
    %cst_61 = arith.constant dense<0.000000e+00> : vector<1x128xf32>
    %136 = tpu.matmul %135, %131, %cst_61 {dimension_numbers = #tpu.dot_dimension_numbers<[1], [0], [0], [1], [0, 0, 1, 1], [], []>} : vector<1x16xf32>, vector<16x128xf32>, vector<1x128xf32> -> vector<1x128xf32>
    %137 = arith.addf %134, %136 : vector<1x128xf32>
    %c656 = arith.constant 656 : index
    %c0_62 = arith.constant 0 : index
    %138 = vector.load %arg2[%c656, %c0_62] : memref<672x64xf32, #tpu.memory_space<vmem>>, vector<1x16xf32>
    %c127_i32_63 = arith.constant 127 : i32
    %139 = tpu.dynamic_rotate %131 by %c127_i32_63 dim 1 : vector<16x128xf32>, i32 -> vector<16x128xf32>
    %cst_64 = arith.constant dense<0.000000e+00> : vector<1x128xf32>
    %140 = tpu.matmul %138, %139, %cst_64 {dimension_numbers = #tpu.dot_dimension_numbers<[1], [0], [0], [1], [0, 0, 1, 1], [], []>} : vector<1x16xf32>, vector<16x128xf32>, vector<1x128xf32> -> vector<1x128xf32>
    %141 = arith.addf %137, %140 : vector<1x128xf32>
    %c664 = arith.constant 664 : index
    %c0_65 = arith.constant 0 : index
    %142 = vector.load %arg2[%c664, %c0_65] : memref<672x64xf32, #tpu.memory_space<vmem>>, vector<1x1xf32>
    %143 = vector.broadcast %142 : vector<1x1xf32> to vector<1x128xf32>
    %144 = arith.addf %141, %143 : vector<1x128xf32>
    %c64_i32_66 = arith.constant 64 : i32
    %145 = vector.broadcast %c64_i32_66 : i32 to vector<1x128xi32>
    %146 = arith.cmpi slt, %0, %145 : vector<1x128xi32>
    %cst_67 = arith.constant 0.000000e+00 : f32
    %147 = vector.broadcast %cst_67 : f32 to vector<1x128xf32>
    %148 = arith.maximumf %144, %147 : vector<1x128xf32>
    %cst_68 = arith.constant 0.000000e+00 : f32
    %149 = vector.broadcast %cst_68 : f32 to vector<1x128xf32>
    %150 = arith.select %146, %148, %149 : vector<1x128xi1>, vector<1x128xf32>
    %c0_69 = arith.constant 0 : index
    %c0_70 = arith.constant 0 : index
    %c0_71 = arith.constant 0 : index
    %151 = vector.load %arg3[%c0_69, %c0_70, %c0_71] : memref<2x1x128xf32, #tpu.memory_space<vmem>>, vector<1x1x128xf32>
    %152 = vector.shape_cast %151 : vector<1x1x128xf32> to vector<1x128xf32>
    %153 = vector.shape_cast %150 : vector<1x128xf32> to vector<1x1x128xf32>
    tpu.vector_store %arg3[%c0_69, %c0_70, %c0_71], %153 {strides = array<i32>} : memref<2x1x128xf32, #tpu.memory_space<vmem>>, vector<1x1x128xf32>,
    %154 = vector.extract_strided_slice %15 {offsets = [1, 0], sizes = [1, 128], strides = [1, 1]} : vector<8x128xf32> to vector<1x128xf32>
    %155 = vector.extract_strided_slice %16 {offsets = [1, 0], sizes = [1, 128], strides = [1, 1]} : vector<8x128xf32> to vector<1x128xf32>
    %156 = vector.extract_strided_slice %17 {offsets = [1, 0], sizes = [1, 128], strides = [1, 1]} : vector<8x128xf32> to vector<1x128xf32>
    %157 = vector.broadcast %18 : vector<16x1xf32> to vector<16x128xf32>
    %158 = vector.broadcast %155 : vector<1x128xf32> to vector<16x128xf32>
    %159 = arith.mulf %157, %158 : vector<16x128xf32>
    %160 = vector.broadcast %19 : vector<16x1xf32> to vector<16x128xf32>
    %161 = vector.broadcast %154 : vector<1x128xf32> to vector<16x128xf32>
    %162 = arith.mulf %160, %161 : vector<16x128xf32>
    %163 = arith.addf %159, %162 : vector<16x128xf32>
    %164 = vector.broadcast %20 : vector<16x1xf32> to vector<16x128xf32>
    %165 = vector.broadcast %156 : vector<1x128xf32> to vector<16x128xf32>
    %166 = arith.mulf %164, %165 : vector<16x128xf32>
    %167 = arith.addf %163, %166 : vector<16x128xf32>
    %168 = vector.broadcast %21 : vector<16x1xf32> to vector<16x128xf32>
    %169 = arith.addf %167, %168 : vector<16x128xf32>
    %c16_i32_72 = arith.constant 16 : i32
    %170 = vector.broadcast %c16_i32_72 : i32 to vector<1x128xi32>
    %171 = arith.cmpi slt, %0, %170 : vector<1x128xi32>
    %cst_73 = arith.constant 0.000000e+00 : f32
    %172 = vector.broadcast %cst_73 : f32 to vector<16x128xf32>
    %173 = arith.maximumf %169, %172 : vector<16x128xf32>
    %cst_74 = arith.constant 0.000000e+00 : f32
    %174 = vector.shape_cast %171 : vector<1x128xi1> to vector<1x128xi1>
    %175 = vector.broadcast %174 : vector<1x128xi1> to vector<16x128xi1>
    %176 = vector.broadcast %cst_74 : f32 to vector<16x128xf32>
    %177 = arith.select %175, %173, %176 : vector<16x128xi1>, vector<16x128xf32>
    %c64_75 = arith.constant 64 : index
    %c0_76 = arith.constant 0 : index
    %178 = vector.load %arg2[%c64_75, %c0_76] : memref<672x64xf32, #tpu.memory_space<vmem>>, vector<32x16xf32>
    %c1_i32_77 = arith.constant 1 : i32
    %179 = tpu.dynamic_rotate %177 by %c1_i32_77 dim 1 : vector<16x128xf32>, i32 -> vector<16x128xf32>
    %cst_78 = arith.constant dense<0.000000e+00> : vector<32x128xf32>
    %180 = tpu.matmul %178, %179, %cst_78 {dimension_numbers = #tpu.dot_dimension_numbers<[1], [0], [0], [1], [0, 0, 1, 1], [], []>} : vector<32x16xf32>, vector<16x128xf32>, vector<32x128xf32> -> vector<32x128xf32>
    %c96_79 = arith.constant 96 : index
    %c0_80 = arith.constant 0 : index
    %181 = vector.load %arg2[%c96_79, %c0_80] : memref<672x64xf32, #tpu.memory_space<vmem>>, vector<32x16xf32>
    %cst_81 = arith.constant dense<0.000000e+00> : vector<32x128xf32>
    %182 = tpu.matmul %181, %177, %cst_81 {dimension_numbers = #tpu.dot_dimension_numbers<[1], [0], [0], [1], [0, 0, 1, 1], [], []>} : vector<32x16xf32>, vector<16x128xf32>, vector<32x128xf32> -> vector<32x128xf32>
    %183 = arith.addf %180, %182 : vector<32x128xf32>
    %c128_82 = arith.constant 128 : index
    %c0_83 = arith.constant 0 : index
    %184 = vector.load %arg2[%c128_82, %c0_83] : memref<672x64xf32, #tpu.memory_space<vmem>>, vector<32x16xf32>
    %c127_i32_84 = arith.constant 127 : i32
    %185 = tpu.dynamic_rotate %177 by %c127_i32_84 dim 1 : vector<16x128xf32>, i32 -> vector<16x128xf32>
    %cst_85 = arith.constant dense<0.000000e+00> : vector<32x128xf32>
    %186 = tpu.matmul %184, %185, %cst_85 {dimension_numbers = #tpu.dot_dimension_numbers<[1], [0], [0], [1], [0, 0, 1, 1], [], []>} : vector<32x16xf32>, vector<16x128xf32>, vector<32x128xf32> -> vector<32x128xf32>
    %187 = arith.addf %183, %186 : vector<32x128xf32>
    %c160_86 = arith.constant 160 : index
    %c0_87 = arith.constant 0 : index
    %188 = vector.load %arg2[%c160_86, %c0_87] : memref<672x64xf32, #tpu.memory_space<vmem>>, vector<32x1xf32>
    %189 = vector.broadcast %188 : vector<32x1xf32> to vector<32x128xf32>
    %190 = arith.addf %187, %189 : vector<32x128xf32>
    %c16_i32_88 = arith.constant 16 : i32
    %191 = vector.broadcast %c16_i32_88 : i32 to vector<1x128xi32>
    %192 = arith.cmpi slt, %0, %191 : vector<1x128xi32>
    %cst_89 = arith.constant 0.000000e+00 : f32
    %193 = vector.broadcast %cst_89 : f32 to vector<32x128xf32>
    %194 = arith.maximumf %190, %193 : vector<32x128xf32>
    %cst_90 = arith.constant 0.000000e+00 : f32
    %195 = vector.shape_cast %192 : vector<1x128xi1> to vector<1x128xi1>
    %196 = vector.broadcast %195 : vector<1x128xi1> to vector<32x128xi1>
    %197 = vector.broadcast %cst_90 : f32 to vector<32x128xf32>
    %198 = arith.select %196, %194, %197 : vector<32x128xi1>, vector<32x128xf32>
    %c192_91 = arith.constant 192 : index
    %c0_92 = arith.constant 0 : index
    %199 = vector.load %arg2[%c192_91, %c0_92] : memref<672x64xf32, #tpu.memory_space<vmem>>, vector<64x32xf32>
    %c1_i32_93 = arith.constant 1 : i32
    %200 = tpu.dynamic_rotate %198 by %c1_i32_93 dim 1 : vector<32x128xf32>, i32 -> vector<32x128xf32>
    %cst_94 = arith.constant dense<0.000000e+00> : vector<64x128xf32>
    %201 = tpu.matmul %199, %200, %cst_94 {dimension_numbers = #tpu.dot_dimension_numbers<[1], [0], [0], [1], [0, 0, 1, 1], [], []>} : vector<64x32xf32>, vector<32x128xf32>, vector<64x128xf32> -> vector<64x128xf32>
    %c256_95 = arith.constant 256 : index
    %c0_96 = arith.constant 0 : index
    %202 = vector.load %arg2[%c256_95, %c0_96] : memref<672x64xf32, #tpu.memory_space<vmem>>, vector<64x32xf32>
    %cst_97 = arith.constant dense<0.000000e+00> : vector<64x128xf32>
    %203 = tpu.matmul %202, %198, %cst_97 {dimension_numbers = #tpu.dot_dimension_numbers<[1], [0], [0], [1], [0, 0, 1, 1], [], []>} : vector<64x32xf32>, vector<32x128xf32>, vector<64x128xf32> -> vector<64x128xf32>
    %204 = arith.addf %201, %203 : vector<64x128xf32>
    %c320_98 = arith.constant 320 : index
    %c0_99 = arith.constant 0 : index
    %205 = vector.load %arg2[%c320_98, %c0_99] : memref<672x64xf32, #tpu.memory_space<vmem>>, vector<64x32xf32>
    %c127_i32_100 = arith.constant 127 : i32
    %206 = tpu.dynamic_rotate %198 by %c127_i32_100 dim 1 : vector<32x128xf32>, i32 -> vector<32x128xf32>
    %cst_101 = arith.constant dense<0.000000e+00> : vector<64x128xf32>
    %207 = tpu.matmul %205, %206, %cst_101 {dimension_numbers = #tpu.dot_dimension_numbers<[1], [0], [0], [1], [0, 0, 1, 1], [], []>} : vector<64x32xf32>, vector<32x128xf32>, vector<64x128xf32> -> vector<64x128xf32>
    %208 = arith.addf %204, %207 : vector<64x128xf32>
    %c384_102 = arith.constant 384 : index
    %c0_103 = arith.constant 0 : index
    %209 = vector.load %arg2[%c384_102, %c0_103] : memref<672x64xf32, #tpu.memory_space<vmem>>, vector<64x1xf32>
    %210 = vector.broadcast %209 : vector<64x1xf32> to vector<64x128xf32>
    %211 = arith.addf %208, %210 : vector<64x128xf32>
    %c16_i32_104 = arith.constant 16 : i32
    %212 = vector.broadcast %c16_i32_104 : i32 to vector<1x128xi32>
    %213 = arith.cmpi slt, %0, %212 : vector<1x128xi32>
    %cst_105 = arith.constant 0.000000e+00 : f32
    %214 = vector.broadcast %cst_105 : f32 to vector<64x128xf32>
    %215 = arith.maximumf %211, %214 : vector<64x128xf32>
    %cst_106 = arith.constant 0.000000e+00 : f32
    %216 = vector.shape_cast %213 : vector<1x128xi1> to vector<1x128xi1>
    %217 = vector.broadcast %216 : vector<1x128xi1> to vector<64x128xi1>
    %218 = vector.broadcast %cst_106 : f32 to vector<64x128xf32>
    %219 = arith.select %217, %215, %218 : vector<64x128xi1>, vector<64x128xf32>
    %c480_107 = arith.constant 480 : index
    %c0_108 = arith.constant 0 : index
    %220 = vector.load %arg2[%c480_107, %c0_108] : memref<672x64xf32, #tpu.memory_space<vmem>>, vector<32x64xf32>
    %cst_109 = arith.constant dense<0.000000e+00> : vector<32x128xf32>
    %221 = tpu.matmul %220, %219, %cst_109 {dimension_numbers = #tpu.dot_dimension_numbers<[1], [0], [0], [1], [0, 0, 1, 1], [], []>} : vector<32x64xf32>, vector<64x128xf32>, vector<32x128xf32> -> vector<32x128xf32>
    %c512_110 = arith.constant 512 : index
    %c0_111 = arith.constant 0 : index
    %222 = vector.load %arg2[%c512_110, %c0_111] : memref<672x64xf32, #tpu.memory_space<vmem>>, vector<32x64xf32>
    %cst_112 = arith.constant dense<0.000000e+00> : vector<32x128xf32>
    %223 = tpu.matmul %222, %219, %cst_112 {dimension_numbers = #tpu.dot_dimension_numbers<[1], [0], [0], [1], [0, 0, 1, 1], [], []>} : vector<32x64xf32>, vector<64x128xf32>, vector<32x128xf32> -> vector<32x128xf32>
    %c448_113 = arith.constant 448 : index
    %c0_114 = arith.constant 0 : index
    %224 = vector.load %arg2[%c448_113, %c0_114] : memref<672x64xf32, #tpu.memory_space<vmem>>, vector<32x64xf32>
    %c127_i32_115 = arith.constant 127 : i32
    %225 = tpu.dynamic_rotate %219 by %c127_i32_115 dim 1 : vector<64x128xf32>, i32 -> vector<64x128xf32>
    %cst_116 = arith.constant dense<0.000000e+00> : vector<32x128xf32>
    %226 = tpu.matmul %224, %225, %cst_116 {dimension_numbers = #tpu.dot_dimension_numbers<[1], [0], [0], [1], [0, 0, 1, 1], [], []>} : vector<32x64xf32>, vector<64x128xf32>, vector<32x128xf32> -> vector<32x128xf32>
    %227 = arith.addf %223, %226 : vector<32x128xf32>
    %cst_117 = arith.constant dense<0.000000e+00> : vector<32x128xf32>
    %228 = tpu.matmul %221, %7, %cst_117 {dimension_numbers = #tpu.dot_dimension_numbers<[1], [0], [0], [1], [0, 0, 1, 1], [], []>} : vector<32x128xf32>, vector<128x128xf32>, vector<32x128xf32> -> vector<32x128xf32>
    %cst_118 = arith.constant dense<0.000000e+00> : vector<32x128xf32>
    %229 = tpu.matmul %227, %14, %cst_118 {dimension_numbers = #tpu.dot_dimension_numbers<[1], [0], [0], [1], [0, 0, 1, 1], [], []>} : vector<32x128xf32>, vector<128x128xf32>, vector<32x128xf32> -> vector<32x128xf32>
    %230 = arith.addf %228, %229 : vector<32x128xf32>
    %c544_119 = arith.constant 544 : index
    %c0_120 = arith.constant 0 : index
    %231 = vector.load %arg2[%c544_119, %c0_120] : memref<672x64xf32, #tpu.memory_space<vmem>>, vector<32x1xf32>
    %232 = vector.broadcast %231 : vector<32x1xf32> to vector<32x128xf32>
    %233 = arith.addf %230, %232 : vector<32x128xf32>
    %c32_i32_121 = arith.constant 32 : i32
    %234 = vector.broadcast %c32_i32_121 : i32 to vector<1x128xi32>
    %235 = arith.cmpi slt, %0, %234 : vector<1x128xi32>
    %cst_122 = arith.constant 0.000000e+00 : f32
    %236 = vector.broadcast %cst_122 : f32 to vector<32x128xf32>
    %237 = arith.maximumf %233, %236 : vector<32x128xf32>
    %cst_123 = arith.constant 0.000000e+00 : f32
    %238 = vector.shape_cast %235 : vector<1x128xi1> to vector<1x128xi1>
    %239 = vector.broadcast %238 : vector<1x128xi1> to vector<32x128xi1>
    %240 = vector.broadcast %cst_123 : f32 to vector<32x128xf32>
    %241 = arith.select %239, %237, %240 : vector<32x128xi1>, vector<32x128xf32>
    %c592_124 = arith.constant 592 : index
    %c0_125 = arith.constant 0 : index
    %242 = vector.load %arg2[%c592_124, %c0_125] : memref<672x64xf32, #tpu.memory_space<vmem>>, vector<16x32xf32>
    %cst_126 = arith.constant dense<0.000000e+00> : vector<16x128xf32>
    %243 = tpu.matmul %242, %241, %cst_126 {dimension_numbers = #tpu.dot_dimension_numbers<[1], [0], [0], [1], [0, 0, 1, 1], [], []>} : vector<16x32xf32>, vector<32x128xf32>, vector<16x128xf32> -> vector<16x128xf32>
    %c608_127 = arith.constant 608 : index
    %c0_128 = arith.constant 0 : index
    %244 = vector.load %arg2[%c608_127, %c0_128] : memref<672x64xf32, #tpu.memory_space<vmem>>, vector<16x32xf32>
    %cst_129 = arith.constant dense<0.000000e+00> : vector<16x128xf32>
    %245 = tpu.matmul %244, %241, %cst_129 {dimension_numbers = #tpu.dot_dimension_numbers<[1], [0], [0], [1], [0, 0, 1, 1], [], []>} : vector<16x32xf32>, vector<32x128xf32>, vector<16x128xf32> -> vector<16x128xf32>
    %c576_130 = arith.constant 576 : index
    %c0_131 = arith.constant 0 : index
    %246 = vector.load %arg2[%c576_130, %c0_131] : memref<672x64xf32, #tpu.memory_space<vmem>>, vector<16x32xf32>
    %c127_i32_132 = arith.constant 127 : i32
    %247 = tpu.dynamic_rotate %241 by %c127_i32_132 dim 1 : vector<32x128xf32>, i32 -> vector<32x128xf32>
    %cst_133 = arith.constant dense<0.000000e+00> : vector<16x128xf32>
    %248 = tpu.matmul %246, %247, %cst_133 {dimension_numbers = #tpu.dot_dimension_numbers<[1], [0], [0], [1], [0, 0, 1, 1], [], []>} : vector<16x32xf32>, vector<32x128xf32>, vector<16x128xf32> -> vector<16x128xf32>
    %249 = arith.addf %245, %248 : vector<16x128xf32>
    %cst_134 = arith.constant dense<0.000000e+00> : vector<16x128xf32>
    %250 = tpu.matmul %243, %7, %cst_134 {dimension_numbers = #tpu.dot_dimension_numbers<[1], [0], [0], [1], [0, 0, 1, 1], [], []>} : vector<16x128xf32>, vector<128x128xf32>, vector<16x128xf32> -> vector<16x128xf32>
    %cst_135 = arith.constant dense<0.000000e+00> : vector<16x128xf32>
    %251 = tpu.matmul %249, %14, %cst_135 {dimension_numbers = #tpu.dot_dimension_numbers<[1], [0], [0], [1], [0, 0, 1, 1], [], []>} : vector<16x128xf32>, vector<128x128xf32>, vector<16x128xf32> -> vector<16x128xf32>
    %252 = arith.addf %250, %251 : vector<16x128xf32>
    %c624_136 = arith.constant 624 : index
    %c0_137 = arith.constant 0 : index
    %253 = vector.load %arg2[%c624_136, %c0_137] : memref<672x64xf32, #tpu.memory_space<vmem>>, vector<16x1xf32>
    %254 = vector.broadcast %253 : vector<16x1xf32> to vector<16x128xf32>
    %255 = arith.addf %252, %254 : vector<16x128xf32>
    %c64_i32_138 = arith.constant 64 : i32
    %256 = vector.broadcast %c64_i32_138 : i32 to vector<1x128xi32>
    %257 = arith.cmpi slt, %0, %256 : vector<1x128xi32>
    %cst_139 = arith.constant 0.000000e+00 : f32
    %258 = vector.broadcast %cst_139 : f32 to vector<16x128xf32>
    %259 = arith.maximumf %255, %258 : vector<16x128xf32>
    %cst_140 = arith.constant 0.000000e+00 : f32
    %260 = vector.shape_cast %257 : vector<1x128xi1> to vector<1x128xi1>
    %261 = vector.broadcast %260 : vector<1x128xi1> to vector<16x128xi1>
    %262 = vector.broadcast %cst_140 : f32 to vector<16x128xf32>
    %263 = arith.select %261, %259, %262 : vector<16x128xi1>, vector<16x128xf32>
    %c640_141 = arith.constant 640 : index
    %c0_142 = arith.constant 0 : index
    %264 = vector.load %arg2[%c640_141, %c0_142] : memref<672x64xf32, #tpu.memory_space<vmem>>, vector<1x16xf32>
    %c1_i32_143 = arith.constant 1 : i32
    %265 = tpu.dynamic_rotate %263 by %c1_i32_143 dim 1 : vector<16x128xf32>, i32 -> vector<16x128xf32>
    %cst_144 = arith.constant dense<0.000000e+00> : vector<1x128xf32>
    %266 = tpu.matmul %264, %265, %cst_144 {dimension_numbers = #tpu.dot_dimension_numbers<[1], [0], [0], [1], [0, 0, 1, 1], [], []>} : vector<1x16xf32>, vector<16x128xf32>, vector<1x128xf32> -> vector<1x128xf32>
    %c648_145 = arith.constant 648 : index
    %c0_146 = arith.constant 0 : index
    %267 = vector.load %arg2[%c648_145, %c0_146] : memref<672x64xf32, #tpu.memory_space<vmem>>, vector<1x16xf32>
    %cst_147 = arith.constant dense<0.000000e+00> : vector<1x128xf32>
    %268 = tpu.matmul %267, %263, %cst_147 {dimension_numbers = #tpu.dot_dimension_numbers<[1], [0], [0], [1], [0, 0, 1, 1], [], []>} : vector<1x16xf32>, vector<16x128xf32>, vector<1x128xf32> -> vector<1x128xf32>
    %269 = arith.addf %266, %268 : vector<1x128xf32>
    %c656_148 = arith.constant 656 : index
    %c0_149 = arith.constant 0 : index
    %270 = vector.load %arg2[%c656_148, %c0_149] : memref<672x64xf32, #tpu.memory_space<vmem>>, vector<1x16xf32>
    %c127_i32_150 = arith.constant 127 : i32
    %271 = tpu.dynamic_rotate %263 by %c127_i32_150 dim 1 : vector<16x128xf32>, i32 -> vector<16x128xf32>
    %cst_151 = arith.constant dense<0.000000e+00> : vector<1x128xf32>
    %272 = tpu.matmul %270, %271, %cst_151 {dimension_numbers = #tpu.dot_dimension_numbers<[1], [0], [0], [1], [0, 0, 1, 1], [], []>} : vector<1x16xf32>, vector<16x128xf32>, vector<1x128xf32> -> vector<1x128xf32>
    %273 = arith.addf %269, %272 : vector<1x128xf32>
    %c664_152 = arith.constant 664 : index
    %c0_153 = arith.constant 0 : index
    %274 = vector.load %arg2[%c664_152, %c0_153] : memref<672x64xf32, #tpu.memory_space<vmem>>, vector<1x1xf32>
    %275 = vector.broadcast %274 : vector<1x1xf32> to vector<1x128xf32>
    %276 = arith.addf %273, %275 : vector<1x128xf32>
    %c64_i32_154 = arith.constant 64 : i32
    %277 = vector.broadcast %c64_i32_154 : i32 to vector<1x128xi32>
    %278 = arith.cmpi slt, %0, %277 : vector<1x128xi32>
    %cst_155 = arith.constant 0.000000e+00 : f32
    %279 = vector.broadcast %cst_155 : f32 to vector<1x128xf32>
    %280 = arith.maximumf %276, %279 : vector<1x128xf32>
    %cst_156 = arith.constant 0.000000e+00 : f32
    %281 = vector.broadcast %cst_156 : f32 to vector<1x128xf32>
    %282 = arith.select %278, %280, %281 : vector<1x128xi1>, vector<1x128xf32>
    %c1 = arith.constant 1 : index
    %c0_157 = arith.constant 0 : index
    %c0_158 = arith.constant 0 : index
    %283 = vector.load %arg3[%c1, %c0_157, %c0_158] : memref<2x1x128xf32, #tpu.memory_space<vmem>>, vector<1x1x128xf32>
    %284 = vector.shape_cast %283 : vector<1x1x128xf32> to vector<1x128xf32>
    %285 = vector.shape_cast %282 : vector<1x128xf32> to vector<1x1x128xf32>
    tpu.vector_store %arg3[%c1, %c0_157, %c0_158], %285 {strides = array<i32>} : memref<2x1x128xf32, #tpu.memory_space<vmem>>, vector<1x1x128xf32>,
    return
  }
  func.func @transform_0(%arg0: i32) -> (i32, i32) {
    %c0_i32 = arith.constant 0 : i32
    %c0_i32_0 = arith.constant 0 : i32
    %c0_i32_1 = arith.constant 0 : i32
    return %c0_i32, %c0_i32_0 : i32, i32
  }
  func.func @transform_1(%arg0: i32) -> (i32, i32) {
    %c0_i32 = arith.constant 0 : i32
    %c0_i32_0 = arith.constant 0 : i32
    %c0_i32_1 = arith.constant 0 : i32
    return %c0_i32, %c0_i32_0 : i32, i32
  }
  func.func @transform_2(%arg0: i32) -> (i32, i32, i32) {
    %c0_i32 = arith.constant 0 : i32
    %c0_i32_0 = arith.constant 0 : i32
    %c0_i32_1 = arith.constant 0 : i32
    %c0_i32_2 = arith.constant 0 : i32
    return %c0_i32, %c0_i32_0, %c0_i32_1 : i32, i32, i32
  }
}

</mosaic_0001>

<bundles_post_ra>
// kernel: forward.1
= control target key start
LH: loop header
LB: loop body
LE: loop exit
PB: predicated region body
PF: predicated region fallthrough
CT: control target
= control target key end

     0   :  { %v2793_v2 = vmov 0   ;;  %s2794_s13 = smov 1   ;;  %s4394_s0 = inlined_call_operand.vmem [shape: f32[8,128], index: 0, kind: input, shape index: {}]   ;;  %s4395_s1 = inlined_call_operand.vmem [shape: f32[672,64], index: 1, kind: input, shape index: {}]   ;;  %s4396_s2 = inlined_call_operand.hbm [shape: f32[2,1,128], index: 2, kind: output, shape index: {}]  }
   0x1   :  { %v159_v0 = vld [vmem:[%s4394_s0] sm:$0xff]  ;;  %v165_v1 = vld [vmem:[%s4395_s1 + $0x8] sm:$0xff]  ;;  %2623 = vset.pattern.permute.xlu1 %v2793_v2  ;;  %2625 = vset.pattern.permute.xlu0 %v2793_v2 }
   0x2   :  { %160 = vrot.lane.b32.xlu0 %v159_v0, %s2794_s13  ;;  %v164_v3 = vld [vmem:[%s4395_s1] sm:$0xff]  ;;  %179 = vperm.xlu1 %2623, %v165_v1  }
   0x3   :  { %2624 = vset.pattern.permute.xlu2 %v2793_v2 }
   0x4   :  { %7 = vsyncpa [#allocation3], 0  ;;  %174 = vperm.xlu2 %2624, %v164_v3   ;;  %v167_v4 = vld [vmem:[%s4395_s1 + $0x18] sm:$0xff]  ;;  %s2795_s17 = smov 127   ;;  %v166_v5 = vld [vmem:[%s4395_s1 + $0x10] sm:$0xff]  ;;  %v1245_v13 = vperm.slane %v159_v0, 1  ;;  %v12_v31 = vlaneseq }
   0x5   :  { %v169_v6 = vld [vmem:[%s4395_s1 + $0x28] sm:$0xff]  ;;  %v168_v7 = vld [vmem:[%s4395_s1 + $0x20] sm:$0xff]  ;;  %v171_v8 = vld [vmem:[%s4395_s1 + $0x38] sm:$0xff]  ;;  %v195_v26 = vperm.slane %v159_v0, 0  ;;  %vm4398_vm1 = vcmask 130048   ;;  %vm4399_vm2 = vcmask 261120  }
   0x6   :  { %v170_v9 = vld [vmem:[%s4395_s1 + $0x30] sm:$0xff]  ;;  %v385_v10 = vld [vmem:[%s4395_s1 + $0xb8] sm:$0xff]  ;;  %v382_v11 = vld [vmem:[%s4395_s1 + $0xa0] sm:$0xff]  ;;  %v2850_v41 = vand.u32 127, %v12_v31  ;;  %vm4405_vm3 = vcmask 523264   ;;  %s2797_s6 = smov [#allocation2]  }
   0x7   :  { %v384_v1 = vld [vmem:[%s4395_s1 + $0xb0] sm:$0xff]  ;;  %v242_v2 = vld [vmem:[%s4395_s1 + $0x60] sm:$0xff]  ;;  %s2265_s7 = sshll.u32 %s2797_s6, 4  ;;  %s2267_s10 = sshll.u32 %s4396_s2, 4  ;;  %s2266_s7 = int_to_ptr.vmem [resolvable:$true] %s2265_s7  ;;  %s2268_s10 = int_to_ptr.hbm [resolvable:$true] %s2267_s10 }
   0x8   :  { %vm4397_vm0 = vcmp.lt.s32.totalorder %v2850_v41, 16 }
   0xa   :  { %162 = vrot.lane.b32.xlu0 %v159_v0, %s2795_s17  ;;  %192 = vperm.xlu1 %2623, %v167_v4   ;;  %v383_v0 = vld [vmem:[%s4395_s1 + $0xa8] sm:$0xff] }
   0xc   :  { %187 = vperm.xlu2 %2624, %v166_v5  }
  0x12   :  { %207 = vperm.xlu0 %2625, %v169_v6   ;;  %202 = vperm.xlu1 %2623, %v168_v7   ;;  %v329_v6 = vld [vmem:[%s4395_s1 + $0x80] sm:$0xff]  ;;  %v243_v7 = vld [vmem:[%s4395_s1 + $0x68] sm:$0xff] }
  0x14   :  { %222 = vperm.xlu2 %2624, %v171_v8   ;;  %v330_v8 = vld [vmem:[%s4395_s1 + $0x88] sm:$0xff] }
  0x1a   :  { %217 = vperm.xlu1 %2623, %v170_v9   ;;  %v244_v9 = vld [vmem:[%s4395_s1 + $0x70] sm:$0xff] }
  0x22   :  { %403 = vperm.xlu1 %2623, %v385_v10   ;;  %v331_v10 = vld [vmem:[%s4395_s1 + $0x90] sm:$0xff] }
  0x2a   :  { %388 = vperm.xlu1 %2623, %v382_v11   ;;  %v245_v11 = vld [vmem:[%s4395_s1 + $0x78] sm:$0xff] }
  0x5e   :  { %v175_v12 = vpop.permute.xlu2 %174 }
  0x66   :  { %v188_v15 = vpop.permute.xlu2 %187 }
  0x67   :  { %v1246_v18 = vmul.f32 %v1245_v13, %v188_v15  ;;  %v196_v39 = vmul.f32 %v195_v26, %v188_v15  ;;  %v234_v15 = vld [vmem:[%s4395_s1 + $0x40] sm:$0xff] }
  0x6e   :  { %v223_v44 = vpop.permute.xlu2 %222 }
  0x74   :  { %v161_v14 = vpop.permute.xlu0 %160  ;;  %v180_v17 = vpop.permute.xlu1 %179 }
  0x75   :  { %v1242_v16 = vperm.slane %v161_v14, 1  ;;  %v182_v25 = vperm.slane %v161_v14, 0 }
  0x77   :  { %v1243_v19 = vmul.f32 %v1242_v16, %v175_v12  ;;  %v1244_v20 = vmul.f32 %v1242_v16, %v180_v17  ;;  %v184_v32 = vmul.f32 %v182_v25, %v180_v17  ;;  %v183_v38 = vmul.f32 %v182_v25, %v175_v12  ;;  %v332_v16 = vld [vmem:[%s4395_s1 + $0x98] sm:$0xff]  ;;  %v235_v17 = vld [vmem:[%s4395_s1 + $0x48] sm:$0xff] }
  0x79   :  { %v1248_v21 = vadd.f32 %v1246_v18, %v1243_v19  ;;  %v198_v48 = vadd.f32 %v196_v39, %v183_v38  ;;  %v236_v18 = vld [vmem:[%s4395_s1 + $0x50] sm:$0xff]  ;;  %v237_v19 = vld [vmem:[%s4395_s1 + $0x58] sm:$0xff] }
  0x7c   :  { %v163_v22 = vpop.permute.xlu0 %162  ;;  %v193_v23 = vpop.permute.xlu1 %192 }
  0x7d   :  { %v1247_v24 = vmul.f32 %v1245_v13, %v193_v23  ;;  %v210_v28 = vperm.slane %v163_v22, 0  ;;  %v1250_v29 = vperm.slane %v163_v22, 1  ;;  %v197_v30 = vmul.f32 %v195_v26, %v193_v23 }
  0x7f   :  { %v1249_v27 = vadd.f32 %v1247_v24, %v1244_v20  ;;  %v199_v34 = vadd.f32 %v197_v30, %v184_v32 }
  0x84   :  { %v208_v33 = vpop.permute.xlu0 %207  ;;  %v203_v37 = vpop.permute.xlu1 %202 }
  0x85   :  { %v212_v35 = vmul.f32 %v210_v28, %v208_v33  ;;  %v1252_v36 = vmul.f32 %v1250_v29, %v208_v33  ;;  %v1251_v40 = vmul.f32 %v1250_v29, %v203_v37  ;;  %v211_v45 = vmul.f32 %v210_v28, %v203_v37 }
  0x87   :  { %v214_v42 = vadd.f32 %v212_v35, %v199_v34  ;;  %v1254_v43 = vadd.f32 %v1252_v36, %v1249_v27  ;;  %v1253_v46 = vadd.f32 %v1251_v40, %v1248_v21  ;;  %v213_v51 = vadd.f32 %v211_v45, %v198_v48 }
  0x89   :  { %v226_v47 = vadd.f32 %v223_v44, %v214_v42  ;;  %v2852_v49 = vadd.f32 %v1254_v43, %v223_v44 }
  0x8b   :  { %v229_v50 = vmax.f32 %v226_v47, 0.0  ;;  %v1258_v53 = vmax.f32 %v2852_v49, 0.0  ;;  %v1355_v49 = vld [vmem:[%s4395_s1 + $0x80] sm:$0xff] }
  0x8c   :  { %v218_v52 = vpop.permute.xlu1 %217 }
  0x8d   :  { %2311 = vmatpush.msk.msra.mxu0 %vm4397_vm0, %v229_v50  ;;  %v225_v54 = vadd.f32 %v218_v52, %v213_v51  ;;  %v2858_v55 = vadd.f32 %v1253_v46, %v218_v52  ;;  %v233_v60 = vsel %vm4397_vm0, %v229_v50, 0.0  ;;  %v1260_v61 = vsel %vm4397_vm0, %v1258_v53, 0.0 }
  0x8f   :  { %v228_v56 = vmax.f32 %v225_v54, 0.0  ;;  %v1257_v57 = vmax.f32 %v2858_v55, 0.0  ;;  %v1356_v55 = vld [vmem:[%s4395_s1 + $0x88] sm:$0xff] }
  0x91   :  { %v232_v58 = vsel %vm4397_vm0, %v228_v56, 0.0  ;;  %v1259_v59 = vsel %vm4397_vm0, %v1257_v57, 0.0  ;;  %2312 = vmatpush.msk.msra.mxu0 %vm4397_vm0, %v228_v56  ;;  %v668_v56 = vld [vmem:[%s4395_s1 + $0x1b0] sm:$0xff] }
  0x92   :  { %v2631_v62 = vpack.i.bf16 %v232_v58, %v233_v60  ;;  %v2875_v63 = vpack.i.bf16 %v1259_v59, %v1260_v61  ;;  %2313 = vmatmul.msk.f32.vlgmr.msra.gmra.mxu0 %vm4398_vm1, %v242_v2 }
  0x94   :  { %2632 = vrot.lane.b32.xlu0 %v2631_v62, %s2794_s13  ;;  %2627 = vrot.lane.b32.xlu2 %v2631_v62, %s2795_s17  ;;  %v404_v22 = vpop.permute.xlu1 %403 }
  0x9a   :  { %2314 = vmatmul.msk.f32.gmra.mxu0 %vm4398_vm1, %v243_v7  ;;  %v663_v7 = vld [vmem:[%s4395_s1 + $0x188] sm:$0xff] }
  0x9c   :  { %393 = vperm.xlu0 %2625, %v383_v0   ;;  %398 = vperm.xlu2 %2624, %v384_v1   ;;  %v389_v28 = vpop.permute.xlu1 %388  ;;  %v665_v0 = vld [vmem:[%s4395_s1 + $0x198] sm:$0xff] }
  0xa2   :  { %2315 = vmatmul.msk.f32.gmra.mxu0 %vm4398_vm1, %v244_v9  ;;  %v434_v9 = vld [vmem:[%s4395_s1 + $0x100] sm:$0xff] }
  0xaa   :  { %2316 = vmatmul.msk.f32.gmra.mxu0 %vm4398_vm1, %v245_v11  ;;  %v435_v11 = vld [vmem:[%s4395_s1 + $0x108] sm:$0xff] }
  0xee   :  { %v2628_v3 = vpop.permute.xlu2 %2627 }
  0xef   :  { %v2629_v4 = vunpack.i.l.bf16 %v2628_v3  ;;  %v2630_v5 = vunpack.i.h.bf16 %v2628_v3  ;;  %v662_v3 = vld [vmem:[%s4395_s1 + $0x180] sm:$0xff] }
  0xf1   :  { %363 = vmatpush.msra.mxu2 %v2629_v4  ;;  %v669_v4 = vld [vmem:[%s4395_s1 + $0x1b8] sm:$0xff] }
  0xf3   :  { %364 = vmatpush.msra.mxu2 %v2630_v5  ;;  %v666_v5 = vld [vmem:[%s4395_s1 + $0x1a0] sm:$0xff] }
  0xf4   :  { %2321 = vmatmul.msk.f32.vlgmr.msra.gmra.mxu2 %vm4398_vm1, %v329_v6  ;;  %v667_v6 = vld [vmem:[%s4395_s1 + $0x1a8] sm:$0xff] }
  0xf6   :  { %v399_v48 = vpop.permute.xlu2 %398 }
  0xfc   :  { %2322 = vmatmul.msk.f32.gmra.mxu2 %vm4398_vm1, %v330_v8  ;;  %v664_v8 = vld [vmem:[%s4395_s1 + $0x190] sm:$0xff] }
 0x104   :  { %2323 = vmatmul.msk.f32.gmra.mxu2 %vm4398_vm1, %v331_v10 }
 0x106   :  { %v2633_v12 = vpop.permute.xlu0 %2632 }
 0x107   :  { %v2634_v13 = vunpack.i.l.bf16 %v2633_v12  ;;  %v2635_v14 = vunpack.i.h.bf16 %v2633_v12 }
 0x109   :  { %314 = vmatpush.msra.mxu1 %v2634_v13 }
 0x10b   :  { %315 = vmatpush.msra.mxu1 %v2635_v14 }
 0x10c   :  { %2317 = vmatmul.msk.f32.vlgmr.msra.gmra.mxu1 %vm4398_vm1, %v234_v15  ;;  %2324 = vmatmul.msk.f32.gmra.mxu2 %vm4398_vm1, %v332_v16  ;;  %v436_v15 = vld [vmem:[%s4395_s1 + $0x110] sm:$0xff] }
 0x10e   :  { %v394_v34 = vpop.permute.xlu0 %393 }
 0x10f   :  { %v276_v20 = vpop.f32.mrf.mxu0 }
 0x114   :  { %2318 = vmatmul.msk.f32.gmra.mxu1 %vm4398_vm1, %v235_v17 }
 0x117   :  { %v279_v25 = vpop.f32.mrf.mxu0 }
 0x11c   :  { %2319 = vmatmul.msk.f32.gmra.mxu1 %vm4398_vm1, %v236_v18  ;;  %v418_v18 = vld [vmem:[%s4395_s1 + $0xc0] sm:$0xff] }
 0x11f   :  { %v282_v35 = vpop.f32.mrf.mxu0 }
 0x124   :  { %2320 = vmatmul.msk.f32.gmra.mxu1 %vm4398_vm1, %v237_v19  ;;  %v437_v19 = vld [vmem:[%s4395_s1 + $0x118] sm:$0xff] }
 0x127   :  { %v285_v47 = vpop.f32.mrf.mxu0 }
 0x177   :  { %v366_v21 = vpop.f32.mrf.mxu2 }
 0x17f   :  { %v369_v26 = vpop.f32.mrf.mxu2 }
 0x187   :  { %v372_v38 = vpop.f32.mrf.mxu2 }
 0x189   :  { %v317_v23 = vpop.f32.mrf.mxu1 }
 0x18a   :  { %v318_v24 = vadd.f32 %v317_v23, %v276_v20  ;;  %v419_v20 = vld [vmem:[%s4395_s1 + $0xc8] sm:$0xff] }
 0x18c   :  { %v378_v27 = vadd.f32 %v366_v21, %v318_v24  ;;  %v438_v21 = vld [vmem:[%s4395_s1 + $0x120] sm:$0xff] }
 0x18e   :  { %v406_v30 = vadd.f32 %v389_v28, %v378_v27 }
 0x18f   :  { %v375_v51 = vpop.f32.mrf.mxu2 }
 0x190   :  { %v410_v36 = vmax.f32 %v406_v30, 0.0  ;;  %v439_v30 = vld [vmem:[%s4395_s1 + $0x128] sm:$0xff] }
 0x191   :  { %v320_v29 = vpop.f32.mrf.mxu1 }
 0x192   :  { %v321_v32 = vadd.f32 %v320_v29, %v279_v25  ;;  %v414_v43 = vsel %vm4397_vm0, %v410_v36, 0.0  ;;  %v573_v29 = vld [vmem:[%s4395_s1 + $0x140] sm:$0xff] }
 0x194   :  { %v379_v33 = vadd.f32 %v369_v26, %v321_v32  ;;  %v420_v26 = vld [vmem:[%s4395_s1 + $0xd0] sm:$0xff]  ;;  %v421_v32 = vld [vmem:[%s4395_s1 + $0xd8] sm:$0xff] }
 0x196   :  { %v407_v37 = vadd.f32 %v394_v34, %v379_v33  ;;  %v574_v33 = vld [vmem:[%s4395_s1 + $0x148] sm:$0xff]  ;;  %v440_v34 = vld [vmem:[%s4395_s1 + $0x130] sm:$0xff] }
 0x198   :  { %v411_v39 = vmax.f32 %v407_v37, 0.0  ;;  %v441_v37 = vld [vmem:[%s4395_s1 + $0x138] sm:$0xff] }
 0x199   :  { %v323_v40 = vpop.f32.mrf.mxu1 }
 0x19a   :  { %v324_v42 = vadd.f32 %v323_v40, %v282_v35  ;;  %v415_v44 = vsel %vm4397_vm0, %v411_v39, 0.0  ;;  %v422_v35 = vld [vmem:[%s4395_s1 + $0xe0] sm:$0xff]  ;;  %v424_v40 = vld [vmem:[%s4395_s1 + $0xf0] sm:$0xff] }
 0x19b   :  { %v2646_v45 = vpack.i.bf16 %v414_v43, %v415_v44  ;;  %v425_v43 = vld [vmem:[%s4395_s1 + $0xf8] sm:$0xff]  ;;  %v578_v44 = vld [vmem:[%s4395_s1 + $0x168] sm:$0xff] }
 0x19c   :  { %v380_v46 = vadd.f32 %v372_v38, %v324_v42  ;;  %v423_v38 = vld [vmem:[%s4395_s1 + $0xe8] sm:$0xff]  ;;  %v577_v42 = vld [vmem:[%s4395_s1 + $0x160] sm:$0xff] }
 0x19d   :  { %2647 = vrot.lane.b32.xlu1 %v2646_v45, %s2794_s13 }
 0x19e   :  { %v408_v52 = vadd.f32 %v399_v48, %v380_v46  ;;  %v580_v46 = vld [vmem:[%s4395_s1 + $0x178] sm:$0xff] }
 0x1a0   :  { %v412_v60 = vmax.f32 %v408_v52, 0.0 }
 0x1a1   :  { %v326_v50 = vpop.f32.mrf.mxu1 }
 0x1a2   :  { %v327_v54 = vadd.f32 %v326_v50, %v285_v47  ;;  %v416_v1 = vsel %vm4397_vm0, %v412_v60, 0.0 }
 0x1a4   :  { %v381_v58 = vadd.f32 %v375_v51, %v327_v54 }
 0x1a5   :  { %702 = vperm.xlu1 %2623, %v668_v56  }
 0x1a6   :  { %v409_v59 = vadd.f32 %v404_v22, %v381_v58 }
 0x1a8   :  { %v413_v61 = vmax.f32 %v409_v59, 0.0 }
 0x1aa   :  { %v417_v62 = vsel %vm4397_vm0, %v413_v61, 0.0  ;;  %2325 = vmatpush.msk.msra.mxu3 %vm4397_vm0, %v413_v61 }
 0x1ab   :  { %v2641_v2 = vpack.i.bf16 %v416_v1, %v417_v62 }
 0x1ac   :  { %2326 = vmatpush.msk.msra.mxu3 %vm4397_vm0, %v412_v60 }
 0x1ad   :  { %687 = vperm.xlu1 %2623, %v665_v0   ;;  %2642 = vrot.lane.b32.xlu0 %v2641_v2, %s2795_s17 }
 0x1ae   :  { %2637 = vrot.lane.b32.xlu2 %v2641_v2, %s2794_s13  ;;  %2327 = vmatpush.msk.msra.mxu3 %vm4397_vm0, %v411_v39  ;;  %v576_v39 = vld [vmem:[%s4395_s1 + $0x158] sm:$0xff] }
 0x1b0   :  { %2328 = vmatpush.msk.msra.mxu3 %vm4397_vm0, %v410_v36  ;;  %v575_v36 = vld [vmem:[%s4395_s1 + $0x150] sm:$0xff] }
 0x1b1   :  { %2329 = vmatmul.msk.f32.vlgmr.msra.gmra.mxu3 %vm4399_vm2, %v434_v9 }
 0x1b5   :  { %672 = vperm.xlu1 %2623, %v662_v3   ;;  %707 = vperm.xlu0 %2625, %v669_v4  }
 0x1b6   :  { %2652 = vrot.lane.b32.xlu2 %v2646_v45, %s2795_s17  ;;  %v579_v45 = vld [vmem:[%s4395_s1 + $0x170] sm:$0xff] }
 0x1b9   :  { %2330 = vmatmul.msk.f32.gmra.mxu3 %vm4399_vm2, %v435_v11 }
 0x1bd   :  { %692 = vperm.xlu0 %2625, %v666_v5  }
 0x1be   :  { %697 = vperm.xlu2 %2624, %v667_v6  }
 0x1c1   :  { %2331 = vmatmul.msk.f32.gmra.mxu3 %vm4399_vm2, %v436_v15 }
 0x1c5   :  { %677 = vperm.xlu0 %2625, %v663_v7  }
 0x1c6   :  { %682 = vperm.xlu2 %2624, %v664_v8  }
 0x1c9   :  { %2332 = vmatmul.msk.f32.gmra.mxu3 %vm4399_vm2, %v437_v19 }
 0x1d1   :  { %2333 = vmatmul.msk.f32.gmra.mxu3 %vm4399_vm2, %v438_v21 }
 0x1d9   :  { %2334 = vmatmul.msk.f32.gmra.mxu3 %vm4399_vm2, %v439_v30 }
 0x1e1   :  { %2335 = vmatmul.msk.f32.gmra.mxu3 %vm4399_vm2, %v440_v34 }
 0x1e9   :  { %2336 = vmatmul.msk.f32.gmra.mxu3 %vm4399_vm2, %v441_v37 }
 0x208   :  { %v2638_v10 = vpop.permute.xlu2 %2637 }
 0x209   :  { %v2639_v12 = vunpack.i.l.bf16 %v2638_v10  ;;  %v2640_v13 = vunpack.i.h.bf16 %v2638_v10 }
 0x20b   :  { %544 = vmatpush.msrb.mxu0 %v2639_v12 }
 0x20d   :  { %545 = vmatpush.msrb.mxu0 %v2640_v13 }
 0x20f   :  { %v2648_v14 = vpop.permute.xlu1 %2647 }
 0x210   :  { %v2649_v16 = vunpack.i.l.bf16 %v2648_v14  ;;  %v2650_v17 = vunpack.i.h.bf16 %v2648_v14  ;;  %v2653_v24 = vpop.permute.xlu2 %2652 }
 0x211   :  { %v2654_v27 = vunpack.i.l.bf16 %v2653_v24  ;;  %v2655_v28 = vunpack.i.h.bf16 %v2653_v24 }
 0x212   :  { %546 = vmatpush.msrb.mxu0 %v2649_v16 }
 0x214   :  { %547 = vmatpush.msrb.mxu0 %v2650_v17 }
 0x215   :  { %2337 = vmatmul.msk.f32.vlgmr.msrb.gmra.mxu0 %vm4399_vm2, %v418_v18 }
 0x217   :  { %v703_v0 = vpop.permute.xlu1 %702 }
 0x218   :  { %v698_v61 = vpop.permute.xlu2 %697 }
 0x21d   :  { %2338 = vmatmul.msk.f32.gmra.mxu0 %vm4399_vm2, %v419_v20 }
 0x21f   :  { %v2643_v22 = vpop.permute.xlu0 %2642  ;;  %v688_v10 = vpop.permute.xlu1 %687 }
 0x220   :  { %v2644_v23 = vunpack.i.l.bf16 %v2643_v22  ;;  %v2645_v25 = vunpack.i.h.bf16 %v2643_v22  ;;  %v683_v6 = vpop.permute.xlu2 %682 }
 0x222   :  { %625 = vmatpush.msrb.mxu1 %v2644_v23 }
 0x224   :  { %626 = vmatpush.msrb.mxu1 %v2645_v25 }
 0x225   :  { %2339 = vmatmul.msk.f32.gmra.mxu0 %vm4399_vm2, %v420_v26  ;;  %v946_v26 = vld [vmem:[%s4395_s1 + $0x230] sm:$0xff] }
 0x226   :  { %627 = vmatpush.msrb.mxu1 %v2654_v27 }
 0x227   :  { %v708_v13 = vpop.permute.xlu0 %707 }
 0x228   :  { %628 = vmatpush.msrb.mxu1 %v2655_v28 }
 0x229   :  { %2345 = vmatmul.msk.f32.vlgmr.msrb.gmra.mxu1 %vm4399_vm2, %v573_v29 }
 0x22d   :  { %2340 = vmatmul.msk.f32.gmra.mxu0 %vm4399_vm2, %v421_v32 }
 0x22f   :  { %v693_v24 = vpop.permute.xlu0 %692 }
 0x231   :  { %2346 = vmatmul.msk.f32.gmra.mxu1 %vm4399_vm2, %v574_v33 }
 0x234   :  { %v484_v47 = vpop.f32.mrf.mxu3 }
 0x235   :  { %2341 = vmatmul.msk.f32.gmra.mxu0 %vm4399_vm2, %v422_v35 }
 0x239   :  { %2347 = vmatmul.msk.f32.gmra.mxu1 %vm4399_vm2, %v575_v36 }
 0x23c   :  { %v487_v50 = vpop.f32.mrf.mxu3 }
 0x23d   :  { %2342 = vmatmul.msk.f32.gmra.mxu0 %vm4399_vm2, %v423_v38 }
 0x241   :  { %2348 = vmatmul.msk.f32.gmra.mxu1 %vm4399_vm2, %v576_v39 }
 0x244   :  { %v490_v52 = vpop.f32.mrf.mxu3 }
 0x245   :  { %2343 = vmatmul.msk.f32.gmra.mxu0 %vm4399_vm2, %v424_v40 }
 0x249   :  { %2349 = vmatmul.msk.f32.gmra.mxu1 %vm4399_vm2, %v577_v42 }
 0x24c   :  { %v493_v59 = vpop.f32.mrf.mxu3 }
 0x24d   :  { %2344 = vmatmul.msk.f32.gmra.mxu0 %vm4399_vm2, %v425_v43 }
 0x251   :  { %2350 = vmatmul.msk.f32.gmra.mxu1 %vm4399_vm2, %v578_v44 }
 0x254   :  { %v496_v3 = vpop.f32.mrf.mxu3 }
 0x259   :  { %2351 = vmatmul.msk.f32.gmra.mxu1 %vm4399_vm2, %v579_v45 }
 0x25c   :  { %v499_v15 = vpop.f32.mrf.mxu3 }
 0x261   :  { %2352 = vmatmul.msk.f32.gmra.mxu1 %vm4399_vm2, %v580_v46 }
 0x264   :  { %v502_v27 = vpop.f32.mrf.mxu3 }
 0x26c   :  { %v505_v40 = vpop.f32.mrf.mxu3 }
 0x292   :  { %v549_v48 = vpop.f32.mrf.mxu0 }
 0x293   :  { %v550_v46 = vadd.f32 %v549_v48, %v484_v47 }
 0x29a   :  { %v552_v51 = vpop.f32.mrf.mxu0 }
 0x29b   :  { %v553_v44 = vadd.f32 %v552_v51, %v487_v50  ;;  %v944_v50 = vld [vmem:[%s4395_s1 + $0x220] sm:$0xff] }
 0x2a2   :  { %v555_v56 = vpop.f32.mrf.mxu0 }
 0x2a3   :  { %v556_v62 = vadd.f32 %v555_v56, %v490_v52  ;;  %v947_v56 = vld [vmem:[%s4395_s1 + $0x238] sm:$0xff] }
 0x2a6   :  { %v630_v54 = vpop.f32.mrf.mxu1 }
 0x2aa   :  { %v558_v60 = vpop.f32.mrf.mxu0 }
 0x2ab   :  { %v559_v5 = vadd.f32 %v558_v60, %v493_v59 }
 0x2ae   :  { %v633_v58 = vpop.f32.mrf.mxu1 }
 0x2af   :  { %v655_v60 = vadd.f32 %v633_v58, %v553_v44  ;;  %v1604_v44 = vld [vmem:[%s4395_s1 + $0x170] sm:$0xff] }
 0x2b2   :  { %v561_v4 = vpop.f32.mrf.mxu0 }
 0x2b3   :  { %v562_v17 = vadd.f32 %v561_v4, %v496_v3  ;;  %v678_v3 = vpop.permute.xlu0 %677 }
 0x2b4   :  { %v711_v4 = vadd.f32 %v678_v3, %v655_v60  ;;  %v4441_v3 = vmov 0 }
 0x2b6   :  { %v636_v1 = vpop.f32.mrf.mxu1 }
 0x2b7   :  { %v656_v2 = vadd.f32 %v636_v1, %v556_v62  ;;  %v654_v62 = vadd.f32 %v630_v54, %v550_v46  ;;  %v719_v54 = vmax.f32 %v711_v4, 0.0 }
 0x2b9   :  { %v712_v7 = vadd.f32 %v683_v6, %v656_v2  ;;  %v673_v6 = vpop.permute.xlu1 %672 }
 0x2ba   :  { %v564_v16 = vpop.f32.mrf.mxu0 }
 0x2bb   :  { %v3073_v11 = vmax.f32 %v712_v7, 0.0  ;;  %v565_v23 = vadd.f32 %v564_v16, %v499_v15  ;;  %v710_v7 = vadd.f32 %v673_v6, %v654_v62  ;;  %v737_v15 = vld [vmem:[%s4395_s1 + $0x1f8] sm:$0xff]  ;;  %v780_v16 = vld [vmem:[%s4395_s1 + $0x200] sm:$0xff]  ;;  %v4439_v62 = vmov 0  ;;  %v785_v6 = vld [vmem:[%s4395_s1 + $0x1c8] sm:$0xff] }
 0x2bd   :  { %v728_v18 = vsel %vm4397_vm0, %v3073_v11, 0.0  ;;  %v718_v58 = vmax.f32 %v710_v7, 0.0 }
 0x2be   :  { %v639_v8 = vpop.f32.mrf.mxu1 }
 0x2bf   :  { %v657_v9 = vadd.f32 %v639_v8, %v559_v5  ;;  %v1131_v8 = vld [vmem:[%s4395_s1 + $0x278] sm:$0xff] }
 0x2c1   :  { %v713_v12 = vadd.f32 %v688_v10, %v657_v9  ;;  %v726_v9 = vsel %vm4397_vm0, %v718_v58, 0.0 }
 0x2c2   :  { %v567_v29 = vpop.f32.mrf.mxu0 }
 0x2c3   :  { %v3075_v14 = vmax.f32 %v713_v12, 0.0  ;;  %v568_v35 = vadd.f32 %v567_v29, %v502_v27  ;;  %v734_v12 = vld [vmem:[%s4395_s1 + $0x1e0] sm:$0xff]  ;;  %v3182_v29 = vshrl.u32 %v12_v31, 7 }
 0x2c5   :  { %v729_v19 = vsel %vm4397_vm0, %v3075_v14, 0.0  ;;  %v3192_v31 = vadd.s32 88, %v3182_v29  ;;  %v3209_v46 = vadd.s32 80, %v3182_v29  ;;  %v3222_v60 = vadd.s32 72, %v3182_v29 }
 0x2c6   :  { %v642_v20 = vpop.f32.mrf.mxu1  ;;  %v2666_v21 = vpack.i.bf16 %v728_v18, %v729_v19 }
 0x2c7   :  { %v658_v22 = vadd.f32 %v642_v20, %v562_v17  ;;  %v781_v17 = vld [vmem:[%s4395_s1 + $0x208] sm:$0xff]  ;;  %v40_v4 = vmul.u32 2, %v3222_v60 }
 0x2c8   :  { %2667 = vrot.lane.b32.xlu1 %v2666_v21, %s2795_s17  ;;  %v782_v21 = vld [vmem:[%s4395_s1 + $0x210] sm:$0xff] }
 0x2c9   :  { %v714_v25 = vadd.f32 %v693_v24, %v658_v22  ;;  %vm3290_vm12 = vcmp.eq.s32.totalorder %v2850_v41, %v40_v4 }
 0x2ca   :  { %v570_v42 = vpop.f32.mrf.mxu0 }
 0x2cb   :  { %v722_v32 = vmax.f32 %v714_v25, 0.0  ;;  %v571_v45 = vadd.f32 %v570_v42, %v505_v40  ;;  %v784_v42 = vld [vmem:[%s4395_s1 + $0x1c0] sm:$0xff] }
 0x2cd   :  { %v730_v36 = vsel %vm4397_vm0, %v722_v32, 0.0 }
 0x2ce   :  { %v645_v28 = vpop.f32.mrf.mxu1 }
 0x2cf   :  { %v659_v30 = vadd.f32 %v645_v28, %v565_v23  ;;  %v783_v28 = vld [vmem:[%s4395_s1 + $0x218] sm:$0xff] }
 0x2d0   :  { %960 = vperm.xlu1 %2623, %v946_v26  }
 0x2d1   :  { %v715_v33 = vadd.f32 %v698_v61, %v659_v30 }
 0x2d3   :  { %v723_v34 = vmax.f32 %v715_v33, 0.0  ;;  %v29_v33 = vadd.s32 112, %v3182_v29 }
 0x2d5   :  { %v731_v37 = vsel %vm4397_vm0, %v723_v34, 0.0 }
 0x2d6   :  { %v648_v38 = vpop.f32.mrf.mxu1  ;;  %v2661_v39 = vpack.i.bf16 %v730_v36, %v731_v37 }
 0x2d7   :  { %v660_v43 = vadd.f32 %v648_v38, %v568_v35  ;;  %v3189_v35 = vadd.s32 96, %v3182_v29  ;;  %v45_v38 = vmul.u32 2, %v29_v33 }
 0x2d8   :  { %2662 = vrot.lane.b32.xlu0 %v2661_v39, %s2795_s17 }
 0x2d9   :  { %v716_v52 = vadd.f32 %v703_v0, %v660_v43  ;;  %v727_v0 = vsel %vm4397_vm0, %v719_v54, 0.0  ;;  %vm3203_vm5 = vcmp.eq.s32.totalorder %v2850_v41, %v45_v38  ;;  %v3266_v7 = vadd.s32 1, %v45_v38  ;;  %v1450_v43 = vld [vmem:[%s4395_s1 + $0xf0] sm:$0xff] }
 0x2da   :  { %v2671_v10 = vpack.i.bf16 %v726_v9, %v727_v0  ;;  %v3296_v0 = vadd.s32 40, %v3182_v29 }
 0x2db   :  { %v724_v1 = vmax.f32 %v716_v52, 0.0  ;;  %v2796_v52 = vmov 1.0   ;;  %vm4401_vm11 = vcmp.eq.s32.totalorder %v2850_v41, %v3266_v7 }
 0x2dd   :  { %v732_v47 = vsel %vm4397_vm0, %v724_v1, 0.0 }
 0x2de   :  { %v651_v59 = vpop.f32.mrf.mxu1 }
 0x2df   :  { %v661_v61 = vadd.f32 %v651_v59, %v571_v45  ;;  %v43_v45 = vmul.u32 2, %v3189_v35  ;;  %v42_v59 = vmul.u32 2, %v3192_v31  ;;  %v3487_v35 = vadd.s32 1, %v40_v4 }
 0x2e0   :  { %965 = vperm.xlu0 %2625, %v947_v56   ;;  %v1451_v56 = vld [vmem:[%s4395_s1 + $0xf8] sm:$0xff] }
 0x2e1   :  { %v717_v2 = vadd.f32 %v708_v13, %v661_v61  ;;  %v735_v13 = vld [vmem:[%s4395_s1 + $0x1e8] sm:$0xff]  ;;  %vm3232_vm7 = vcmp.eq.s32.totalorder %v2850_v41, %v43_v45  ;;  %vm3248_vm9 = vcmp.eq.s32.totalorder %v2850_v41, %v42_v59  ;;  %v3439_v33 = vadd.s32 1, %v43_v45 }
 0x2e2   :  { %v4440_v62 = vsel %vm3232_vm7, 4294967295, %v4439_v62  ;;  %v4442_v3 = vsel %vm3248_vm9, 4294967295, %v4441_v3 }
 0x2e3   :  { %v725_v5 = vmax.f32 %v717_v2, 0.0  ;;  %v3238_v2 = vadd.s32 64, %v3182_v29 }
 0x2e5   :  { %2353 = vmatpush.msk.msrb.mxu2 %vm4397_vm0, %v725_v5  ;;  %2369 = vmatpush.msk.msrb.mxu3 %vm4397_vm0, %v725_v5  ;;  %v733_v48 = vsel %vm4397_vm0, %v725_v5, 0.0  ;;  %v3254_v5 = vadd.s32 56, %v3182_v29 }
 0x2e6   :  { %v2656_v51 = vpack.i.bf16 %v732_v47, %v733_v48  ;;  %v39_v48 = vmul.u32 2, %v3238_v2 }
 0x2e7   :  { %2354 = vmatpush.msk.msrb.mxu2 %vm4397_vm0, %v724_v1  ;;  %2370 = vmatpush.msk.msrb.mxu3 %vm4397_vm0, %v724_v1  ;;  %v41_v1 = vmul.u32 2, %v3209_v46 }
 0x2e8   :  { %2657 = vrot.lane.b32.xlu2 %v2656_v51, %s2795_s17  ;;  %950 = vperm.xlu0 %2625, %v944_v50   ;;  %v3277_v50 = vadd.s32 48, %v3182_v29  ;;  %vm3310_vm14 = vcmp.eq.s32.totalorder %v2850_v41, %v39_v48 }
 0x2e9   :  { %2355 = vmatpush.msk.msrb.mxu2 %vm4397_vm0, %v723_v34  ;;  %2371 = vmatpush.msk.msrb.mxu3 %vm4397_vm0, %v723_v34  ;;  %v28_v34 = vadd.s32 104, %v3182_v29  ;;  %vm3271_vm10 = vcmp.eq.s32.totalorder %v2850_v41, %v41_v1 }
 0x2ea   :  { %v37_v9 = vmul.u32 2, %v3277_v50 }
 0x2eb   :  { %2356 = vmatpush.msk.msrb.mxu2 %vm4397_vm0, %v722_v32  ;;  %2372 = vmatpush.msk.msrb.mxu3 %vm4397_vm0, %v722_v32  ;;  %v30_v32 = vadd.s32 120, %v3182_v29  ;;  %v44_v39 = vmul.u32 2, %v28_v34  ;;  %v3446_v34 = vadd.s32 1, %v42_v59 }
 0x2ed   :  { %2357 = vmatpush.msk.msrb.mxu2 %vm4397_vm0, %v3075_v14  ;;  %2373 = vmatpush.msk.msrb.mxu3 %vm4397_vm0, %v3075_v14  ;;  %v736_v14 = vld [vmem:[%s4395_s1 + $0x1f0] sm:$0xff]  ;;  %v46_v37 = vmul.u32 2, %v30_v32  ;;  %vm3216_vm6 = vcmp.eq.s32.totalorder %v2850_v41, %v44_v39  ;;  %v3279_v51 = vadd.s32 1, %v44_v39  ;;  %v3502_v39 = vadd.s32 1, %v37_v9 }
 0x2ef   :  { %2358 = vmatpush.msk.msrb.mxu2 %vm4397_vm0, %v3073_v11  ;;  %2374 = vmatpush.msk.msrb.mxu3 %vm4397_vm0, %v3073_v11  ;;  %v945_v11 = vld [vmem:[%s4395_s1 + $0x228] sm:$0xff]  ;;  %vm3198_vm4 = vcmp.eq.s32.totalorder %v2850_v41, %v46_v37  ;;  %v3227_v61 = vadd.s32 1, %v46_v37  ;;  %vm4400_vm13 = vcmp.eq.s32.totalorder %v2850_v41, %v3279_v51  ;;  %v3494_v37 = vadd.s32 1, %v39_v48 }
 0x2f0   :  { %1139 = vperm.xlu0 %2625, %v1131_v8   ;;  %2672 = vrot.lane.b32.xlu2 %v2671_v10, %s2795_s17  ;;  %v3316_v10 = vadd.s32 32, %v3182_v29 }
 0x2f1   :  { %2359 = vmatpush.msk.msrb.mxu2 %vm4397_vm0, %v719_v54  ;;  %2375 = vmatpush.msk.msrb.mxu3 %vm4397_vm0, %v719_v54  ;;  %vm4402_vm8 = vcmp.eq.s32.totalorder %v2850_v41, %v3227_v61 }
 0x2f2   :  { %2397 = vmatpush.msk.msra.mxu1 %vm3198_vm4, %v2796_v52  ;;  %2381 = vmatpush.msk.msra.mxu0 %vm4402_vm8, %v2796_v52 }
 0x2f3   :  { %2360 = vmatpush.msk.msrb.mxu2 %vm4397_vm0, %v718_v58  ;;  %2376 = vmatpush.msk.msrb.mxu3 %vm4397_vm0, %v718_v58  ;;  %v38_v58 = vmul.u32 2, %v3254_v5  ;;  %vm3343_vm0 = vcmp.eq.s32.totalorder %v2850_v41, %v37_v9 }
 0x2f4   :  { %2361 = vmatmul.msk.f32.vlgmr.msrb.gmra.mxu2 %vm4405_vm3, %v734_v12  ;;  %2377 = vmatmul.msk.f32.vlgmr.msrb.gmra.mxu3 %vm4405_vm3, %v780_v16  ;;  %v4449_v12 = vmov 0  ;;  %v35_v16 = vmul.u32 2, %v3316_v10 }
 0x2f5   :  { %2398 = vmatpush.msk.msra.mxu1 %vm3203_vm5, %v2796_v52  ;;  %2382 = vmatpush.msk.msra.mxu0 %vm4401_vm11, %v2796_v52  ;;  %vm3328_vm15 = vcmp.eq.s32.totalorder %v2850_v41, %v38_v58  ;;  %v3498_v38 = vadd.s32 1, %v38_v58 }
 0x2f6   :  { %v4450_v12 = vsel %vm3328_vm15, 4294967295, %v4449_v12  ;;  %vm3372_vm2 = vcmp.eq.s32.totalorder %v2850_v41, %v35_v16 }
 0x2f7   :  { %2399 = vmatpush.msk.msra.mxu1 %vm3216_vm6, %v2796_v52  ;;  %2383 = vmatpush.msk.msra.mxu0 %vm4400_vm13, %v2796_v52 }
 0x2f8   :  { %955 = vperm.xlu2 %2624, %v945_v11   ;;  %v36_v11 = vmul.u32 2, %v3296_v0 }
 0x2f9   :  { %2400 = vmatpush.msk.msra.mxu1 %vm3232_vm7, %v2796_v52 }
 0x2fa   :  { %vm3358_vm1 = vcmp.eq.s32.totalorder %v2850_v41, %v36_v11  ;;  %v3533_v31 = vadd.s32 1, %v36_v11 }
 0x2fb   :  { %2401 = vmatpush.msk.msra.mxu1 %vm3248_vm9, %v2796_v52 }
 0x2fc   :  { %2362 = vmatmul.msk.f32.gmra.mxu2 %vm4405_vm3, %v735_v13  ;;  %2378 = vmatmul.msk.f32.gmra.mxu3 %vm4405_vm3, %v781_v17  ;;  %v3334_v13 = vadd.s32 24, %v3182_v29  ;;  %v3349_v17 = vadd.s32 16, %v3182_v29 }
 0x2fd   :  { %2402 = vmatpush.msk.msra.mxu1 %vm3271_vm10, %v2796_v52 }
 0x2ff   :  { %2403 = vmatpush.msk.msra.mxu1 %vm3290_vm12, %v2796_v52 }
 0x301   :  { %2404 = vmatpush.msk.msra.mxu1 %vm3310_vm14, %v2796_v52 }
 0x303   :  { %2405 = vmatpush.msk.msra.mxu1 %vm3328_vm15, %v2796_v52 }
 0x304   :  { %2363 = vmatmul.msk.f32.gmra.mxu2 %vm4405_vm3, %v736_v14  ;;  %2379 = vmatmul.msk.f32.gmra.mxu3 %vm4405_vm3, %v782_v21  ;;  %v786_v14 = vld [vmem:[%s4395_s1 + $0x1d0] sm:$0xff]  ;;  %v4455_v21 = vmov 0 }
 0x305   :  { %2406 = vmatpush.msk.msra.mxu1 %vm3343_vm0, %v2796_v52  ;;  %v4456_v21 = vsel %vm3372_vm2, 4294967295, %v4455_v21 }
 0x307   :  { %2407 = vmatpush.msk.msra.mxu1 %vm3358_vm1, %v2796_v52 }
 0x309   :  { %2408 = vmatpush.msk.msra.mxu1 %vm3372_vm2, %v2796_v52 }
 0x30c   :  { %2364 = vmatmul.msk.f32.gmra.mxu2 %vm4405_vm3, %v737_v15  ;;  %2380 = vmatmul.msk.f32.gmra.mxu3 %vm4405_vm3, %v783_v28  ;;  %v4451_v15 = vmov 0  ;;  %v4461_v28 = vmov 0 }
 0x30d   :  { %v4452_v15 = vsel %vm3343_vm0, 4294967295, %v4451_v15 }
 0x33a   :  { %v2668_v24 = vpop.permute.xlu1 %2667 }
 0x33b   :  { %v2669_v26 = vunpack.i.l.bf16 %v2668_v24  ;;  %v2670_v30 = vunpack.i.h.bf16 %v2668_v24 }
 0x342   :  { %v2658_v18 = vpop.permute.xlu2 %2657 }
 0x343   :  { %v2659_v19 = vunpack.i.l.bf16 %v2658_v18  ;;  %v2660_v20 = vunpack.i.h.bf16 %v2658_v18  ;;  %v4453_v18 = vmov 0 }
 0x344   :  { %v4454_v18 = vsel %vm3358_vm1, 4294967295, %v4453_v18 }
 0x345   :  { %824 = vmatpush.msra.mxu2 %v2659_v19  ;;  %v34_v19 = vmul.u32 2, %v3334_v13 }
 0x347   :  { %825 = vmatpush.msra.mxu2 %v2660_v20  ;;  %v3364_v20 = vadd.s32 8, %v3182_v29  ;;  %vm3381_vm13 = vcmp.eq.s32.totalorder %v2850_v41, %v34_v19 }
 0x348   :  { %2409 = vmatpush.msk.msra.mxu1 %vm3381_vm13, %v2796_v52 }
 0x349   :  { %v32_v24 = vmul.u32 2, %v3364_v20 }
 0x34a   :  { %v2663_v22 = vpop.permute.xlu0 %2662  ;;  %v2673_v27 = vpop.permute.xlu2 %2672 }
 0x34b   :  { %v2664_v23 = vunpack.i.l.bf16 %v2663_v22  ;;  %v2665_v25 = vunpack.i.h.bf16 %v2663_v22  ;;  %v2674_v36 = vunpack.i.l.bf16 %v2673_v27  ;;  %v2675_v40 = vunpack.i.h.bf16 %v2673_v27 }
 0x34c   :  { %v33_v22 = vmul.u32 2, %v3349_v17  ;;  %v31_v27 = vmul.u32 2, %v3182_v29  ;;  %vm3405_vm8 = vcmp.eq.s32.totalorder %v2850_v41, %v32_v24 }
 0x34d   :  { %826 = vmatpush.msra.mxu2 %v2664_v23  ;;  %v4462_v28 = vsel %vm3405_vm8, 4294967295, %v4461_v28 }
 0x34e   :  { %vm3393_vm11 = vcmp.eq.s32.totalorder %v2850_v41, %v33_v22  ;;  %vm3415_vm2 = vcmp.eq.s32.totalorder %v2850_v41, %v31_v27  ;;  %v3550_v45 = vadd.s32 1, %v33_v22  ;;  %v3585_v2 = vadd.s32 1, %v31_v27 }
 0x34f   :  { %827 = vmatpush.msra.mxu2 %v2665_v25  ;;  %v787_v25 = vld [vmem:[%s4395_s1 + $0x1d8] sm:$0xff]  ;;  %2410 = vmatpush.msk.msra.mxu1 %vm3393_vm11, %v2796_v52 }
 0x351   :  { %828 = vmatpush.msra.mxu2 %v2669_v26  ;;  %v4459_v26 = vmov 0  ;;  %2411 = vmatpush.msk.msra.mxu1 %vm3405_vm8, %v2796_v52 }
 0x352   :  { %v4460_v26 = vsel %vm3393_vm11, 4294967295, %v4459_v26 }
 0x353   :  { %829 = vmatpush.msra.mxu2 %v2670_v30  ;;  %v4463_v30 = vmov 0  ;;  %2412 = vmatpush.msk.msra.mxu1 %vm3415_vm2, %v2796_v52 }
 0x354   :  { %v4464_v30 = vsel %vm3415_vm2, 4294967295, %v4463_v30 }
 0x355   :  { %830 = vmatpush.msra.mxu2 %v2674_v36  ;;  %2443 = vmatpush.msk.msrb.mxu1 %vm3198_vm4, %v2796_v52  ;;  %v3450_v36 = vadd.s32 1, %v41_v1  ;;  %v3579_v1 = vadd.s32 1, %v32_v24 }
 0x357   :  { %831 = vmatpush.msra.mxu2 %v2675_v40  ;;  %2444 = vmatpush.msk.msrb.mxu1 %vm3203_vm5, %v2796_v52  ;;  %v3544_v40 = vadd.s32 1, %v35_v16  ;;  %v966_v16 = vpop.permute.xlu0 %965 }
 0x358   :  { %2365 = vmatmul.msk.f32.vlgmr.msra.gmra.mxu2 %vm4405_vm3, %v784_v42  ;;  %v3546_v42 = vadd.s32 1, %v34_v19 }
 0x359   :  { %2445 = vmatpush.msk.msrb.mxu1 %vm3216_vm6, %v2796_v52 }
 0x35b   :  { %2446 = vmatpush.msk.msrb.mxu1 %vm3232_vm7, %v2796_v52  ;;  %vm4410_vm7 = vcmp.eq.s32.totalorder %v2850_v41, %v3450_v36 }
 0x35d   :  { %2447 = vmatpush.msk.msrb.mxu1 %vm3248_vm9, %v2796_v52  ;;  %vm4411_vm9 = vcmp.eq.s32.totalorder %v2850_v41, %v3446_v34 }
 0x35f   :  { %2448 = vmatpush.msk.msrb.mxu1 %vm3271_vm10, %v2796_v52  ;;  %v951_v22 = vpop.permute.xlu0 %950 }
 0x360   :  { %2366 = vmatmul.msk.f32.gmra.mxu2 %vm4405_vm3, %v785_v6 }
 0x361   :  { %2449 = vmatpush.msk.msrb.mxu1 %vm3290_vm12, %v2796_v52 }
 0x363   :  { %2450 = vmatpush.msk.msrb.mxu1 %vm3310_vm14, %v2796_v52 }
 0x365   :  { %2451 = vmatpush.msk.msrb.mxu1 %vm3328_vm15, %v2796_v52 }
 0x367   :  { %2452 = vmatpush.msk.msrb.mxu1 %vm3343_vm0, %v2796_v52 }
 0x368   :  { %2367 = vmatmul.msk.f32.gmra.mxu2 %vm4405_vm3, %v786_v14 }
 0x369   :  { %2453 = vmatpush.msk.msrb.mxu1 %vm3358_vm1, %v2796_v52  ;;  %vm4415_vm1 = vcmp.eq.s32.totalorder %v2850_v41, %v3498_v38 }
 0x370   :  { %2368 = vmatmul.msk.f32.gmra.mxu2 %vm4405_vm3, %v787_v25  ;;  %vm4412_vm3 = vcmp.eq.s32.totalorder %v2850_v41, %v3439_v33 }
 0x371   :  { %2384 = vmatpush.msk.msra.mxu0 %vm4412_vm3, %v2796_v52  ;;  %vm4417_vm3 = vcmp.eq.s32.totalorder %v2850_v41, %v3494_v37 }
 0x373   :  { %2385 = vmatpush.msk.msra.mxu0 %vm4411_vm9, %v2796_v52  ;;  %vm4465_vm9 = vnez %v4456_v21 }
 0x374   :  { %2454 = vmatpush.msk.msrb.mxu1 %vm4465_vm9, %v2796_v52  ;;  %vm4416_vm9 = vcmp.eq.s32.totalorder %v2850_v41, %v3502_v39 }
 0x375   :  { %2386 = vmatpush.msk.msra.mxu0 %vm4410_vm7, %v2796_v52  ;;  %vm4418_vm7 = vcmp.eq.s32.totalorder %v2850_v41, %v3487_v35 }
 0x376   :  { %2455 = vmatpush.msk.msrb.mxu1 %vm3381_vm13, %v2796_v52 }
 0x377   :  { %v768_v32 = vpop.f32.mrf.mxu2  ;;  %2387 = vmatpush.msk.msra.mxu0 %vm4418_vm7, %v2796_v52  ;;  %vm4420_vm7 = vcmp.eq.s32.totalorder %v2850_v41, %v3550_v45  ;;  %v874_v29 = vpop.f32.mrf.mxu3 }
 0x378   :  { %931 = vmatmul.f32.vlgmr.msra.gmra.mxu1 %v768_v32  ;;  %v956_v32 = vpop.permute.xlu2 %955 }
 0x379   :  { %2388 = vmatpush.msk.msra.mxu0 %vm4417_vm3, %v2796_v52  ;;  %2456 = vmatpush.msk.msrb.mxu1 %vm3393_vm11, %v2796_v52  ;;  %vm4421_vm3 = vcmp.eq.s32.totalorder %v2850_v41, %v3546_v42 }
 0x37b   :  { %2389 = vmatpush.msk.msra.mxu0 %vm4415_vm1, %v2796_v52  ;;  %2457 = vmatpush.msk.msrb.mxu1 %vm3405_vm8, %v2796_v52  ;;  %vm4422_vm1 = vcmp.eq.s32.totalorder %v2850_v41, %v3533_v31 }
 0x37d   :  { %2390 = vmatpush.msk.msra.mxu0 %vm4416_vm9, %v2796_v52  ;;  %2458 = vmatpush.msk.msrb.mxu1 %vm3415_vm2, %v2796_v52  ;;  %vm4419_vm9 = vcmp.eq.s32.totalorder %v2850_v41, %v3544_v40  ;;  %vm4469_vm2 = vcmp.eq.s32.totalorder %v2850_v41, %v3439_v33 }
 0x37f   :  { %2391 = vmatpush.msk.msra.mxu0 %vm4422_vm1, %v2796_v52  ;;  %v771_v46 = vpop.f32.mrf.mxu2  ;;  %vm4467_vm1 = vcmp.eq.s32.totalorder %v2850_v41, %v3266_v7  ;;  %v877_v6 = vpop.f32.mrf.mxu3 }
 0x380   :  { %934 = vmatmul.f32.gmra.mxu1 %v771_v46 }
 0x381   :  { %2392 = vmatpush.msk.msra.mxu0 %vm4419_vm9, %v2796_v52  ;;  %vm4423_vm9 = vcmp.eq.s32.totalorder %v2850_v41, %v3579_v1 }
 0x383   :  { %2393 = vmatpush.msk.msra.mxu0 %vm4421_vm3, %v2796_v52  ;;  %vm4466_vm3 = vcmp.eq.s32.totalorder %v2850_v41, %v3227_v61 }
 0x385   :  { %2394 = vmatpush.msk.msra.mxu0 %vm4420_vm7, %v2796_v52  ;;  %vm4426_vm7 = vcmp.eq.s32.totalorder %v2850_v41, %v3585_v2 }
 0x387   :  { %v774_v59 = vpop.f32.mrf.mxu2  ;;  %2395 = vmatpush.msk.msra.mxu0 %vm4423_vm9, %v2796_v52  ;;  %vm4468_vm9 = vcmp.eq.s32.totalorder %v2850_v41, %v3279_v51  ;;  %v880_v58 = vpop.f32.mrf.mxu3 }
 0x388   :  { %937 = vmatmul.f32.gmra.mxu1 %v774_v59 }
 0x389   :  { %2396 = vmatpush.msk.msra.mxu0 %vm4426_vm7, %v2796_v52  ;;  %vm4470_vm7 = vcmp.eq.s32.totalorder %v2850_v41, %v3446_v34 }
 0x38b   :  { %2427 = vmatpush.msk.msrb.mxu0 %vm4466_vm3, %v2796_v52  ;;  %vm4471_vm3 = vcmp.eq.s32.totalorder %v2850_v41, %v3450_v36 }
 0x38d   :  { %2428 = vmatpush.msk.msrb.mxu0 %vm4467_vm1, %v2796_v52  ;;  %vm4472_vm1 = vcmp.eq.s32.totalorder %v2850_v41, %v3487_v35 }
 0x38f   :  { %v777_v60 = vpop.f32.mrf.mxu2  ;;  %2429 = vmatpush.msk.msrb.mxu0 %vm4468_vm9, %v2796_v52  ;;  %vm4473_vm9 = vcmp.eq.s32.totalorder %v2850_v41, %v3494_v37  ;;  %v883_v10 = vpop.f32.mrf.mxu3 }
 0x390   :  { %940 = vmatmul.f32.gmra.mxu1 %v777_v60 }
 0x391   :  { %2430 = vmatpush.msk.msrb.mxu0 %vm4469_vm2, %v2796_v52  ;;  %vm4474_vm2 = vcmp.eq.s32.totalorder %v2850_v41, %v3498_v38 }
 0x393   :  { %2431 = vmatpush.msk.msrb.mxu0 %vm4470_vm7, %v2796_v52  ;;  %vm4475_vm7 = vcmp.eq.s32.totalorder %v2850_v41, %v3502_v39 }
 0x395   :  { %2432 = vmatpush.msk.msrb.mxu0 %vm4471_vm3, %v2796_v52  ;;  %vm4476_vm3 = vcmp.eq.s32.totalorder %v2850_v41, %v3533_v31 }
 0x397   :  { %2433 = vmatpush.msk.msrb.mxu0 %vm4472_vm1, %v2796_v52  ;;  %vm4477_vm1 = vcmp.eq.s32.totalorder %v2850_v41, %v3544_v40 }
 0x399   :  { %2434 = vmatpush.msk.msrb.mxu0 %vm4473_vm9, %v2796_v52  ;;  %vm4478_vm9 = vcmp.eq.s32.totalorder %v2850_v41, %v3546_v42 }
 0x39b   :  { %2435 = vmatpush.msk.msrb.mxu0 %vm4474_vm2, %v2796_v52  ;;  %vm4479_vm2 = vcmp.eq.s32.totalorder %v2850_v41, %v3550_v45 }
 0x39d   :  { %2436 = vmatpush.msk.msrb.mxu0 %vm4475_vm7, %v2796_v52  ;;  %vm4480_vm7 = vcmp.eq.s32.totalorder %v2850_v41, %v3579_v1 }
 0x39f   :  { %2437 = vmatpush.msk.msrb.mxu0 %vm4476_vm3, %v2796_v52  ;;  %vm4481_vm3 = vcmp.eq.s32.totalorder %v2850_v41, %v3585_v2 }
 0x3a1   :  { %2438 = vmatpush.msk.msrb.mxu0 %vm4477_vm1, %v2796_v52  ;;  %vm4428_vm1 = vcmp.lt.s32.totalorder %v2850_v41, 32 }
 0x3a3   :  { %2439 = vmatpush.msk.msrb.mxu0 %vm4478_vm9, %v2796_v52  ;;  %vm4482_vm9 = vcmask 261120  }
 0x3a5   :  { %2440 = vmatpush.msk.msrb.mxu0 %vm4479_vm2, %v2796_v52  ;;  %vm4483_vm2 = vmmov %vm4482_vm9 }
 0x3a7   :  { %2441 = vmatpush.msk.msrb.mxu0 %vm4480_vm7, %v2796_v52  ;;  %vm4484_vm7 = vmmov %vm4483_vm2 }
 0x3a9   :  { %2442 = vmatpush.msk.msrb.mxu0 %vm4481_vm3, %v2796_v52  ;;  %vm4485_vm3 = vmmov %vm4483_vm2 }
 0x3db   :  { %v833_v4 = vpop.f32.mrf.mxu2 }
 0x3dc   :  { %v875_v5 = vadd.f32 %v874_v29, %v833_v4 }
 0x3de   :  { %902 = vmatmul.f32.vlgmr.msra.gmra.mxu0 %v875_v5 }
 0x3e3   :  { %v836_v48 = vpop.f32.mrf.mxu2 }
 0x3e4   :  { %v878_v50 = vadd.f32 %v877_v6, %v836_v48 }
 0x3e6   :  { %905 = vmatmul.f32.gmra.mxu0 %v878_v50 }
 0x3eb   :  { %v839_v0 = vpop.f32.mrf.mxu2 }
 0x3ec   :  { %v881_v9 = vadd.f32 %v880_v58, %v839_v0  ;;  %v961_v58 = vpop.permute.xlu1 %960 }
 0x3ee   :  { %908 = vmatmul.f32.gmra.mxu0 %v881_v9 }
 0x3f3   :  { %v842_v11 = vpop.f32.mrf.mxu2 }
 0x3f4   :  { %v884_v13 = vadd.f32 %v883_v10, %v842_v11 }
 0x3f5   :  { %v932_v14 = vpop.f32.mrf.mxu1 }
 0x3f6   :  { %911 = vmatmul.f32.gmra.mxu0 %v884_v13 }
 0x3fd   :  { %v935_v20 = vpop.f32.mrf.mxu1 }
 0x405   :  { %v938_v29 = vpop.f32.mrf.mxu1 }
 0x40d   :  { %v941_v9 = vpop.f32.mrf.mxu1 }
 0x45b   :  { %v903_v17 = vpop.f32.mrf.mxu0 }
 0x45c   :  { %v933_v19 = vadd.f32 %v932_v14, %v903_v17 }
 0x45e   :  { %v968_v24 = vadd.f32 %v951_v22, %v933_v19 }
 0x460   :  { %v973_v46 = vmax.f32 %v968_v24, 0.0  ;;  %v2766_v24 = vld [vmem:[%s4395_s1 + $0xb0] sm:$0xff] }
 0x462   :  { %v979_v4 = vsel %vm4428_vm1, %v973_v46, 0.0 }
 0x463   :  { %v906_v25 = vpop.f32.mrf.mxu0 }
 0x464   :  { %v936_v27 = vadd.f32 %v935_v20, %v906_v25  ;;  %v983_v25 = vld [vmem:[%s4395_s1 + $0x250] sm:$0xff] }
 0x466   :  { %v969_v59 = vadd.f32 %v956_v32, %v936_v27  ;;  %v984_v27 = vld [vmem:[%s4395_s1 + $0x258] sm:$0xff]  ;;  %v1014_v32 = vld [vmem:[%s4395_s1 + $0x260] sm:$0xff] }
 0x468   :  { %v974_v60 = vmax.f32 %v969_v59, 0.0 }
 0x46a   :  { %v980_v5 = vsel %vm4428_vm1, %v974_v60, 0.0 }
 0x46b   :  { %v909_v6 = vpop.f32.mrf.mxu0  ;;  %v2681_v48 = vpack.i.bf16 %v979_v4, %v980_v5 }
 0x46c   :  { %v939_v50 = vadd.f32 %v938_v29, %v909_v6 }
 0x46d   :  { %2682 = vrot.lane.b32.xlu2 %v2681_v48, %s2795_s17  ;;  %v1016_v48 = vld [vmem:[%s4395_s1 + $0x240] sm:$0xff] }
 0x46e   :  { %v970_v0 = vadd.f32 %v961_v58, %v939_v50  ;;  %v1017_v50 = vld [vmem:[%s4395_s1 + $0x248] sm:$0xff] }
 0x470   :  { %v975_v13 = vmax.f32 %v970_v0, 0.0 }
 0x472   :  { %v981_v19 = vsel %vm4428_vm1, %v975_v13, 0.0 }
 0x473   :  { %v912_v10 = vpop.f32.mrf.mxu0 }
 0x474   :  { %v942_v11 = vadd.f32 %v941_v9, %v912_v10 }
 0x476   :  { %v971_v14 = vadd.f32 %v966_v16, %v942_v11  ;;  %v1130_v16 = vld [vmem:[%s4395_s1 + $0x270] sm:$0xff] }
 0x478   :  { %v976_v17 = vmax.f32 %v971_v14, 0.0 }
 0x47a   :  { %2413 = vmatpush.msk.msrb.mxu2 %vm4428_vm1, %v976_v17  ;;  %v982_v20 = vsel %vm4428_vm1, %v976_v17, 0.0 }
 0x47b   :  { %v2676_v22 = vpack.i.bf16 %v981_v19, %v982_v20 }
 0x47c   :  { %2414 = vmatpush.msk.msrb.mxu2 %vm4428_vm1, %v975_v13 }
 0x47d   :  { %2677 = vrot.lane.b32.xlu1 %v2676_v22, %s2795_s17 }
 0x47e   :  { %2415 = vmatpush.msk.msrb.mxu2 %vm4428_vm1, %v974_v60 }
 0x480   :  { %2416 = vmatpush.msk.msrb.mxu2 %vm4428_vm1, %v973_v46 }
 0x481   :  { %2417 = vmatmul.msk.f32.vlgmr.msrb.gmra.mxu2 %vm4482_vm9, %v983_v25  ;;  %vm4486_vm9 = vmmov %vm4483_vm2 }
 0x482   :  { %2421 = vmatpush.msk.msra.mxu2 %vm4428_vm1, %v976_v17 }
 0x484   :  { %2422 = vmatpush.msk.msra.mxu2 %vm4428_vm1, %v975_v13 }
 0x485   :  { %1134 = vperm.xlu1 %2623, %v1130_v16  }
 0x486   :  { %2423 = vmatpush.msk.msra.mxu2 %vm4428_vm1, %v974_v60 }
 0x488   :  { %2424 = vmatpush.msk.msra.mxu2 %vm4428_vm1, %v973_v46  ;;  %v1015_v46 = vld [vmem:[%s4395_s1 + $0x268] sm:$0xff] }
 0x489   :  { %2418 = vmatmul.msk.f32.gmra.mxu2 %vm4483_vm2, %v984_v27 }
 0x48d   :  { %2697 = vrot.lane.b32.xlu1 %v2875_v63, %s2794_s13 }
 0x491   :  { %2425 = vmatmul.msk.f32.vlgmr.msra.gmra.mxu2 %vm4484_vm7, %v1014_v32  ;;  %vm4427_vm7 = vcmp.lt.s32.totalorder %v2850_v41, 64 }
 0x495   :  { %1424 = vperm.xlu1 %2623, %v2766_v24  }
 0x499   :  { %2426 = vmatmul.msk.f32.gmra.mxu2 %vm4485_vm3, %v1015_v46  ;;  %v1140_v46 = vpop.permute.xlu0 %1139  ;;  %vm4487_vm3 = vcmask 130048  }
 0x4c7   :  { %v2683_v29 = vpop.permute.xlu2 %2682 }
 0x4c8   :  { %v2684_v5 = vunpack.i.l.bf16 %v2683_v29  ;;  %v2685_v6 = vunpack.i.h.bf16 %v2683_v29 }
 0x4ef   :  { %v2678_v59 = vpop.permute.xlu1 %2677 }
 0x4f0   :  { %v2679_v60 = vunpack.i.l.bf16 %v2678_v59  ;;  %v2680_v4 = vunpack.i.h.bf16 %v2678_v59 }
 0x4f2   :  { %1044 = vmatpush.msra.mxu3 %v2679_v60 }
 0x4f4   :  { %1045 = vmatpush.msra.mxu3 %v2680_v4 }
 0x4f6   :  { %1046 = vmatpush.msra.mxu3 %v2684_v5 }
 0x4f7   :  { %v1135_v16 = vpop.permute.xlu1 %1134 }
 0x4f8   :  { %1047 = vmatpush.msra.mxu3 %v2685_v6 }
 0x4f9   :  { %2419 = vmatmul.msk.f32.vlgmr.msra.gmra.mxu3 %vm4486_vm9, %v1016_v48  ;;  %v1411_v48 = vld [vmem:[%s4395_s1 + $0xb8] sm:$0xff]  ;;  %vm4488_vm9 = vcmp.lt.s32.totalorder %v2850_v41, 16 }
 0x501   :  { %2420 = vmatmul.msk.f32.gmra.mxu3 %vm4483_vm2, %v1017_v50  ;;  %v1408_v50 = vld [vmem:[%s4395_s1 + $0xa0] sm:$0xff]  ;;  %vm4489_vm2 = vmmov %vm4487_vm3 }
 0x502   :  { %vm4499_vm1 = vmmov %vm4489_vm2 }
 0x504   :  { %v1008_v58 = vpop.f32.mrf.mxu2 }
 0x505   :  { %1123 = vmatmul.f32.vlgmr.msrb.gmra.mxu1 %v1008_v58  ;;  %v1409_v58 = vld [vmem:[%s4395_s1 + $0xa8] sm:$0xff] }
 0x50c   :  { %v1011_v0 = vpop.f32.mrf.mxu2 }
 0x50d   :  { %1126 = vmatmul.f32.gmra.mxu1 %v1011_v0  ;;  %v1156_v0 = vld [vmem:[%s4395_s1 + $0x288] sm:$0x1] }
 0x514   :  { %v1078_v9 = vpop.f32.mrf.mxu2 }
 0x51c   :  { %v1081_v13 = vpop.f32.mrf.mxu2 }
 0x57c   :  { %v1049_v10 = vpop.f32.mrf.mxu3 }
 0x57d   :  { %v1079_v11 = vadd.f32 %v1078_v9, %v1049_v10 }
 0x57f   :  { %1100 = vmatmul.f32.vlgmr.msrb.gmra.mxu0 %v1079_v11 }
 0x582   :  { %v1124_v19 = vpop.f32.mrf.mxu1 }
 0x584   :  { %v1052_v14 = vpop.f32.mrf.mxu3 }
 0x585   :  { %v1082_v17 = vadd.f32 %v1081_v13, %v1052_v14 }
 0x587   :  { %1103 = vmatmul.f32.gmra.mxu0 %v1082_v17 }
 0x58a   :  { %v1127_v25 = vpop.f32.mrf.mxu1 }
 0x5fc   :  { %v1101_v20 = vpop.f32.mrf.mxu0 }
 0x5fd   :  { %v1125_v22 = vadd.f32 %v1124_v19, %v1101_v20  ;;  %v1269_v19 = vld [vmem:[%s4395_s1 + $0x60] sm:$0xff] }
 0x5ff   :  { %v1142_v24 = vadd.f32 %v1135_v16, %v1125_v22  ;;  %v2698_v22 = vpop.permute.xlu1 %2697 }
 0x601   :  { %v1145_v59 = vmax.f32 %v1142_v24, 0.0  ;;  %v1203_v24 = vld [vmem:[%s4395_s1 + $0x290] sm:$0x1] }
 0x603   :  { %v1149_v4 = vsel %vm4427_vm7, %v1145_v59, 0.0 }
 0x604   :  { %v1104_v27 = vpop.f32.mrf.mxu0 }
 0x605   :  { %v1128_v32 = vadd.f32 %v1127_v25, %v1104_v27  ;;  %v1271_v25 = vld [vmem:[%s4395_s1 + $0x70] sm:$0xff]  ;;  %v2699_v27 = vunpack.i.l.bf16 %v2698_v22 }
 0x607   :  { %v1143_v60 = vadd.f32 %v1140_v46, %v1128_v32  ;;  %v1357_v32 = vld [vmem:[%s4395_s1 + $0x90] sm:$0xff]  ;;  %v2700_v46 = vunpack.i.h.bf16 %v2698_v22 }
 0x609   :  { %v1146_v29 = vmax.f32 %v1143_v60, 0.0  ;;  %v1272_v60 = vld [vmem:[%s4395_s1 + $0x78] sm:$0xff] }
 0x60b   :  { %2459 = vmatpush.msk.msrb.mxu3 %vm4427_vm7, %v1146_v29  ;;  %v1150_v5 = vsel %vm4427_vm7, %v1146_v29, 0.0  ;;  %v1358_v29 = vld [vmem:[%s4395_s1 + $0x98] sm:$0xff] }
 0x60c   :  { %v2691_v6 = vpack.i.bf16 %v1149_v4, %v1150_v5  ;;  %v1262_v4 = vld [vmem:[%s4395_s1 + $0x48] sm:$0xff]  ;;  %v1263_v5 = vld [vmem:[%s4395_s1 + $0x50] sm:$0xff] }
 0x60d   :  { %2460 = vmatpush.msk.msrb.mxu3 %vm4427_vm7, %v1145_v59  ;;  %vm4493_vm7 = vmmov %vm4489_vm2  ;;  %v1261_v59 = vld [vmem:[%s4395_s1 + $0x40] sm:$0xff] }
 0x60e   :  { %2692 = vrot.lane.b32.xlu0 %v2691_v6, %s2795_s17  ;;  %2687 = vrot.lane.b32.xlu2 %v2691_v6, %s2794_s13  ;;  %v1264_v6 = vld [vmem:[%s4395_s1 + $0x58] sm:$0xff] }
 0x60f   :  { %2461 = vmatmul.msk.f32.vlgmr.msrb.gmra.mxu3 %vm4487_vm3, %v1156_v0  ;;  %vm4490_vm3 = vmmov %vm4488_vm9 }
 0x616   :  { %1429 = vperm.xlu0 %2625, %v1411_v48   ;;  %2702 = vrot.lane.b32.xlu2 %v2875_v63, %s2795_s17  ;;  %v1151_v63 = vld [vmem:[%s4395_s1 + $0x280] sm:$0x1] }
 0x61e   :  { %1414 = vperm.xlu0 %2625, %v1408_v50   ;;  %1419 = vperm.xlu2 %2624, %v1409_v58  }
 0x668   :  { %v2688_v9 = vpop.permute.xlu2 %2687 }
 0x669   :  { %v2689_v10 = vunpack.i.l.bf16 %v2688_v9  ;;  %v2690_v11 = vunpack.i.h.bf16 %v2688_v9 }
 0x66b   :  { %1197 = vmatpush.msra.mxu3 %v2689_v10 }
 0x66d   :  { %1198 = vmatpush.msra.mxu3 %v2690_v11 }
 0x66e   :  { %2462 = vmatmul.msk.f32.vlgmr.msra.gmra.mxu3 %vm4489_vm2, %v1151_v63 }
 0x66f   :  { %2464 = vmatpush.msk.msrb.mxu3 %vm4488_vm9, %v1258_v53  ;;  %vm4491_vm9 = vmmov %vm4489_vm2  ;;  %v1270_v53 = vld [vmem:[%s4395_s1 + $0x68] sm:$0xff] }
 0x670   :  { %v2703_v13 = vpop.permute.xlu2 %2702 }
 0x671   :  { %2465 = vmatpush.msk.msrb.mxu3 %vm4490_vm3, %v1257_v57  ;;  %v2704_v14 = vunpack.i.l.bf16 %v2703_v13  ;;  %v2705_v17 = vunpack.i.h.bf16 %v2703_v13  ;;  %vm4492_vm3 = vmmov %vm4489_vm2 }
 0x673   :  { %1389 = vmatpush.msra.mxu0 %v2704_v14 }
 0x675   :  { %1390 = vmatpush.msra.mxu0 %v2705_v17 }
 0x676   :  { %2466 = vmatmul.msk.f32.vlgmr.msrb.gmra.mxu3 %vm4491_vm9, %v1269_v19  ;;  %2474 = vmatmul.msk.f32.vlgmr.msra.gmra.mxu0 %vm4489_vm2, %v1355_v49  ;;  %vm4494_vm9 = vmmov %vm4489_vm2 }
 0x67e   :  { %2467 = vmatmul.msk.f32.gmra.mxu3 %vm4492_vm3, %v1270_v53  ;;  %2475 = vmatmul.msk.f32.gmra.mxu0 %vm4493_vm7, %v1356_v55  ;;  %vm4495_vm7 = vmmov %vm4489_vm2 }
 0x67f   :  { %vm4496_vm3 = vmmov %vm4489_vm2 }
 0x680   :  { %v2693_v57 = vpop.permute.xlu0 %2692 }
 0x681   :  { %v2694_v20 = vunpack.i.l.bf16 %v2693_v57  ;;  %v2695_v16 = vunpack.i.h.bf16 %v2693_v57 }
 0x683   :  { %1225 = vmatpush.msrb.mxu2 %v2694_v20 }
 0x685   :  { %1226 = vmatpush.msrb.mxu2 %v2695_v16  ;;  %v1420_v16 = vpop.permute.xlu2 %1419 }
 0x686   :  { %2463 = vmatmul.msk.f32.vlgmr.msrb.gmra.mxu2 %vm4494_vm9, %v1203_v24  ;;  %2468 = vmatmul.msk.f32.gmra.mxu3 %vm4495_vm7, %v1271_v25  ;;  %vm4497_vm9 = vmmov %vm4489_vm2 }
 0x687   :  { %1340 = vmatpush.msra.mxu2 %v2699_v27  ;;  %2476 = vmatmul.msk.f32.gmra.mxu0 %vm4489_vm2, %v1357_v32  ;;  %vm4498_vm7 = vmmov %vm4489_vm2 }
 0x688   :  { %v1430_v63 = vpop.permute.xlu0 %1429 }
 0x689   :  { %1341 = vmatpush.msra.mxu2 %v2700_v46 }
 0x68e   :  { %2470 = vmatmul.msk.f32.vlgmr.msra.gmra.mxu2 %vm4496_vm3, %v1261_v59  ;;  %2469 = vmatmul.msk.f32.gmra.mxu3 %vm4497_vm9, %v1272_v60  ;;  %vm4500_vm3 = vmmov %vm4499_vm1 }
 0x68f   :  { %2477 = vmatmul.msk.f32.gmra.mxu0 %vm4498_vm7, %v1358_v29 }
 0x690   :  { %v1415_v53 = vpop.permute.xlu0 %1414 }
 0x692   :  { %v1177_v48 = vpop.f32.mrf.mxu3 }
 0x696   :  { %2471 = vmatmul.msk.f32.gmra.mxu2 %vm4489_vm2, %v1262_v4 }
 0x69e   :  { %2472 = vmatmul.msk.f32.gmra.mxu2 %vm4499_vm1, %v1263_v5  ;;  %vm4501_vm1 = vcmp.lt.s32.totalorder %v2850_v41, 16 }
 0x69f   :  { %vm4502_vm9 = vmmov %vm4501_vm1 }
 0x6a0   :  { %vm4503_vm7 = vmmov %vm4501_vm1 }
 0x6a1   :  { %vm4504_vm2 = vmmov %vm4501_vm1 }
 0x6a6   :  { %2473 = vmatmul.msk.f32.gmra.mxu2 %vm4500_vm3, %v1264_v6  ;;  %vm4505_vm3 = vmmov %vm4501_vm1 }
 0x6f1   :  { %v1200_v50 = vpop.f32.mrf.mxu3 }
 0x6f2   :  { %v1201_v58 = vadd.f32 %v1200_v50, %v1177_v48  ;;  %v1425_v50 = vpop.permute.xlu1 %1424 }
 0x6f3   :  { %v1392_v11 = vpop.f32.mrf.mxu0 }
 0x6f9   :  { %v1302_v9 = vpop.f32.mrf.mxu3 }
 0x6fb   :  { %v1395_v19 = vpop.f32.mrf.mxu0 }
 0x701   :  { %v1305_v17 = vpop.f32.mrf.mxu3 }
 0x704   :  { %v1398_v32 = vpop.f32.mrf.mxu0 }
 0x709   :  { %v1228_v0 = vpop.f32.mrf.mxu2  ;;  %v1308_v24 = vpop.f32.mrf.mxu3 }
 0x70a   :  { %v3810_v10 = vadd.f32 %v1228_v0, %v1201_v58 }
 0x70c   :  { %v1401_v0 = vpop.f32.mrf.mxu0 }
 0x711   :  { %v1343_v13 = vpop.f32.mrf.mxu2  ;;  %v1311_v48 = vpop.f32.mrf.mxu3 }
 0x712   :  { %v1344_v14 = vadd.f32 %v1343_v13, %v1302_v9  ;;  %v1693_v13 = vld [vmem:[%s4395_s1 + $0x1b0] sm:$0xff] }
 0x714   :  { %v1404_v49 = vadd.f32 %v1392_v11, %v1344_v14 }
 0x716   :  { %v1432_v57 = vadd.f32 %v1415_v53, %v1404_v49  ;;  %v1690_v53 = vld [vmem:[%s4395_s1 + $0x198] sm:$0xff] }
 0x718   :  { %v1436_v25 = vmax.f32 %v1432_v57, 0.0 }
 0x719   :  { %v1346_v55 = vpop.f32.mrf.mxu2 }
 0x71a   :  { %v1347_v20 = vadd.f32 %v1346_v55, %v1305_v17  ;;  %v1440_v29 = vsel %vm4501_vm1, %v1436_v25, 0.0 }
 0x71c   :  { %v1405_v22 = vadd.f32 %v1395_v19, %v1347_v20 }
 0x71e   :  { %v1433_v27 = vadd.f32 %v1420_v16, %v1405_v22  ;;  %v1694_v22 = vld [vmem:[%s4395_s1 + $0x1b8] sm:$0xff]  ;;  %v1691_v16 = vld [vmem:[%s4395_s1 + $0x1a0] sm:$0xff] }
 0x720   :  { %v1437_v46 = vmax.f32 %v1433_v27, 0.0  ;;  %v1689_v27 = vld [vmem:[%s4395_s1 + $0x190] sm:$0xff] }
 0x721   :  { %v1349_v59 = vpop.f32.mrf.mxu2 }
 0x722   :  { %v1350_v60 = vadd.f32 %v1349_v59, %v1308_v24  ;;  %v1441_v4 = vsel %vm4502_vm9, %v1437_v46, 0.0  ;;  %vm4506_vm9 = vmmov %vm4501_vm1  ;;  %v1692_v24 = vld [vmem:[%s4395_s1 + $0x1a8] sm:$0xff] }
 0x723   :  { %v2716_v5 = vpack.i.bf16 %v1440_v29, %v1441_v4  ;;  %v1461_v29 = vld [vmem:[%s4395_s1 + $0x108] sm:$0xff]  ;;  %v1462_v4 = vld [vmem:[%s4395_s1 + $0x110] sm:$0xff] }
 0x724   :  { %v1406_v6 = vadd.f32 %v1398_v32, %v1350_v60  ;;  %v1460_v60 = vld [vmem:[%s4395_s1 + $0x100] sm:$0xff] }
 0x725   :  { %2717 = vrot.lane.b32.xlu0 %v2716_v5, %s2794_s13 }
 0x726   :  { %v1434_v9 = vadd.f32 %v1425_v50, %v1406_v6 }
 0x728   :  { %v1438_v17 = vmax.f32 %v1434_v9, 0.0 }
 0x729   :  { %v1352_v58 = vpop.f32.mrf.mxu2 }
 0x72a   :  { %v1353_v11 = vadd.f32 %v1352_v58, %v1311_v48  ;;  %v1442_v55 = vsel %vm4504_vm2, %v1438_v17, 0.0  ;;  %vm4508_vm2 = vcmask 261120  }
 0x72c   :  { %v1407_v14 = vadd.f32 %v1401_v0, %v1353_v11  ;;  %v1463_v0 = vld [vmem:[%s4395_s1 + $0x118] sm:$0xff]  ;;  %v1444_v11 = vld [vmem:[%s4395_s1 + $0xc0] sm:$0xff] }
 0x72d   :  { %1727 = vperm.xlu0 %2625, %v1693_v13  }
 0x72e   :  { %v1435_v19 = vadd.f32 %v1430_v63, %v1407_v14  ;;  %v1687_v63 = vld [vmem:[%s4395_s1 + $0x180] sm:$0xff] }
 0x730   :  { %v1439_v49 = vmax.f32 %v1435_v19, 0.0  ;;  %v1598_v19 = vld [vmem:[%s4395_s1 + $0x140] sm:$0xff] }
 0x732   :  { %2478 = vmatpush.msk.msra.mxu1 %vm4503_vm7, %v1439_v49  ;;  %v1443_v57 = vsel %vm4505_vm3, %v1439_v49, 0.0  ;;  %vm4507_vm7 = vmmov %vm4501_vm1  ;;  %v1464_v49 = vld [vmem:[%s4395_s1 + $0x120] sm:$0xff] }
 0x733   :  { %v2711_v20 = vpack.i.bf16 %v1442_v55, %v1443_v57  ;;  %vm4509_vm3 = vmmov %vm4508_vm2  ;;  %v1599_v55 = vld [vmem:[%s4395_s1 + $0x148] sm:$0xff] }
 0x734   :  { %2479 = vmatpush.msk.msra.mxu1 %vm4501_vm1, %v1438_v17  ;;  %vm4510_vm1 = vmmov %vm4508_vm2  ;;  %v1465_v57 = vld [vmem:[%s4395_s1 + $0x128] sm:$0xff] }
 0x735   :  { %1712 = vperm.xlu0 %2625, %v1690_v53   ;;  %2712 = vrot.lane.b32.xlu2 %v2711_v20, %s2795_s17  ;;  %v1445_v53 = vld [vmem:[%s4395_s1 + $0xc8] sm:$0xff] }
 0x736   :  { %2707 = vrot.lane.b32.xlu1 %v2711_v20, %s2794_s13  ;;  %2480 = vmatpush.msk.msra.mxu1 %vm4506_vm9, %v1437_v46  ;;  %vm4511_vm9 = vmmov %vm4510_vm1  ;;  %v1446_v20 = vld [vmem:[%s4395_s1 + $0xd0] sm:$0xff] }
 0x738   :  { %2481 = vmatpush.msk.msra.mxu1 %vm4507_vm7, %v1436_v25  ;;  %v1688_v25 = vld [vmem:[%s4395_s1 + $0x188] sm:$0xff]  ;;  %vm4512_vm7 = vmmov %vm4510_vm1 }
 0x739   :  { %2482 = vmatmul.msk.f32.vlgmr.msra.gmra.mxu1 %vm4508_vm2, %v1460_v60  ;;  %vm4513_vm2 = vcmp.eq.s32.totalorder %v2850_v41, %v3227_v61 }
 0x73d   :  { %1697 = vperm.xlu0 %2625, %v1687_v63   ;;  %1732 = vperm.xlu2 %2624, %v1694_v22   ;;  %v1600_v63 = vld [vmem:[%s4395_s1 + $0x150] sm:$0xff] }
 0x73e   :  { %2722 = vrot.lane.b32.xlu1 %v2716_v5, %s2795_s17  ;;  %v1466_v22 = vld [vmem:[%s4395_s1 + $0x130] sm:$0xff] }
 0x741   :  { %2483 = vmatmul.msk.f32.gmra.mxu1 %vm4509_vm3, %v1461_v29  ;;  %vm4514_vm3 = vcmp.eq.s32.totalorder %v2850_v41, %v3266_v7 }
 0x745   :  { %1717 = vperm.xlu2 %2624, %v1691_v16   ;;  %v1447_v16 = vld [vmem:[%s4395_s1 + $0xd8] sm:$0xff] }
 0x746   :  { %1722 = vperm.xlu1 %2623, %v1692_v24   ;;  %v1601_v24 = vld [vmem:[%s4395_s1 + $0x158] sm:$0xff] }
 0x749   :  { %2484 = vmatmul.msk.f32.gmra.mxu1 %vm4510_vm1, %v1462_v4 }
 0x74d   :  { %1702 = vperm.xlu2 %2624, %v1688_v25   ;;  %v1467_v25 = vld [vmem:[%s4395_s1 + $0x138] sm:$0xff] }
 0x74e   :  { %1707 = vperm.xlu1 %2623, %v1689_v27   ;;  %v1448_v27 = vld [vmem:[%s4395_s1 + $0xe0] sm:$0xff] }
 0x751   :  { %2485 = vmatmul.msk.f32.gmra.mxu1 %vm4511_vm9, %v1463_v0  ;;  %vm4515_vm9 = vcmp.eq.s32.totalorder %v2850_v41, %v3279_v51 }
 0x78f   :  { %v2713_v32 = vpop.permute.xlu2 %2712 }
 0x790   :  { %v2714_v46 = vunpack.i.l.bf16 %v2713_v32  ;;  %v2715_v59 = vunpack.i.h.bf16 %v2713_v32  ;;  %v1602_v32 = vld [vmem:[%s4395_s1 + $0x160] sm:$0xff] }
 0x792   :  { %1650 = vmatpush.msrb.mxu2 %v2714_v46  ;;  %v1449_v46 = vld [vmem:[%s4395_s1 + $0xe8] sm:$0xff] }
 0x794   :  { %1651 = vmatpush.msrb.mxu2 %v2715_v59  ;;  %v1603_v59 = vld [vmem:[%s4395_s1 + $0x168] sm:$0xff] }
 0x797   :  { %v2718_v48 = vpop.permute.xlu0 %2717 }
 0x798   :  { %v2719_v58 = vunpack.i.l.bf16 %v2718_v48  ;;  %v2720_v9 = vunpack.i.h.bf16 %v2718_v48 }
 0x7a8   :  { %v2708_v5 = vpop.permute.xlu1 %2707 }
 0x7a9   :  { %v2709_v6 = vunpack.i.l.bf16 %v2708_v5  ;;  %v2710_v50 = vunpack.i.h.bf16 %v2708_v5 }
 0x7ab   :  { %1569 = vmatpush.msra.mxu3 %v2709_v6 }
 0x7ad   :  { %1570 = vmatpush.msra.mxu3 %v2710_v50 }
 0x7af   :  { %1571 = vmatpush.msra.mxu3 %v2719_v58 }
 0x7b0   :  { %v2723_v13 = vpop.permute.xlu1 %2722 }
 0x7b1   :  { %v2724_v14 = vunpack.i.l.bf16 %v2723_v13  ;;  %1572 = vmatpush.msra.mxu3 %v2720_v9  ;;  %v2725_v17 = vunpack.i.h.bf16 %v2723_v13  ;;  %v1970_v13 = vld [vmem:[%s4395_s1 + $0x230] sm:$0xff] }
 0x7b2   :  { %2490 = vmatmul.msk.f32.vlgmr.msra.gmra.mxu3 %vm4512_vm7, %v1444_v11  ;;  %vm4516_vm7 = vmmov %vm4510_vm1 }
 0x7b3   :  { %1652 = vmatpush.msrb.mxu2 %v2724_v14  ;;  %2534 = vmatpush.msk.msrb.mxu3 %vm4513_vm2, %v2796_v52  ;;  %vm4517_vm2 = vmmov %vm4510_vm1 }
 0x7b4   :  { %2486 = vmatmul.msk.f32.gmra.mxu1 %vm4516_vm7, %v1464_v49  ;;  %vm4521_vm7 = vmmov %vm4517_vm2 }
 0x7b5   :  { %1653 = vmatpush.msrb.mxu2 %v2725_v17  ;;  %2535 = vmatpush.msk.msrb.mxu3 %vm4514_vm3, %v2796_v52  ;;  %vm4518_vm3 = vcmp.eq.s32.totalorder %v2850_v41, %v3439_v33 }
 0x7b6   :  { %2498 = vmatmul.msk.f32.vlgmr.msrb.gmra.mxu2 %vm4510_vm1, %v1598_v19  ;;  %vm4519_vm1 = vnez %v4440_v62  ;;  %v1509_v62 = vpop.f32.mrf.mxu1 }
 0x7b7   :  { %2550 = vmatpush.msk.msra.mxu2 %vm3198_vm4, %v2796_v52  ;;  %2536 = vmatpush.msk.msrb.mxu3 %vm4515_vm9, %v2796_v52  ;;  %vm4520_vm9 = vcmp.eq.s32.totalorder %v2850_v41, %v3446_v34 }
 0x7b9   :  { %2551 = vmatpush.msk.msra.mxu2 %vm3203_vm5, %v2796_v52  ;;  %2537 = vmatpush.msk.msrb.mxu3 %vm4518_vm3, %v2796_v52  ;;  %vm4523_vm3 = vcmp.eq.s32.totalorder %v2850_v41, %v3450_v36 }
 0x7ba   :  { %2491 = vmatmul.msk.f32.gmra.mxu3 %vm4517_vm2, %v1445_v53  ;;  %vm4522_vm2 = vnez %v4442_v3 }
 0x7bb   :  { %2552 = vmatpush.msk.msra.mxu2 %vm3216_vm6, %v2796_v52  ;;  %2538 = vmatpush.msk.msrb.mxu3 %vm4520_vm9, %v2796_v52  ;;  %vm4524_vm9 = vmmov %vm4521_vm7 }
 0x7bc   :  { %2487 = vmatmul.msk.f32.gmra.mxu1 %vm4524_vm9, %v1465_v57  ;;  %vm4526_vm9 = vcmp.eq.s32.totalorder %v2850_v41, %v3494_v37 }
 0x7bd   :  { %2553 = vmatpush.msk.msra.mxu2 %vm4519_vm1, %v2796_v52  ;;  %2539 = vmatpush.msk.msrb.mxu3 %vm4523_vm3, %v2796_v52  ;;  %vm4525_vm3 = vcmp.eq.s32.totalorder %v2850_v41, %v3487_v35 }
 0x7be   :  { %2499 = vmatmul.msk.f32.gmra.mxu2 %vm4521_vm7, %v1599_v55  ;;  %v1512_v3 = vpop.f32.mrf.mxu1 }
 0x7bf   :  { %2554 = vmatpush.msk.msra.mxu2 %vm4522_vm2, %v2796_v52  ;;  %2540 = vmatpush.msk.msrb.mxu3 %vm4525_vm3, %v2796_v52  ;;  %vm4527_vm3 = vcmp.eq.s32.totalorder %v2850_v41, %v3498_v38 }
 0x7c1   :  { %2555 = vmatpush.msk.msra.mxu2 %vm3271_vm10, %v2796_v52  ;;  %2541 = vmatpush.msk.msrb.mxu3 %vm4526_vm9, %v2796_v52  ;;  %vm4528_vm9 = vmmov %vm4521_vm7 }
 0x7c2   :  { %2492 = vmatmul.msk.f32.gmra.mxu3 %vm4521_vm7, %v1446_v20 }
 0x7c3   :  { %2556 = vmatpush.msk.msra.mxu2 %vm3290_vm12, %v2796_v52  ;;  %2542 = vmatpush.msk.msrb.mxu3 %vm4527_vm3, %v2796_v52  ;;  %vm4530_vm3 = vcmp.eq.s32.totalorder %v2850_v41, %v3502_v39 }
 0x7c4   :  { %2488 = vmatmul.msk.f32.gmra.mxu1 %vm4528_vm9, %v1466_v22  ;;  %vm4531_vm9 = vnez %v4456_v21  ;;  %v1723_v21 = vpop.permute.xlu1 %1722 }
 0x7c5   :  { %2557 = vmatpush.msk.msra.mxu2 %vm3310_vm14, %v2796_v52  ;;  %2543 = vmatpush.msk.msrb.mxu3 %vm4530_vm3, %v2796_v52  ;;  %vm4534_vm3 = vcmp.eq.s32.totalorder %v2850_v41, %v3544_v40 }
 0x7c6   :  { %2500 = vmatmul.msk.f32.gmra.mxu2 %vm4521_vm7, %v1600_v63  ;;  %v1515_v54 = vpop.f32.mrf.mxu1 }
 0x7c7   :  { %2558 = vmatpush.msk.msra.mxu2 %vm3328_vm15, %v2796_v52  ;;  %vm4529_vm15 = vnez %v4454_v18 }
 0x7c9   :  { %2559 = vmatpush.msk.msra.mxu2 %vm3343_vm0, %v2796_v52  ;;  %vm4533_vm0 = vcmask 261120  }
 0x7ca   :  { %2493 = vmatmul.msk.f32.gmra.mxu3 %vm4521_vm7, %v1447_v16  ;;  %vm4532_vm7 = vcmp.eq.s32.totalorder %v2850_v41, %v3533_v31 }
 0x7cb   :  { %2560 = vmatpush.msk.msra.mxu2 %vm4529_vm15, %v2796_v52  ;;  %2544 = vmatpush.msk.msrb.mxu3 %vm4532_vm7, %v2796_v52  ;;  %vm4535_vm7 = vmmov %vm4533_vm0 }
 0x7cc   :  { %2489 = vmatmul.msk.f32.gmra.mxu1 %vm4535_vm7, %v1467_v25  ;;  %vm4537_vm7 = vnez %v4464_v30 }
 0x7cd   :  { %2561 = vmatpush.msk.msra.mxu2 %vm4531_vm9, %v2796_v52  ;;  %2545 = vmatpush.msk.msrb.mxu3 %vm4534_vm3, %v2796_v52  ;;  %vm4536_vm3 = vcmp.eq.s32.totalorder %v2850_v41, %v3546_v42 }
 0x7ce   :  { %2501 = vmatmul.msk.f32.gmra.mxu2 %vm4533_vm0, %v1601_v24  ;;  %v1518_v18 = vpop.f32.mrf.mxu1 }
 0x7cf   :  { %2562 = vmatpush.msk.msra.mxu2 %vm3381_vm13, %v2796_v52  ;;  %2546 = vmatpush.msk.msrb.mxu3 %vm4536_vm3, %v2796_v52  ;;  %vm4541_vm3 = vcmp.eq.s32.totalorder %v2850_v41, %v3585_v2 }
 0x7d1   :  { %2563 = vmatpush.msk.msra.mxu2 %vm3393_vm11, %v2796_v52  ;;  %vm4539_vm11 = vcmask 261120  }
 0x7d2   :  { %2494 = vmatmul.msk.f32.gmra.mxu3 %vm4533_vm0, %v1448_v27  ;;  %vm4538_vm0 = vcmp.eq.s32.totalorder %v2850_v41, %v3550_v45 }
 0x7d3   :  { %2564 = vmatpush.msk.msra.mxu2 %vm3405_vm8, %v2796_v52  ;;  %2547 = vmatpush.msk.msrb.mxu3 %vm4538_vm0, %v2796_v52  ;;  %vm4540_vm8 = vcmp.eq.s32.totalorder %v2850_v41, %v3579_v1  ;;  %vm4545_vm0 = vcmp.eq.s32.totalorder %v2850_v41, %v3279_v51 }
 0x7d5   :  { %2565 = vmatpush.msk.msra.mxu2 %vm4537_vm7, %v2796_v52  ;;  %2548 = vmatpush.msk.msrb.mxu3 %vm4540_vm8, %v2796_v52  ;;  %vm4542_vm8 = vcmp.eq.s32.totalorder %v2850_v41, %v3227_v61  ;;  %v1605_v61 = vld [vmem:[%s4395_s1 + $0x178] sm:$0xff] }
 0x7d6   :  { %2502 = vmatmul.msk.f32.gmra.mxu2 %vm4539_vm11, %v1602_v32 }
 0x7d7   :  { %2596 = vmatpush.msk.msrb.mxu2 %vm3198_vm4, %v2796_v52  ;;  %2549 = vmatpush.msk.msrb.mxu3 %vm4541_vm3, %v2796_v52  ;;  %vm4543_vm4 = vcmp.eq.s32.totalorder %v2850_v41, %v3266_v7  ;;  %vm4548_vm3 = vcmp.eq.s32.totalorder %v2850_v41, %v3446_v34 }
 0x7d9   :  { %2597 = vmatpush.msk.msrb.mxu2 %vm3203_vm5, %v2796_v52  ;;  %2580 = vmatpush.msk.msra.mxu3 %vm4542_vm8, %v2796_v52  ;;  %vm4544_vm5 = vmmov %vm4539_vm11  ;;  %vm4553_vm8 = vcmp.eq.s32.totalorder %v2850_v41, %v3494_v37 }
 0x7da   :  { %2495 = vmatmul.msk.f32.gmra.mxu3 %vm4539_vm11, %v1449_v46  ;;  %vm4551_vm11 = vcmp.eq.s32.totalorder %v2850_v41, %v3487_v35  ;;  %v1708_v35 = vpop.permute.xlu1 %1707 }
 0x7db   :  { %2598 = vmatpush.msk.msrb.mxu2 %vm3216_vm6, %v2796_v52  ;;  %2581 = vmatpush.msk.msra.mxu3 %vm4543_vm4, %v2796_v52  ;;  %vm4546_vm6 = vcmp.eq.s32.totalorder %v2850_v41, %v3439_v33 }
 0x7dd   :  { %2599 = vmatpush.msk.msrb.mxu2 %vm4519_vm1, %v2796_v52  ;;  %2582 = vmatpush.msk.msra.mxu3 %vm4545_vm0, %v2796_v52  ;;  %vm4547_vm1 = vmmov %vm4544_vm5  ;;  %vm4557_vm0 = vcmp.eq.s32.totalorder %v2850_v41, %v3502_v39 }
 0x7de   :  { %2503 = vmatmul.msk.f32.gmra.mxu2 %vm4544_vm5, %v1603_v59  ;;  %vm4555_vm4 = vmmov %vm4547_vm1  ;;  %vm4556_vm5 = vcmp.eq.s32.totalorder %v2850_v41, %v3498_v38 }
 0x7df   :  { %2600 = vmatpush.msk.msrb.mxu2 %vm4522_vm2, %v2796_v52  ;;  %2583 = vmatpush.msk.msra.mxu3 %vm4546_vm6, %v2796_v52  ;;  %vm4549_vm2 = vcmp.eq.s32.totalorder %v2850_v41, %v3450_v36  ;;  %vm4558_vm6 = vmmov %vm4547_vm1 }
 0x7e1   :  { %2601 = vmatpush.msk.msrb.mxu2 %vm3271_vm10, %v2796_v52  ;;  %2584 = vmatpush.msk.msra.mxu3 %vm4548_vm3, %v2796_v52  ;;  %vm4550_vm10 = vmmov %vm4547_vm1  ;;  %vm4561_vm3 = vnez %v4460_v26 }
 0x7e2   :  { %2496 = vmatmul.msk.f32.gmra.mxu3 %vm4547_vm1, %v1450_v43  ;;  %vm4559_vm1 = vcmp.eq.s32.totalorder %v2850_v41, %v3533_v31 }
 0x7e3   :  { %2602 = vmatpush.msk.msrb.mxu2 %vm3290_vm12, %v2796_v52  ;;  %2585 = vmatpush.msk.msra.mxu3 %vm4549_vm2, %v2796_v52  ;;  %vm4552_vm12 = vnez %v4450_v12  ;;  %vm4563_vm2 = vnez %v4462_v28  ;;  %v1728_v28 = vpop.permute.xlu0 %1727 }
 0x7e5   :  { %2603 = vmatpush.msk.msrb.mxu2 %vm3310_vm14, %v2796_v52  ;;  %2586 = vmatpush.msk.msra.mxu3 %vm4551_vm11, %v2796_v52  ;;  %vm4554_vm14 = vnez %v4452_v15  ;;  %vm4566_vm11 = vcmp.eq.s32.totalorder %v2850_v41, %v3585_v2 }
 0x7e6   :  { %2504 = vmatmul.msk.f32.gmra.mxu2 %vm4550_vm10, %v1604_v44  ;;  %vm4565_vm10 = vcmp.eq.s32.totalorder %v2850_v41, %v3579_v1  ;;  %v1971_v44 = vld [vmem:[%s4395_s1 + $0x238] sm:$0xff] }
 0x7e7   :  { %2604 = vmatpush.msk.msrb.mxu2 %vm4552_vm12, %v2796_v52  ;;  %2587 = vmatpush.msk.msra.mxu3 %vm4553_vm8, %v2796_v52 }
 0x7e9   :  { %2605 = vmatpush.msk.msrb.mxu2 %vm4554_vm14, %v2796_v52  ;;  %2588 = vmatpush.msk.msra.mxu3 %vm4556_vm5, %v2796_v52 }
 0x7ea   :  { %2497 = vmatmul.msk.f32.gmra.mxu3 %vm4555_vm4, %v1451_v56 }
 0x7eb   :  { %2606 = vmatpush.msk.msrb.mxu2 %vm4529_vm15, %v2796_v52  ;;  %2589 = vmatpush.msk.msra.mxu3 %vm4557_vm0, %v2796_v52  ;;  %vm4560_vm15 = vcmp.eq.s32.totalorder %v2850_v41, %v3544_v40  ;;  %v1713_v31 = vpop.permute.xlu0 %1712 }
 0x7ed   :  { %2607 = vmatpush.msk.msrb.mxu2 %vm4531_vm9, %v2796_v52  ;;  %2590 = vmatpush.msk.msra.mxu3 %vm4559_vm1, %v2796_v52  ;;  %vm4562_vm9 = vcmp.eq.s32.totalorder %v2850_v41, %v3546_v42 }
 0x7ee   :  { %2505 = vmatmul.msk.f32.gmra.mxu2 %vm4558_vm6, %v1605_v61 }
 0x7ef   :  { %2608 = vmatpush.msk.msrb.mxu2 %vm3381_vm13, %v2796_v52  ;;  %2591 = vmatpush.msk.msra.mxu3 %vm4560_vm15, %v2796_v52  ;;  %vm4564_vm13 = vcmp.eq.s32.totalorder %v2850_v41, %v3550_v45  ;;  %v1733_v45 = vpop.permute.xlu2 %1732 }
 0x7f1   :  { %2609 = vmatpush.msk.msrb.mxu2 %vm4561_vm3, %v2796_v52  ;;  %2592 = vmatpush.msk.msra.mxu3 %vm4562_vm9, %v2796_v52 }
 0x7f3   :  { %2610 = vmatpush.msk.msrb.mxu2 %vm4563_vm2, %v2796_v52  ;;  %2593 = vmatpush.msk.msra.mxu3 %vm4564_vm13, %v2796_v52 }
 0x7f5   :  { %2611 = vmatpush.msk.msrb.mxu2 %vm4537_vm7, %v2796_v52  ;;  %2594 = vmatpush.msk.msra.mxu3 %vm4565_vm10, %v2796_v52  ;;  %vm4567_vm7 = vcmp.lt.s32.totalorder %v2850_v41, 16 }
 0x7f6   :  { %vm4568_vm12 = vmmov %vm4567_vm7 }
 0x7f7   :  { %2595 = vmatpush.msk.msra.mxu3 %vm4566_vm11, %v2796_v52  ;;  %v1718_v9 = vpop.permute.xlu2 %1717  ;;  %vm4569_vm8 = vmmov %vm4567_vm7 }
 0x7f8   :  { %vm4570_vm14 = vmmov %vm4567_vm7 }
 0x7f9   :  { %vm4571_vm4 = vmmov %vm4567_vm7 }
 0x7fa   :  { %vm4572_vm5 = vmmov %vm4571_vm4 }
 0x7fb   :  { %vm4573_vm0 = vmmov %vm4571_vm4 }
 0x7fc   :  { %vm4574_vm6 = vmmov %vm4573_vm0 }
 0x7fd   :  { %vm4575_vm1 = vmmov %vm4573_vm0 }
 0x7fe   :  { %vm4576_vm15 = vmmov %vm4573_vm0 }
 0x7ff   :  { %vm4577_vm3 = vmmov %vm4573_vm0 }
 0x800   :  { %vm4578_vm9 = vmmov %vm4573_vm0 }
 0x801   :  { %vm4579_vm2 = vmmov %vm4573_vm0 }
 0x802   :  { %vm4580_vm13 = vmmov %vm4573_vm0 }
 0x803   :  { %vm4581_vm10 = vmmov %vm4573_vm0 }
 0x804   :  { %vm4582_vm11 = vmmov %vm4573_vm0 }
 0x831   :  { %v1521_v36 = vpop.f32.mrf.mxu1 }
 0x835   :  { %v1574_v7 = vpop.f32.mrf.mxu3 }
 0x836   :  { %v1575_v47 = vadd.f32 %v1574_v7, %v1509_v62 }
 0x839   :  { %v1655_v51 = vpop.f32.mrf.mxu2  ;;  %v1524_v60 = vpop.f32.mrf.mxu1 }
 0x83a   :  { %v4176_v8 = vadd.f32 %v1655_v51, %v1575_v47  ;;  %v1703_v51 = vpop.permute.xlu2 %1702 }
 0x83d   :  { %v1577_v12 = vpop.f32.mrf.mxu3 }
 0x83e   :  { %v1578_v46 = vadd.f32 %v1577_v12, %v1512_v3 }
 0x841   :  { %v1658_v15 = vpop.f32.mrf.mxu2  ;;  %v1527_v17 = vpop.f32.mrf.mxu1 }
 0x842   :  { %v1680_v61 = vadd.f32 %v1658_v15, %v1578_v46  ;;  %v1968_v15 = vld [vmem:[%s4395_s1 + $0x220] sm:$0xff] }
 0x845   :  { %v1580_v23 = vpop.f32.mrf.mxu3 }
 0x846   :  { %v1581_v26 = vadd.f32 %v1580_v23, %v1515_v54  ;;  %v1736_v54 = vadd.f32 %v1703_v51, %v1680_v61 }
 0x849   :  { %v1661_v30 = vpop.f32.mrf.mxu2  ;;  %v1530_v25 = vpop.f32.mrf.mxu1 }
 0x84a   :  { %v1681_v33 = vadd.f32 %v1661_v30, %v1581_v26 }
 0x84c   :  { %v1737_v37 = vadd.f32 %v1708_v35, %v1681_v33  ;;  %v2152_v33 = vld [vmem:[%s4395_s1 + $0x278] sm:$0xff]  ;;  %v1759_v35 = vld [vmem:[%s4395_s1 + $0x1e0] sm:$0xff] }
 0x84d   :  { %v1583_v34 = vpop.f32.mrf.mxu3 }
 0x84e   :  { %v1584_v52 = vadd.f32 %v1583_v34, %v1518_v18  ;;  %v4178_v40 = vmax.f32 %v1737_v37, 0.0  ;;  %v1760_v37 = vld [vmem:[%s4395_s1 + $0x1e8] sm:$0xff] }
 0x850   :  { %v1753_v4 = vsel %vm4567_vm7, %v4178_v40, 0.0  ;;  %vm4583_vm7 = vmmov %vm4573_vm0 }
 0x851   :  { %v1664_v38 = vpop.f32.mrf.mxu2 }
 0x852   :  { %v1682_v39 = vadd.f32 %v1664_v38, %v1584_v52  ;;  %v1969_v52 = vld [vmem:[%s4395_s1 + $0x228] sm:$0xff]  ;;  %v1761_v38 = vld [vmem:[%s4395_s1 + $0x1f0] sm:$0xff] }
 0x854   :  { %v1738_v42 = vadd.f32 %v1713_v31, %v1682_v39  ;;  %v1762_v39 = vld [vmem:[%s4395_s1 + $0x1f8] sm:$0xff]  ;;  %v1804_v31 = vld [vmem:[%s4395_s1 + $0x200] sm:$0xff] }
 0x855   :  { %v1586_v1 = vpop.f32.mrf.mxu3 }
 0x856   :  { %v4180_v2 = vmax.f32 %v1738_v42, 0.0  ;;  %v1587_v29 = vadd.f32 %v1586_v1, %v1521_v36  ;;  %v1806_v1 = vld [vmem:[%s4395_s1 + $0x210] sm:$0xff] }
 0x858   :  { %v1754_v5 = vsel %vm4568_vm12, %v4180_v2, 0.0  ;;  %vm4584_vm12 = vmmov %vm4573_vm0 }
 0x859   :  { %v1667_v6 = vpop.f32.mrf.mxu2  ;;  %v2736_v48 = vpack.i.bf16 %v1753_v4, %v1754_v5 }
 0x85a   :  { %v1683_v50 = vadd.f32 %v1667_v6, %v1587_v29 }
 0x85b   :  { %2737 = vrot.lane.b32.xlu0 %v2736_v48, %s2795_s17  ;;  %v1807_v48 = vld [vmem:[%s4395_s1 + $0x218] sm:$0xff] }
 0x85c   :  { %v1739_v11 = vadd.f32 %v1718_v9, %v1683_v50 }
 0x85d   :  { %v1589_v58 = vpop.f32.mrf.mxu3 }
 0x85e   :  { %v1590_v0 = vadd.f32 %v1589_v58, %v1524_v60  ;;  %v1747_v49 = vmax.f32 %v1739_v11, 0.0  ;;  %v1808_v11 = vld [vmem:[%s4395_s1 + $0x1c0] sm:$0xff] }
 0x860   :  { %v1755_v63 = vsel %vm4569_vm8, %v1747_v49, 0.0  ;;  %vm4585_vm8 = vmmov %vm4573_vm0 }
 0x861   :  { %v1670_v14 = vpop.f32.mrf.mxu2 }
 0x862   :  { %v1684_v19 = vadd.f32 %v1670_v14, %v1590_v0  ;;  %v1810_v14 = vld [vmem:[%s4395_s1 + $0x1d0] sm:$0xff] }
 0x863   :  { %1984 = vperm.xlu0 %2625, %v1970_v13   ;;  %v1809_v13 = vld [vmem:[%s4395_s1 + $0x1c8] sm:$0xff] }
 0x864   :  { %v1740_v53 = vadd.f32 %v1723_v21, %v1684_v19  ;;  %v1698_v21 = vpop.permute.xlu0 %1697 }
 0x865   :  { %v1592_v55 = vpop.f32.mrf.mxu3  ;;  %v1735_v23 = vadd.f32 %v1698_v21, %v4176_v8 }
 0x866   :  { %v1748_v57 = vmax.f32 %v1740_v53, 0.0  ;;  %v1593_v20 = vadd.f32 %v1592_v55, %v1527_v17  ;;  %v1811_v17 = vld [vmem:[%s4395_s1 + $0x1d8] sm:$0xff] }
 0x867   :  { %v1743_v8 = vmax.f32 %v1735_v23, 0.0 }
 0x868   :  { %v1756_v22 = vsel %vm4570_vm14, %v1748_v57, 0.0  ;;  %vm4586_vm14 = vmmov %vm4573_vm0 }
 0x869   :  { %v1673_v16 = vpop.f32.mrf.mxu2  ;;  %v2731_v24 = vpack.i.bf16 %v1755_v63, %v1756_v22  ;;  %v1751_v34 = vsel %vm4584_vm12, %v1743_v8, 0.0 }
 0x86a   :  { %v1685_v27 = vadd.f32 %v1673_v16, %v1593_v20 }
 0x86b   :  { %2732 = vrot.lane.b32.xlu2 %v2731_v24, %s2795_s17 }
 0x86c   :  { %v1741_v43 = vadd.f32 %v1728_v28, %v1685_v27  ;;  %v1744_v28 = vmax.f32 %v1736_v54, 0.0 }
 0x86d   :  { %v1595_v32 = vpop.f32.mrf.mxu3 }
 0x86e   :  { %v1596_v59 = vadd.f32 %v1595_v32, %v1530_v25  ;;  %v1749_v7 = vmax.f32 %v1741_v43, 0.0  ;;  %v1752_v30 = vsel %vm4581_vm10, %v1744_v28, 0.0 }
 0x86f   :  { %v2741_v36 = vpack.i.bf16 %v1751_v34, %v1752_v30 }
 0x870   :  { %v1757_v3 = vsel %vm4573_vm0, %v1749_v7, 0.0 }
 0x871   :  { %v1676_v56 = vpop.f32.mrf.mxu2 }
 0x872   :  { %v1686_v62 = vadd.f32 %v1676_v56, %v1596_v59 }
 0x873   :  { %1989 = vperm.xlu2 %2624, %v1971_v44  }
 0x874   :  { %v1742_v47 = vadd.f32 %v1733_v45, %v1686_v62 }
 0x876   :  { %v1750_v18 = vmax.f32 %v1742_v47, 0.0 }
 0x878   :  { %2506 = vmatpush.msk.msrb.mxu0 %vm4571_vm4, %v1750_v18  ;;  %2522 = vmatpush.msk.msrb.mxu1 %vm4572_vm5, %v1750_v18  ;;  %v1758_v12 = vsel %vm4574_vm6, %v1750_v18, 0.0  ;;  %vm4587_vm4 = vmmov %vm4573_vm0 }
 0x879   :  { %v2726_v26 = vpack.i.bf16 %v1757_v3, %v1758_v12  ;;  %vm4588_vm5 = vmmov %vm4573_vm0 }
 0x87a   :  { %2507 = vmatpush.msk.msrb.mxu0 %vm4575_vm1, %v1749_v7  ;;  %2523 = vmatpush.msk.msrb.mxu1 %vm4576_vm15, %v1749_v7  ;;  %vm4589_vm6 = vmmov %vm4573_vm0  ;;  %vm4590_vm1 = vcmask 523264  }
 0x87b   :  { %2727 = vrot.lane.b32.xlu1 %v2726_v26, %s2795_s17  ;;  %1974 = vperm.xlu2 %2624, %v1968_v15   ;;  %vm4591_vm15 = vmmov %vm4590_vm1 }
 0x87c   :  { %2508 = vmatpush.msk.msrb.mxu0 %vm4577_vm3, %v1748_v57  ;;  %2524 = vmatpush.msk.msrb.mxu1 %vm4578_vm9, %v1748_v57  ;;  %vm4592_vm3 = vmmov %vm4590_vm1 }
 0x87d   :  { %vm4593_vm9 = vmmov %vm4590_vm1 }
 0x87e   :  { %2509 = vmatpush.msk.msrb.mxu0 %vm4579_vm2, %v1747_v49  ;;  %2525 = vmatpush.msk.msrb.mxu1 %vm4580_vm13, %v1747_v49  ;;  %vm4594_vm2 = vmmov %vm4590_vm1 }
 0x87f   :  { %vm4595_vm13 = vmmov %vm4590_vm1 }
 0x880   :  { %2510 = vmatpush.msk.msrb.mxu0 %vm4582_vm11, %v4180_v2  ;;  %2526 = vmatpush.msk.msrb.mxu1 %vm4583_vm7, %v4180_v2  ;;  %vm4596_vm10 = vmmov %vm4590_vm1 }
 0x881   :  { %vm4597_vm11 = vmmov %vm4590_vm1 }
 0x882   :  { %2511 = vmatpush.msk.msrb.mxu0 %vm4585_vm8, %v4178_v40  ;;  %2527 = vmatpush.msk.msrb.mxu1 %vm4586_vm14, %v4178_v40  ;;  %v1805_v40 = vld [vmem:[%s4395_s1 + $0x208] sm:$0xff]  ;;  %vm4598_vm7 = vmmov %vm4590_vm1 }
 0x883   :  { %2160 = vperm.xlu2 %2624, %v2152_v33   ;;  %2742 = vrot.lane.b32.xlu1 %v2741_v36, %s2795_s17  ;;  %vm4599_vm12 = vmmov %vm4590_vm1 }
 0x884   :  { %2512 = vmatpush.msk.msrb.mxu0 %vm4587_vm4, %v1744_v28  ;;  %2528 = vmatpush.msk.msrb.mxu1 %vm4588_vm5, %v1744_v28  ;;  %vm4600_vm8 = vmmov %vm4590_vm1  ;;  %vm4602_vm4 = vcmp.lt.s32.totalorder %v2850_v41, 32 }
 0x885   :  { %vm4601_vm14 = vmmov %vm4590_vm1 }
 0x886   :  { %2513 = vmatpush.msk.msrb.mxu0 %vm4573_vm0, %v1743_v8  ;;  %2529 = vmatpush.msk.msrb.mxu1 %vm4589_vm6, %v1743_v8  ;;  %vm4603_vm5 = vmmov %vm4602_vm4 }
 0x887   :  { %2514 = vmatmul.msk.f32.vlgmr.msrb.gmra.mxu0 %vm4590_vm1, %v1759_v35  ;;  %2530 = vmatmul.msk.f32.vlgmr.msrb.gmra.mxu1 %vm4594_vm2, %v1804_v31  ;;  %vm4604_vm0 = vmmov %vm4602_vm4 }
 0x888   :  { %vm4605_vm6 = vmmov %vm4604_vm0 }
 0x889   :  { %vm4606_vm1 = vmmov %vm4604_vm0 }
 0x88a   :  { %vm4610_vm2 = vmmov %vm4604_vm0 }
 0x88b   :  { %1979 = vperm.xlu1 %2623, %v1969_v52  }
 0x88f   :  { %2515 = vmatmul.msk.f32.gmra.mxu0 %vm4591_vm15, %v1760_v37  ;;  %2531 = vmatmul.msk.f32.gmra.mxu1 %vm4595_vm13, %v1805_v40  ;;  %vm4607_vm15 = vmmov %vm4604_vm0 }
 0x890   :  { %vm4611_vm13 = vmmov %vm4604_vm0 }
 0x897   :  { %2516 = vmatmul.msk.f32.gmra.mxu0 %vm4592_vm3, %v1761_v38  ;;  %2532 = vmatmul.msk.f32.gmra.mxu1 %vm4596_vm10, %v1806_v1  ;;  %vm4608_vm3 = vmmov %vm4604_vm0  ;;  %v2151_v1 = vld [vmem:[%s4395_s1 + $0x270] sm:$0xff] }
 0x898   :  { %vm4612_vm10 = vmmov %vm4604_vm0 }
 0x89f   :  { %2517 = vmatmul.msk.f32.gmra.mxu0 %vm4593_vm9, %v1762_v39  ;;  %2533 = vmatmul.msk.f32.gmra.mxu1 %vm4597_vm11, %v1807_v48  ;;  %vm4609_vm9 = vmmov %vm4604_vm0 }
 0x8a0   :  { %vm4613_vm11 = vmmov %vm4604_vm0 }
 0x8c5   :  { %v2733_v2 = vpop.permute.xlu2 %2732 }
 0x8c6   :  { %v2734_v29 = vunpack.i.l.bf16 %v2733_v2  ;;  %v2735_v5 = vunpack.i.h.bf16 %v2733_v2  ;;  %v1232_v2 = vld [vmem:[%s4395_s1 + $0x298] sm:$0x1] }
 0x8cd   :  { %v2738_v4 = vpop.permute.xlu0 %2737  ;;  %v1990_v56 = vpop.permute.xlu2 %1989 }
 0x8ce   :  { %v2739_v6 = vunpack.i.l.bf16 %v2738_v4  ;;  %v2740_v58 = vunpack.i.h.bf16 %v2738_v4  ;;  %v2035_v4 = vld [vmem:[%s4395_s1 + $0x260] sm:$0xff] }
 0x8d5   :  { %v1975_v47 = vpop.permute.xlu2 %1974  ;;  %v1985_v34 = vpop.permute.xlu0 %1984 }
 0x8ed   :  { %v2728_v42 = vpop.permute.xlu1 %2727 }
 0x8ee   :  { %v2729_v45 = vunpack.i.l.bf16 %v2728_v42  ;;  %v2730_v60 = vunpack.i.h.bf16 %v2728_v42 }
 0x8f0   :  { %1848 = vmatpush.msra.mxu0 %v2729_v45 }
 0x8f2   :  { %1849 = vmatpush.msra.mxu0 %v2730_v60  ;;  %v2004_v60 = vld [vmem:[%s4395_s1 + $0x250] sm:$0xff] }
 0x8f4   :  { %1850 = vmatpush.msra.mxu0 %v2734_v29  ;;  %v2005_v29 = vld [vmem:[%s4395_s1 + $0x258] sm:$0xff] }
 0x8f5   :  { %v2743_v50 = vpop.permute.xlu1 %2742 }
 0x8f6   :  { %1851 = vmatpush.msra.mxu0 %v2735_v5  ;;  %v2744_v0 = vunpack.i.l.bf16 %v2743_v50  ;;  %v2745_v9 = vunpack.i.h.bf16 %v2743_v50  ;;  %v2036_v5 = vld [vmem:[%s4395_s1 + $0x268] sm:$0xff] }
 0x8f8   :  { %1852 = vmatpush.msra.mxu0 %v2739_v6 }
 0x8fa   :  { %1853 = vmatpush.msra.mxu0 %v2740_v58 }
 0x8fc   :  { %1854 = vmatpush.msra.mxu0 %v2744_v0 }
 0x8fd   :  { %v1980_v21 = vpop.permute.xlu1 %1979 }
 0x8fe   :  { %1855 = vmatpush.msra.mxu0 %v2745_v9 }
 0x8ff   :  { %2518 = vmatmul.msk.f32.vlgmr.msra.gmra.mxu0 %vm4598_vm7, %v1808_v11  ;;  %vm4614_vm7 = vcmask 261120   ;;  %v2037_v11 = vld [vmem:[%s4395_s1 + $0x240] sm:$0xff] }
 0x904   :  { %v1792_v19 = vpop.f32.mrf.mxu0  ;;  %v1898_v57 = vpop.f32.mrf.mxu1 }
 0x905   :  { %1955 = vmatmul.f32.vlgmr.msra.gmra.mxu2 %v1792_v19 }
 0x907   :  { %2519 = vmatmul.msk.f32.gmra.mxu0 %vm4599_vm12, %v1809_v13  ;;  %vm4615_vm12 = vmmov %vm4614_vm7 }
 0x90c   :  { %v1795_v49 = vpop.f32.mrf.mxu0  ;;  %v1901_v22 = vpop.f32.mrf.mxu1 }
 0x90d   :  { %1958 = vmatmul.f32.gmra.mxu2 %v1795_v49 }
 0x90f   :  { %2520 = vmatmul.msk.f32.gmra.mxu0 %vm4600_vm8, %v1810_v14  ;;  %vm4616_vm8 = vmmov %vm4614_vm7  ;;  %v2038_v14 = vld [vmem:[%s4395_s1 + $0x248] sm:$0xff] }
 0x914   :  { %v1798_v53 = vpop.f32.mrf.mxu0  ;;  %v1904_v25 = vpop.f32.mrf.mxu1 }
 0x915   :  { %1961 = vmatmul.f32.gmra.mxu2 %v1798_v53 }
 0x917   :  { %2521 = vmatmul.msk.f32.gmra.mxu0 %vm4601_vm14, %v1811_v17  ;;  %vm4617_vm14 = vmmov %vm4614_vm7 }
 0x91c   :  { %v1801_v55 = vpop.f32.mrf.mxu0  ;;  %v1907_v46 = vpop.f32.mrf.mxu1 }
 0x91d   :  { %1964 = vmatmul.f32.gmra.mxu2 %v1801_v55 }
 0x97c   :  { %v1857_v20 = vpop.f32.mrf.mxu0 }
 0x97d   :  { %v1899_v63 = vadd.f32 %v1898_v57, %v1857_v20 }
 0x97f   :  { %1926 = vmatmul.f32.vlgmr.msrb.gmra.mxu3 %v1899_v63 }
 0x984   :  { %v1860_v16 = vpop.f32.mrf.mxu0 }
 0x985   :  { %v1902_v24 = vadd.f32 %v1901_v22, %v1860_v16 }
 0x987   :  { %1929 = vmatmul.f32.gmra.mxu3 %v1902_v24 }
 0x988   :  { %v1956_v44 = vpop.f32.mrf.mxu2 }
 0x98c   :  { %v1863_v27 = vpop.f32.mrf.mxu0 }
 0x98d   :  { %v1905_v32 = vadd.f32 %v1904_v25, %v1863_v27 }
 0x98f   :  { %1932 = vmatmul.f32.gmra.mxu3 %v1905_v32 }
 0x990   :  { %v1959_v7 = vpop.f32.mrf.mxu2 }
 0x994   :  { %v1866_v59 = vpop.f32.mrf.mxu0 }
 0x995   :  { %v1908_v43 = vadd.f32 %v1907_v46, %v1866_v59 }
 0x997   :  { %1935 = vmatmul.f32.gmra.mxu3 %v1908_v43 }
 0x998   :  { %v1962_v15 = vpop.f32.mrf.mxu2 }
 0x9a0   :  { %v1965_v52 = vpop.f32.mrf.mxu2 }
 0xa02   :  { %v1927_v61 = vpop.f32.mrf.mxu3 }
 0xa03   :  { %v1957_v62 = vadd.f32 %v1956_v44, %v1927_v61 }
 0xa05   :  { %v1992_v51 = vadd.f32 %v1975_v47, %v1957_v62 }
 0xa07   :  { %v1996_v23 = vmax.f32 %v1992_v51, 0.0 }
 0xa09   :  { %v2000_v26 = vsel %vm4602_vm4, %v1996_v23, 0.0  ;;  %vm4618_vm4 = vmmov %vm4614_vm7 }
 0xa0a   :  { %v1930_v54 = vpop.f32.mrf.mxu3 }
 0xa0b   :  { %v1960_v18 = vadd.f32 %v1959_v7, %v1930_v54 }
 0xa0d   :  { %v1993_v3 = vadd.f32 %v1980_v21, %v1960_v18  ;;  %v2250_v18 = vld [vmem:[%s4395_s1 + $0x298] sm:$0x1]  ;;  %v2174_v21 = vld [vmem:[%s4395_s1 + $0x288] sm:$0x1] }
 0xa0f   :  { %v1997_v12 = vmax.f32 %v1993_v3, 0.0 }
 0xa11   :  { %v2001_v28 = vsel %vm4603_vm5, %v1997_v12, 0.0  ;;  %vm4619_vm5 = vmmov %vm4618_vm4 }
 0xa12   :  { %v1933_v8 = vpop.f32.mrf.mxu3  ;;  %v2751_v30 = vpack.i.bf16 %v2000_v26, %v2001_v28 }
 0xa13   :  { %v1963_v33 = vadd.f32 %v1962_v15, %v1933_v8  ;;  %v2221_v15 = vld [vmem:[%s4395_s1 + $0x290] sm:$0x1] }
 0xa14   :  { %2752 = vrot.lane.b32.xlu1 %v2751_v30, %s2795_s17  ;;  %v2169_v30 = vld [vmem:[%s4395_s1 + $0x280] sm:$0x1]  ;;  %s2798_s1 = smov 16  }
 0xa15   :  { %v1994_v36 = vadd.f32 %v1985_v34, %v1963_v33 }
 0xa17   :  { %v1998_v38 = vmax.f32 %v1994_v36, 0.0 }
 0xa19   :  { %v2002_v40 = vsel %vm4605_vm6, %v1998_v38, 0.0 }
 0xa1a   :  { %v1936_v35 = vpop.f32.mrf.mxu3 }
 0xa1b   :  { %v1966_v37 = vadd.f32 %v1965_v52, %v1936_v35 }
 0xa1d   :  { %v1995_v39 = vadd.f32 %v1990_v56, %v1966_v37  ;;  %v2161_v56 = vpop.permute.xlu2 %2160 }
 0xa1f   :  { %v1999_v31 = vmax.f32 %v1995_v39, 0.0 }
 0xa21   :  { %2566 = vmatpush.msk.msrb.mxu0 %vm4604_vm0, %v1999_v31  ;;  %v2003_v42 = vsel %vm4606_vm1, %v1999_v31, 0.0  ;;  %vm4620_vm0 = vcmp.lt.s32.totalorder %v2850_v41, 64 }
 0xa22   :  { %v2746_v45 = vpack.i.bf16 %v2002_v40, %v2003_v42  ;;  %vm4621_vm6 = vmmov %vm4620_vm0 }
 0xa23   :  { %2567 = vmatpush.msk.msrb.mxu0 %vm4607_vm15, %v1998_v38  ;;  %vm4622_vm1 = vmmov %vm4620_vm0 }
 0xa24   :  { %2747 = vrot.lane.b32.xlu0 %v2746_v45, %s2795_s17  ;;  %vm4623_vm15 = vmmov %vm4620_vm0 }
 0xa25   :  { %2568 = vmatpush.msk.msrb.mxu0 %vm4608_vm3, %v1997_v12  ;;  %vm4624_vm3 = vmmov %vm4620_vm0 }
 0xa27   :  { %2569 = vmatpush.msk.msrb.mxu0 %vm4609_vm9, %v1996_v23  ;;  %vm4625_vm9 = vcmask 130048  }
 0xa28   :  { %2570 = vmatmul.msk.f32.vlgmr.msrb.gmra.mxu0 %vm4614_vm7, %v2004_v60 }
 0xa29   :  { %2574 = vmatpush.msk.msra.mxu0 %vm4610_vm2, %v1999_v31  ;;  %vm4626_vm2 = vmmov %vm4625_vm9 }
 0xa2b   :  { %2575 = vmatpush.msk.msra.mxu0 %vm4611_vm13, %v1998_v38  ;;  %vm4627_vm13 = vmmov %vm4626_vm2 }
 0xa2c   :  { %2155 = vperm.xlu0 %2625, %v2151_v1  }
 0xa2d   :  { %2576 = vmatpush.msk.msra.mxu0 %vm4612_vm10, %v1997_v12  ;;  %vm4628_vm10 = vmmov %vm4620_vm0 }
 0xa2f   :  { %2577 = vmatpush.msk.msra.mxu0 %vm4613_vm11, %v1996_v23 }
 0xa30   :  { %2571 = vmatmul.msk.f32.gmra.mxu0 %vm4615_vm12, %v2005_v29 }
 0xa34   :  { %1235 = vperm.xlu0 %2625, %v1232_v2  }
 0xa38   :  { %2578 = vmatmul.msk.f32.vlgmr.msra.gmra.mxu0 %vm4616_vm8, %v2035_v4 }
 0xa40   :  { %2579 = vmatmul.msk.f32.gmra.mxu0 %vm4617_vm14, %v2036_v5 }
 0xa86   :  { %v2753_v50 = vpop.permute.xlu1 %2752 }
 0xa87   :  { %v2754_v0 = vunpack.i.l.bf16 %v2753_v50  ;;  %v2755_v9 = vunpack.i.h.bf16 %v2753_v50 }
 0xa96   :  { %v2748_v6 = vpop.permute.xlu0 %2747 }
 0xa97   :  { %v2749_v48 = vunpack.i.l.bf16 %v2748_v6  ;;  %v2750_v58 = vunpack.i.h.bf16 %v2748_v6 }
 0xa99   :  { %2065 = vmatpush.msra.mxu1 %v2749_v48 }
 0xa9b   :  { %2066 = vmatpush.msra.mxu1 %v2750_v58 }
 0xa9d   :  { %2067 = vmatpush.msra.mxu1 %v2754_v0 }
 0xa9e   :  { %v2156_v13 = vpop.permute.xlu0 %2155 }
 0xa9f   :  { %2068 = vmatpush.msra.mxu1 %v2755_v9 }
 0xaa0   :  { %2572 = vmatmul.msk.f32.vlgmr.msra.gmra.mxu1 %vm4618_vm4, %v2037_v11 }
 0xaa5   :  { %v2029_v55 = vpop.f32.mrf.mxu0 }
 0xaa6   :  { %v1236_v17 = vpop.permute.xlu0 %1235  ;;  %2144 = vmatmul.f32.vlgmr.msrb.gmra.mxu2 %v2029_v55 }
 0xaa7   :  { %v1238_v19 = vadd.f32 %v1236_v17, %v3810_v10 }
 0xaa8   :  { %2573 = vmatmul.msk.f32.gmra.mxu1 %vm4619_vm5, %v2038_v14 }
 0xaa9   :  { %v1239_v49 = vmax.f32 %v1238_v19, 0.0 }
 0xaab   :  { %v1240_v53 = vsel %vm4620_vm0, %v1239_v49, 0.0 }
 0xaac   :  { %1241 = vst [vmem:[#allocation2] sm:$0x1] %v1240_v53 }
 0xaad   :  { %v2032_v57 = vpop.f32.mrf.mxu0 }
 0xaae   :  { %2147 = vmatmul.f32.gmra.mxu2 %v2032_v57 }
 0xab5   :  { %v2099_v20 = vpop.f32.mrf.mxu0 }
 0xabd   :  { %v2102_v16 = vpop.f32.mrf.mxu0 }
 0xb1d   :  { %v2070_v63 = vpop.f32.mrf.mxu1 }
 0xb1e   :  { %v2100_v22 = vadd.f32 %v2099_v20, %v2070_v63 }
 0xb20   :  { %2121 = vmatmul.f32.vlgmr.msra.gmra.mxu3 %v2100_v22 }
 0xb25   :  { %v2073_v24 = vpop.f32.mrf.mxu1 }
 0xb26   :  { %v2103_v25 = vadd.f32 %v2102_v16, %v2073_v24 }
 0xb28   :  { %2124 = vmatmul.f32.gmra.mxu3 %v2103_v25 }
 0xb29   :  { %v2145_v10 = vpop.f32.mrf.mxu2 }
 0xb31   :  { %v2148_v43 = vpop.f32.mrf.mxu2 }
 0xba3   :  { %v2122_v27 = vpop.f32.mrf.mxu3 }
 0xba4   :  { %v2146_v32 = vadd.f32 %v2145_v10, %v2122_v27 }
 0xba6   :  { %v2163_v46 = vadd.f32 %v2156_v13, %v2146_v32 }
 0xba8   :  { %v2165_v61 = vmax.f32 %v2163_v46, 0.0 }
 0xbaa   :  { %v2167_v47 = vsel %vm4622_vm1, %v2165_v61, 0.0 }
 0xbab   :  { %v2125_v59 = vpop.f32.mrf.mxu3 }
 0xbac   :  { %v2149_v44 = vadd.f32 %v2148_v43, %v2125_v59 }
 0xbae   :  { %v2164_v62 = vadd.f32 %v2161_v56, %v2149_v44 }
 0xbb0   :  { %v2166_v7 = vmax.f32 %v2164_v62, 0.0 }
 0xbb2   :  { %2612 = vmatpush.msk.msrb.mxu1 %vm4621_vm6, %v2166_v7  ;;  %v2168_v51 = vsel %vm4623_vm15, %v2166_v7, 0.0 }
 0xbb3   :  { %v2761_v54 = vpack.i.bf16 %v2167_v47, %v2168_v51 }
 0xbb4   :  { %2613 = vmatpush.msk.msrb.mxu1 %vm4624_vm3, %v2165_v61 }
 0xbb5   :  { %2762 = vrot.lane.b32.xlu2 %v2761_v54, %s2795_s17  ;;  %2757 = vrot.lane.b32.xlu1 %v2761_v54, %s2794_s13 }
 0xbb6   :  { %2614 = vmatmul.msk.f32.vlgmr.msrb.gmra.mxu1 %vm4625_vm9, %v2174_v21 }
 0xbbd   :  { %2253 = vperm.xlu1 %2623, %v2250_v18  }
 0xc0f   :  { %v2763_v23 = vpop.permute.xlu2 %2762 }
 0xc10   :  { %v2764_v3 = vunpack.i.l.bf16 %v2763_v23  ;;  %v2765_v12 = vunpack.i.h.bf16 %v2763_v23 }
 0xc12   :  { %2243 = vmatpush.msrb.mxu0 %v2764_v3 }
 0xc14   :  { %2244 = vmatpush.msrb.mxu0 %v2765_v12 }
 0xc15   :  { %2616 = vmatmul.msk.f32.vlgmr.msrb.gmra.mxu0 %vm4626_vm2, %v2221_v15 }
 0xc27   :  { %v2758_v26 = vpop.permute.xlu1 %2757 }
 0xc28   :  { %v2759_v28 = vunpack.i.l.bf16 %v2758_v26  ;;  %v2760_v8 = vunpack.i.h.bf16 %v2758_v26 }
 0xc2a   :  { %2215 = vmatpush.msra.mxu1 %v2759_v28 }
 0xc2c   :  { %2216 = vmatpush.msra.mxu1 %v2760_v8 }
 0xc2d   :  { %2615 = vmatmul.msk.f32.vlgmr.msra.gmra.mxu1 %vm4627_vm13, %v2169_v30 }
 0xc2f   :  { %v2254_v37 = vpop.permute.xlu1 %2253 }
 0xc33   :  { %v2195_v33 = vpop.f32.mrf.mxu1 }
 0xc92   :  { %v2246_v36 = vpop.f32.mrf.mxu0 }
 0xcaa   :  { %v2218_v34 = vpop.f32.mrf.mxu1 }
 0xcab   :  { %v2219_v52 = vadd.f32 %v2218_v34, %v2195_v33 }
 0xcad   :  { %v2249_v35 = vadd.f32 %v2246_v36, %v2219_v52 }
 0xcaf   :  { %v2256_v38 = vadd.f32 %v2254_v37, %v2249_v35 }
 0xcb1   :  { %v2257_v39 = vmax.f32 %v2256_v38, 0.0 }
 0xcb3   :  { %v2258_v31 = vsel %vm4628_vm10, %v2257_v39, 0.0 }
 0xcb4   :  { %2260 = vst [vmem:[#allocation2 + $0x1] sm:$0x1] %v2258_v31 }
 0xcb5   :  { %2273 = dma.vmem_to_hbm [thread:$0]  %s2266_s7, 32, %s2268_s10, [#allocation3], %s2798_s1, %s2798_s1, %s2794_s13  }
 0xcb6   :  { %2791 = dma.done.wait [#allocation3], 32  }
 0xcb7   :  { %2792 = vsyncadd [#allocation3], 4294967264 }
 0xcb8   :  { %2278 = vsyncpa [#allocation3], 1 }

</bundles_post_ra>
